<compile_context>
chip_gen: v7x
topology: tpu7x:2x2x1
jax: 0.10.0
libtpu: 0.0.40
codegen_flags: <defaults>
</compile_context>

<pallas_src>
import numpy as np

import jax
import jax.numpy as jnp
from jax.experimental import pallas as pl
from jax.experimental.pallas import tpu as pltpu

NEG_SLOPE = 0.01                      # nn.LeakyReLU default negative_slope
BN_EPS = 1e-5                         # nn.BatchNorm2d default eps
REF_PREC = jax.lax.Precision.HIGHEST  # gold reference only
TAPS = tuple((dh, dw) for dh in (-1, 0, 1) for dw in (-1, 0, 1))


def _pad8(c):
    return ((c + 7) // 8) * 8


def _pad128(n):
    return ((n + 127) // 128) * 128


# --------------------------------------------------------------------------
# Static operator construction (host-side numpy, traced in as kernel inputs)
# --------------------------------------------------------------------------
def tap_masks(H, W, N, P):
    """(9, P) 0/1 masks.  mask[t, n*H*W + h*W + w] == 1 iff tap (dh, dw) of
    output pixel (h, w) stays inside the image.  Padding lanes (>= N*H*W) are
    always 0, which also kills any cross-image contamination of the rolls."""
    HW = H * W
    m = np.zeros((9, P), np.float32)
    for t, (dh, dw) in enumerate(TAPS):
        for h in range(H):
            if not (0 <= h + dh < H):
                continue
            for w in range(W):
                if not (0 <= w + dw < W):
                    continue
                for n in range(N):
                    m[t, n * HW + h * W + w] = 1.0
    return m


def resize_matrix(Hi, Wi, Pi, Ho, Wo, Po, N):
    """Bilinear align_corners=True resize as a (Pi, Po) right-multiply
    operator on the (C, Pi) batched+flattened layout (pad rows/cols zero)."""
    def mat1d(o, i):
        R = np.zeros((o, i), np.float32)
        for k in range(o):
            src = 0.0 if o == 1 else k * (i - 1) / (o - 1)
            j0 = int(np.floor(src))
            j1 = min(j0 + 1, i - 1)
            a = src - j0
            R[k, j0] += 1.0 - a
            R[k, j1] += a
        return R

    K = np.kron(mat1d(Ho, Hi), mat1d(Wo, Wi))          # (Ho*Wo, Hi*Wi)
    M = np.zeros((Pi, Po), np.float32)
    hwi, hwo = Hi * Wi, Ho * Wo
    for n in range(N):
        M[n * hwi:(n + 1) * hwi, n * hwo:(n + 1) * hwo] = K.T
    return M


def pack_conv_weights(w9, segments, cout_pad, scale=None):
    """(9, Cout, sum(real_c)) tap-major conv weights -> (cout_pad,
    9*sum(pad_c)) GEMM weight matching the im2col row layout
    concat_t [ concat_segments (rolled, channel-padded x) ].
    BN per-channel scale (if given) is folded into the rows."""
    w9 = np.asarray(w9, np.float32)
    _, cout, _ = w9.shape
    if scale is not None:
        w9 = w9 * np.asarray(scale, np.float32)[None, :, None]
    cin_pad_total = sum(p for _, p in segments)
    W = np.zeros((cout_pad, 9 * cin_pad_total), np.float32)
    for t in range(9):
        src = 0
        dst = t * cin_pad_total
        for real_c, pad_c in segments:
            W[:cout, dst:dst + real_c] = w9[t, :, src:src + real_c]
            src += real_c
            dst += pad_c
    return W


def pack_bias(bias, cout_pad):
    bias = np.asarray(bias, np.float32)
    b = np.zeros((cout_pad, 1), np.float32)
    b[:bias.shape[0], 0] = bias
    return b


# --------------------------------------------------------------------------
# Deterministic parameter construction (mirrors Decoder.__init__ shapes)
# Conv weights stored as (9, Cout, Cin) with tap index t = kh*3 + kw.
# --------------------------------------------------------------------------
def init_conv_params(key, cin, cout):
    kw, kb = jax.random.split(key)
    w = jax.random.normal(kw, (9, cout, cin), jnp.float32) / np.sqrt(9.0 * cin)
    b = 0.05 * jax.random.normal(kb, (cout,), jnp.float32)
    return w, b


def init_bn_params(key, c):
    k1, k2, k3, k4 = jax.random.split(key, 4)
    gamma = 1.0 + 0.1 * jax.random.normal(k1, (c,), jnp.float32)
    beta = 0.1 * jax.random.normal(k2, (c,), jnp.float32)
    mean = 0.1 * jax.random.normal(k3, (c,), jnp.float32)
    var = 0.9 + 0.1 * jnp.abs(jax.random.normal(k4, (c,), jnp.float32))
    return gamma, beta, mean, var


def build_decoder_params(key, features, num_classes=1, bottleneck_features=32):
    keys = iter(jax.random.split(key, 64))
    params = {}
    params["bottleneck"] = [
        init_conv_params(next(keys), features[0], bottleneck_features),
        init_conv_params(next(keys), bottleneck_features, bottleneck_features),
    ]
    feats = [bottleneck_features] + list(features[1:])
    num_layers = len(feats) - 1
    ups = []
    for i in range(num_layers):
        cin = feats[i] + feats[i + 1]
        cout = feats[i + 1]
        conv1 = init_conv_params(next(keys), cin, cout)
        bn1 = init_bn_params(next(keys), cout)
        conv2 = init_conv_params(next(keys), cout, cout)
        bn2 = init_bn_params(next(keys), cout)
        ups.append((conv1, bn1, conv2, bn2))
    params["up"] = ups
    params["final"] = init_conv_params(next(keys), feats[-1], num_classes)
    params["num_layers"] = num_layers
    return params


# --------------------------------------------------------------------------
# Fused decoder forward: one pallas_call for the whole module (NCHW in/out)
# --------------------------------------------------------------------------
def decoder_forward(params, feats_nchw):
    L = params["num_layers"]
    N = feats_nchw["layer0"].shape[0]
    num_classes = params["final"][0].shape[1]

    sizes = {k: tuple(feats_nchw[f"layer{k}"].shape[2:]) for k in range(L + 1)}
    chans = {k: feats_nchw[f"layer{k}"].shape[1] for k in range(L + 1)}
    HW = {k: sizes[k][0] * sizes[k][1] for k in range(L + 1)}
    P = {k: _pad128(N * HW[k]) for k in range(L + 1)}

    operands, idx = [], {}

    def add(name, arr):
        idx[name] = len(operands)
        operands.append(jnp.asarray(arr, jnp.float32))

    # encoder features: NCHW -> (C_pad, N*H*W) with batch folded into lanes
    def prep_feature(f, c_pad, p):
        n, c, h, w = f.shape
        x = jnp.transpose(f, (1, 0, 2, 3)).reshape(c, n * h * w)
        return jnp.pad(x, ((0, c_pad - c), (0, p - n * h * w)))

    feat_cpad = {k: _pad8(chans[k]) for k in range(L + 1)}
    for k in range(L + 1):
        add(f"feat{k}",
            prep_feature(feats_nchw[f"layer{k}"], feat_cpad[k], P[k]))

    # per-level 3x3 border/seam masks
    for k in range(L + 1):
        add(f"mask{k}", tap_masks(sizes[k][0], sizes[k][1], N, P[k]))

    # conv weights (BN scale folded) + per-out-channel bias
    conv_meta = {}           # tag -> (level, cin_pad_total, cout_pad)
    resize_meta = []         # (cprev_pad, P_src, P_dst)

    def add_conv(tag, level, w9, bias, segments, scale=None):
        cout = w9.shape[1]
        cout_pad = _pad8(cout)
        add("w_" + tag, pack_conv_weights(w9, segments, cout_pad, scale))
        add("b_" + tag, pack_bias(bias, cout_pad))
        conv_meta[tag] = (level, sum(p for _, p in segments), cout_pad)

    def fold_bn(conv_b, bn):
        gamma, beta, mean, var = (np.asarray(v, np.float32) for v in bn)
        scale = gamma / np.sqrt(var + BN_EPS)
        bias = beta + (np.asarray(conv_b, np.float32) - mean) * scale
        return scale, bias

    (wb1, bb1), (wb2, bb2) = params["bottleneck"]
    bneck = wb1.shape[1]
    add_conv("b1", L, wb1, bb1, [(chans[L], feat_cpad[L])])
    add_conv("b2", L, wb2, bb2, [(bneck, _pad8(bneck))])

    prev_c = bneck
    for i in range(1, L + 1):
        lvl = L - i
        (w1, b1), bn1, (w2, b2), bn2 = params["up"][i - 1]
        cout = w1.shape[1]
        add(f"resize{i}",
            resize_matrix(sizes[lvl + 1][0], sizes[lvl + 1][1], P[lvl + 1],
                          sizes[lvl][0], sizes[lvl][1], P[lvl], N))
        resize_meta.append((_pad8(prev_c), P[lvl + 1], P[lvl]))
        s1, bias1 = fold_bn(b1, bn1)
        # torch.cat([resized, residual], dim=1) becomes a channel (sublane)
        # concat of the two padded activations; weights are packed to match.
        add_conv(f"u{i}_1", lvl, w1, bias1,
                 [(prev_c, _pad8(prev_c)), (chans[lvl], feat_cpad[lvl])],
                 scale=s1)
        s2, bias2 = fold_bn(b2, bn2)
        add_conv(f"u{i}_2", lvl, w2, bias2, [(cout, _pad8(cout))], scale=s2)
        prev_c = cout

    wf, bf = params["final"]
    add_conv("fin", 0, wf, bf, [(prev_c, _pad8(prev_c))])

    # ---------------------------- fused kernel ----------------------------
    def kernel(*refs):
        out_ref = refs[-1]

        def R(name):
            return refs[idx[name]]

        def conv3x3(x, tag, leaky):
            level = conv_meta[tag][0]
            img_w = sizes[level][1]
            p = P[level]
            masks = R(f"mask{level}")[...]                    # (9, p)
            cols = []
            for t, (dh, dw) in enumerate(TAPS):
                shift = (-(dh * img_w + dw)) % p
                shifted = x if shift == 0 else pltpu.roll(x, shift=shift,
                                                          axis=1)
                cols.append(shifted * masks[t:t + 1, :])      # border + seam
            patch = jnp.concatenate(cols, axis=0)             # (9*Cin_pad, p)
            y = jnp.dot(R("w_" + tag)[...], patch,
                        preferred_element_type=jnp.float32)   # one MXU GEMM
            y = y + R("b_" + tag)[...]                        # folded BN bias
            if leaky:
                y = jnp.where(y >= 0.0, y, NEG_SLOPE * y)
            return y

        # bottleneck: Conv+LeakyReLU, Conv+LeakyReLU (no BN)
        x = R(f"feat{L}")[...]
        x = conv3x3(x, "b1", leaky=True)
        x = conv3x3(x, "b2", leaky=True)
        # UpSample blocks: bilinear resize -> channel concat -> Conv/BN/LReLU x2
        for i in range(1, L + 1):
            lvl = L - i
            xr = jnp.dot(x, R(f"resize{i}")[...],
                         preferred_element_type=jnp.float32)
            x = jnp.concatenate([xr, R(f"feat{lvl}")[...]], axis=0)
            x = conv3x3(x, f"u{i}_1", leaky=True)
            x = conv3x3(x, f"u{i}_2", leaky=True)
        # final conv (no activation); dense (num_classes, P0) store
        y = conv3x3(x, "fin", leaky=False)
        out_ref[...] = y[0:out_ref.shape[0], :]

    # ---------------------------- cost estimate ----------------------------
    flops = 0
    for _tag, (lvl, cin_pad, cout_pad) in conv_meta.items():
        flops += 2 * cout_pad * 9 * cin_pad * P[lvl]
    for cprev_pad, p_src, p_dst in resize_meta:
        flops += 2 * cprev_pad * p_src * p_dst
    bytes_accessed = (sum(int(op.size) * 4 for op in operands)
                      + num_classes * P[0] * 4)

    out = pl.pallas_call(
        kernel,
        out_shape=jax.ShapeDtypeStruct((num_classes, P[0]), jnp.float32),
        cost_estimate=pl.CostEstimate(flops=int(flops), transcendentals=0,
                                      bytes_accessed=int(bytes_accessed)),
    )(*operands)

    h0, w0 = sizes[0]
    out = out[:, :N * HW[0]].reshape(num_classes, N, h0, w0)
    return jnp.transpose(out, (1, 0, 2, 3))                   # NCHW


# --------------------------------------------------------------------------
# Pure JAX/XLA reference (independent path) for a correctness check
# --------------------------------------------------------------------------
def reference_decoder(params, feats_nchw):
    L = params["num_layers"]

    def conv(x, w9, b):
        cout, cin = w9.shape[1], w9.shape[2]
        w = jnp.transpose(w9.reshape(3, 3, cout, cin), (2, 3, 0, 1))  # OIHW
        y = jax.lax.conv_general_dilated(
            x, w, window_strides=(1, 1), padding=((1, 1), (1, 1)),
            dimension_numbers=("NCHW", "OIHW", "NCHW"), precision=REF_PREC)
        return y + b.reshape(1, -1, 1, 1)

    def bn(x, gamma, beta, mean, var):
        inv = (gamma / jnp.sqrt(var + BN_EPS)).reshape(1, -1, 1, 1)
        return (x - mean.reshape(1, -1, 1, 1)) * inv + beta.reshape(1, -1, 1, 1)

    def lrelu(x):
        return jnp.where(x >= 0, x, NEG_SLOPE * x)

    def resize(x, Ho, Wo):
        _, _, Hi, Wi = x.shape

        def coords(o, i):
            if o == 1:
                return jnp.zeros((1,), jnp.float32)
            return jnp.arange(o, dtype=jnp.float32) * ((i - 1) / (o - 1))

        hs, ws = coords(Ho, Hi), coords(Wo, Wi)
        h0 = jnp.floor(hs).astype(jnp.int32)
        w0 = jnp.floor(ws).astype(jnp.int32)
        h1 = jnp.minimum(h0 + 1, Hi - 1)
        w1 = jnp.minimum(w0 + 1, Wi - 1)
        ah = (hs - h0.astype(jnp.float32)).reshape(1, 1, Ho, 1)
        aw = (ws - w0.astype(jnp.float32)).reshape(1, 1, 1, Wo)
        x00 = x[:, :, h0][:, :, :, w0]
        x01 = x[:, :, h0][:, :, :, w1]
        x10 = x[:, :, h1][:, :, :, w0]
        x11 = x[:, :, h1][:, :, :, w1]
        top = x00 * (1.0 - aw) + x01 * aw
        bot = x10 * (1.0 - aw) + x11 * aw
        return top * (1.0 - ah) + bot * ah

    out = feats_nchw[f"layer{L}"]
    (w1, b1), (w2, b2) = params["bottleneck"]
    out = lrelu(conv(out, w1, b1))
    out = lrelu(conv(out, w2, b2))
    for i in range(1, L + 1):
        residual = feats_nchw[f"layer{L - i}"]
        (cw1, cb1), bnp1, (cw2, cb2), bnp2 = params["up"][i - 1]
        x = resize(out, residual.shape[2], residual.shape[3])
        f = jnp.concatenate([x, residual], axis=1)
        f = lrelu(bn(conv(f, cw1, cb1), *bnp1))
        out = lrelu(bn(conv(f, cw2, cb2), *bnp2))
    fw, fb = params["final"]
    return conv(out, fw, fb)


if __name__ == "__main__":
    N = 2
    num_classes = 1
    # Encoder channel list (PyTorch: Decoder(features=[16, 8, 4],
    # bottleneck_features=32)) -> num_layers = 2.
    features_ch = [16, 8, 4]
    bottleneck_features = 32

    params = build_decoder_params(
        jax.random.PRNGKey(1), features_ch, num_classes, bottleneck_features)

    key = jax.random.PRNGKey(0)
    k2, k1, k0 = jax.random.split(key, 3)
    feats = {  # PyTorch-style NCHW encoder features (deepest = layer2).
        "layer2": jax.random.normal(k2, (N, 16, 4, 4), jnp.float32),
        "layer1": jax.random.normal(k1, (N, 8, 8, 8), jnp.float32),
        "layer0": jax.random.normal(k0, (N, 4, 16, 16), jnp.float32),
    }

    out = decoder_forward(params, feats)          # NCHW in, NCHW out
    jax.block_until_ready(out)
    assert out.shape == (N, num_classes, 16, 16), out.shape
    assert bool(jnp.all(jnp.isfinite(out)))

    ref = reference_decoder(params, feats)
    diff = out - ref
    max_abs = float(jnp.max(jnp.abs(diff)))
    rel_fro = float(jnp.linalg.norm(diff.ravel())
                    / jnp.linalg.norm(ref.ravel()))
    # Default-precision MXU (bf16 passes) with f32 accumulation: expect
    # rel ~<1e-2, max_abs ~<3e-2; a structural bug would give rel ~O(1).
    assert rel_fro < 3e-2 and max_abs < 1.5e-1, (max_abs, rel_fro)
    print("KERNEL_OK")
</pallas_src>

<mosaic_0001>
module attributes {stable_mosaic.version = 11 : i64} {
  func.func @kernel(%arg0: memref<8x512xf32, #tpu.memory_space<vmem>>, %arg1: memref<8x128xf32, #tpu.memory_space<vmem>>, %arg2: memref<16x128xf32, #tpu.memory_space<vmem>>, %arg3: memref<9x512xf32, #tpu.memory_space<vmem>>, %arg4: memref<9x128xf32, #tpu.memory_space<vmem>>, %arg5: memref<9x128xf32, #tpu.memory_space<vmem>>, %arg6: memref<32x144xf32, #tpu.memory_space<vmem>>, %arg7: memref<32x1xf32, #tpu.memory_space<vmem>>, %arg8: memref<32x288xf32, #tpu.memory_space<vmem>>, %arg9: memref<32x1xf32, #tpu.memory_space<vmem>>, %arg10: memref<128x128xf32, #tpu.memory_space<vmem>>, %arg11: memref<8x360xf32, #tpu.memory_space<vmem>>, %arg12: memref<8x1xf32, #tpu.memory_space<vmem>>, %arg13: memref<8x72xf32, #tpu.memory_space<vmem>>, %arg14: memref<8x1xf32, #tpu.memory_space<vmem>>, %arg15: memref<128x512xf32, #tpu.memory_space<vmem>>, %arg16: memref<8x144xf32, #tpu.memory_space<vmem>>, %arg17: memref<8x1xf32, #tpu.memory_space<vmem>>, %arg18: memref<8x72xf32, #tpu.memory_space<vmem>>, %arg19: memref<8x1xf32, #tpu.memory_space<vmem>>, %arg20: memref<8x72xf32, #tpu.memory_space<vmem>>, %arg21: memref<8x1xf32, #tpu.memory_space<vmem>>, %arg22: memref<1x512xf32, #tpu.memory_space<vmem>>) attributes {dimension_semantics = [], scalar_prefetch = 0 : i64, scratch_operands = 0 : i64, tpu.core_type = #tpu.core_type<tc>} {
    %c0 = arith.constant 0 : index
    %c0_0 = arith.constant 0 : index
    %0 = vector.load %arg2[%c0, %c0_0] : memref<16x128xf32, #tpu.memory_space<vmem>>, vector<16x128xf32>
    %c0_1 = arith.constant 0 : index
    %c0_2 = arith.constant 0 : index
    %1 = vector.load %arg5[%c0_1, %c0_2] : memref<9x128xf32, #tpu.memory_space<vmem>>, vector<9x128xf32>
    %c5_i32 = arith.constant 5 : i32
    %2 = tpu.dynamic_rotate %0 by %c5_i32 dim 1 : vector<16x128xf32>, i32 -> vector<16x128xf32>
    %3 = vector.extract_strided_slice %1 {offsets = [0, 0], sizes = [1, 128], strides = [1, 1]} : vector<9x128xf32> to vector<1x128xf32>
    %4 = vector.broadcast %3 : vector<1x128xf32> to vector<16x128xf32>
    %5 = arith.mulf %2, %4 : vector<16x128xf32>
    %c4_i32 = arith.constant 4 : i32
    %6 = tpu.dynamic_rotate %0 by %c4_i32 dim 1 : vector<16x128xf32>, i32 -> vector<16x128xf32>
    %7 = vector.extract_strided_slice %1 {offsets = [1, 0], sizes = [1, 128], strides = [1, 1]} : vector<9x128xf32> to vector<1x128xf32>
    %8 = vector.broadcast %7 : vector<1x128xf32> to vector<16x128xf32>
    %9 = arith.mulf %6, %8 : vector<16x128xf32>
    %c3_i32 = arith.constant 3 : i32
    %10 = tpu.dynamic_rotate %0 by %c3_i32 dim 1 : vector<16x128xf32>, i32 -> vector<16x128xf32>
    %11 = vector.extract_strided_slice %1 {offsets = [2, 0], sizes = [1, 128], strides = [1, 1]} : vector<9x128xf32> to vector<1x128xf32>
    %12 = vector.broadcast %11 : vector<1x128xf32> to vector<16x128xf32>
    %13 = arith.mulf %10, %12 : vector<16x128xf32>
    %c1_i32 = arith.constant 1 : i32
    %14 = tpu.dynamic_rotate %0 by %c1_i32 dim 1 : vector<16x128xf32>, i32 -> vector<16x128xf32>
    %15 = vector.extract_strided_slice %1 {offsets = [3, 0], sizes = [1, 128], strides = [1, 1]} : vector<9x128xf32> to vector<1x128xf32>
    %16 = vector.broadcast %15 : vector<1x128xf32> to vector<16x128xf32>
    %17 = arith.mulf %14, %16 : vector<16x128xf32>
    %18 = vector.extract_strided_slice %1 {offsets = [4, 0], sizes = [1, 128], strides = [1, 1]} : vector<9x128xf32> to vector<1x128xf32>
    %19 = vector.broadcast %18 : vector<1x128xf32> to vector<16x128xf32>
    %20 = arith.mulf %0, %19 : vector<16x128xf32>
    %c127_i32 = arith.constant 127 : i32
    %21 = tpu.dynamic_rotate %0 by %c127_i32 dim 1 : vector<16x128xf32>, i32 -> vector<16x128xf32>
    %22 = vector.extract_strided_slice %1 {offsets = [5, 0], sizes = [1, 128], strides = [1, 1]} : vector<9x128xf32> to vector<1x128xf32>
    %23 = vector.broadcast %22 : vector<1x128xf32> to vector<16x128xf32>
    %24 = arith.mulf %21, %23 : vector<16x128xf32>
    %c125_i32 = arith.constant 125 : i32
    %25 = tpu.dynamic_rotate %0 by %c125_i32 dim 1 : vector<16x128xf32>, i32 -> vector<16x128xf32>
    %26 = vector.extract_strided_slice %1 {offsets = [6, 0], sizes = [1, 128], strides = [1, 1]} : vector<9x128xf32> to vector<1x128xf32>
    %27 = vector.broadcast %26 : vector<1x128xf32> to vector<16x128xf32>
    %28 = arith.mulf %25, %27 : vector<16x128xf32>
    %c124_i32 = arith.constant 124 : i32
    %29 = tpu.dynamic_rotate %0 by %c124_i32 dim 1 : vector<16x128xf32>, i32 -> vector<16x128xf32>
    %30 = vector.extract_strided_slice %1 {offsets = [7, 0], sizes = [1, 128], strides = [1, 1]} : vector<9x128xf32> to vector<1x128xf32>
    %31 = vector.broadcast %30 : vector<1x128xf32> to vector<16x128xf32>
    %32 = arith.mulf %29, %31 : vector<16x128xf32>
    %c123_i32 = arith.constant 123 : i32
    %33 = tpu.dynamic_rotate %0 by %c123_i32 dim 1 : vector<16x128xf32>, i32 -> vector<16x128xf32>
    %34 = vector.extract_strided_slice %1 {offsets = [8, 0], sizes = [1, 128], strides = [1, 1]} : vector<9x128xf32> to vector<1x128xf32>
    %35 = vector.broadcast %34 : vector<1x128xf32> to vector<16x128xf32>
    %36 = arith.mulf %33, %35 : vector<16x128xf32>
    %37 = tpu.concatenate %5, %9, %13, %17, %20, %24, %28, %32, %36 in 0 : vector<16x128xf32>, vector<16x128xf32>, vector<16x128xf32>, vector<16x128xf32>, vector<16x128xf32>, vector<16x128xf32>, vector<16x128xf32>, vector<16x128xf32>, vector<16x128xf32> -> vector<144x128xf32>
    %c0_3 = arith.constant 0 : index
    %c0_4 = arith.constant 0 : index
    %38 = vector.load %arg6[%c0_3, %c0_4] : memref<32x144xf32, #tpu.memory_space<vmem>>, vector<32x144xf32>
    %cst = arith.constant dense<0.000000e+00> : vector<32x128xf32>
    %39 = tpu.matmul %38, %37, %cst {dimension_numbers = #tpu.dot_dimension_numbers<[1], [0], [0], [1], [0, 0, 1, 1], [], []>} : vector<32x144xf32>, vector<144x128xf32>, vector<32x128xf32> -> vector<32x128xf32>
    %c0_5 = arith.constant 0 : index
    %c0_6 = arith.constant 0 : index
    %40 = vector.load %arg7[%c0_5, %c0_6] : memref<32x1xf32, #tpu.memory_space<vmem>>, vector<32x1xf32>
    %41 = vector.broadcast %40 : vector<32x1xf32> to vector<32x128xf32>
    %42 = arith.addf %39, %41 : vector<32x128xf32>
    %cst_7 = arith.constant 0.000000e+00 : f32
    %43 = vector.broadcast %cst_7 : f32 to vector<32x128xf32>
    %44 = arith.cmpf oge, %42, %43 : vector<32x128xf32>
    %cst_8 = arith.constant 0.00999999977 : f32
    %45 = vector.broadcast %cst_8 : f32 to vector<32x128xf32>
    %46 = arith.mulf %45, %42 : vector<32x128xf32>
    %47 = arith.select %44, %42, %46 : vector<32x128xi1>, vector<32x128xf32>
    %c0_9 = arith.constant 0 : index
    %c0_10 = arith.constant 0 : index
    %48 = vector.load %arg5[%c0_9, %c0_10] : memref<9x128xf32, #tpu.memory_space<vmem>>, vector<9x128xf32>
    %c5_i32_11 = arith.constant 5 : i32
    %49 = tpu.dynamic_rotate %47 by %c5_i32_11 dim 1 : vector<32x128xf32>, i32 -> vector<32x128xf32>
    %50 = vector.extract_strided_slice %48 {offsets = [0, 0], sizes = [1, 128], strides = [1, 1]} : vector<9x128xf32> to vector<1x128xf32>
    %51 = vector.broadcast %50 : vector<1x128xf32> to vector<32x128xf32>
    %52 = arith.mulf %49, %51 : vector<32x128xf32>
    %c4_i32_12 = arith.constant 4 : i32
    %53 = tpu.dynamic_rotate %47 by %c4_i32_12 dim 1 : vector<32x128xf32>, i32 -> vector<32x128xf32>
    %54 = vector.extract_strided_slice %48 {offsets = [1, 0], sizes = [1, 128], strides = [1, 1]} : vector<9x128xf32> to vector<1x128xf32>
    %55 = vector.broadcast %54 : vector<1x128xf32> to vector<32x128xf32>
    %56 = arith.mulf %53, %55 : vector<32x128xf32>
    %c3_i32_13 = arith.constant 3 : i32
    %57 = tpu.dynamic_rotate %47 by %c3_i32_13 dim 1 : vector<32x128xf32>, i32 -> vector<32x128xf32>
    %58 = vector.extract_strided_slice %48 {offsets = [2, 0], sizes = [1, 128], strides = [1, 1]} : vector<9x128xf32> to vector<1x128xf32>
    %59 = vector.broadcast %58 : vector<1x128xf32> to vector<32x128xf32>
    %60 = arith.mulf %57, %59 : vector<32x128xf32>
    %c1_i32_14 = arith.constant 1 : i32
    %61 = tpu.dynamic_rotate %47 by %c1_i32_14 dim 1 : vector<32x128xf32>, i32 -> vector<32x128xf32>
    %62 = vector.extract_strided_slice %48 {offsets = [3, 0], sizes = [1, 128], strides = [1, 1]} : vector<9x128xf32> to vector<1x128xf32>
    %63 = vector.broadcast %62 : vector<1x128xf32> to vector<32x128xf32>
    %64 = arith.mulf %61, %63 : vector<32x128xf32>
    %65 = vector.extract_strided_slice %48 {offsets = [4, 0], sizes = [1, 128], strides = [1, 1]} : vector<9x128xf32> to vector<1x128xf32>
    %66 = vector.broadcast %65 : vector<1x128xf32> to vector<32x128xf32>
    %67 = arith.mulf %47, %66 : vector<32x128xf32>
    %c127_i32_15 = arith.constant 127 : i32
    %68 = tpu.dynamic_rotate %47 by %c127_i32_15 dim 1 : vector<32x128xf32>, i32 -> vector<32x128xf32>
    %69 = vector.extract_strided_slice %48 {offsets = [5, 0], sizes = [1, 128], strides = [1, 1]} : vector<9x128xf32> to vector<1x128xf32>
    %70 = vector.broadcast %69 : vector<1x128xf32> to vector<32x128xf32>
    %71 = arith.mulf %68, %70 : vector<32x128xf32>
    %c125_i32_16 = arith.constant 125 : i32
    %72 = tpu.dynamic_rotate %47 by %c125_i32_16 dim 1 : vector<32x128xf32>, i32 -> vector<32x128xf32>
    %73 = vector.extract_strided_slice %48 {offsets = [6, 0], sizes = [1, 128], strides = [1, 1]} : vector<9x128xf32> to vector<1x128xf32>
    %74 = vector.broadcast %73 : vector<1x128xf32> to vector<32x128xf32>
    %75 = arith.mulf %72, %74 : vector<32x128xf32>
    %c124_i32_17 = arith.constant 124 : i32
    %76 = tpu.dynamic_rotate %47 by %c124_i32_17 dim 1 : vector<32x128xf32>, i32 -> vector<32x128xf32>
    %77 = vector.extract_strided_slice %48 {offsets = [7, 0], sizes = [1, 128], strides = [1, 1]} : vector<9x128xf32> to vector<1x128xf32>
    %78 = vector.broadcast %77 : vector<1x128xf32> to vector<32x128xf32>
    %79 = arith.mulf %76, %78 : vector<32x128xf32>
    %c123_i32_18 = arith.constant 123 : i32
    %80 = tpu.dynamic_rotate %47 by %c123_i32_18 dim 1 : vector<32x128xf32>, i32 -> vector<32x128xf32>
    %81 = vector.extract_strided_slice %48 {offsets = [8, 0], sizes = [1, 128], strides = [1, 1]} : vector<9x128xf32> to vector<1x128xf32>
    %82 = vector.broadcast %81 : vector<1x128xf32> to vector<32x128xf32>
    %83 = arith.mulf %80, %82 : vector<32x128xf32>
    %84 = tpu.concatenate %52, %56, %60, %64, %67, %71, %75, %79, %83 in 0 : vector<32x128xf32>, vector<32x128xf32>, vector<32x128xf32>, vector<32x128xf32>, vector<32x128xf32>, vector<32x128xf32>, vector<32x128xf32>, vector<32x128xf32>, vector<32x128xf32> -> vector<288x128xf32>
    %c0_19 = arith.constant 0 : index
    %c0_20 = arith.constant 0 : index
    %85 = vector.load %arg8[%c0_19, %c0_20] : memref<32x288xf32, #tpu.memory_space<vmem>>, vector<32x288xf32>
    %cst_21 = arith.constant dense<0.000000e+00> : vector<32x128xf32>
    %86 = tpu.matmul %85, %84, %cst_21 {dimension_numbers = #tpu.dot_dimension_numbers<[1], [0], [0], [1], [0, 0, 1, 1], [], []>} : vector<32x288xf32>, vector<288x128xf32>, vector<32x128xf32> -> vector<32x128xf32>
    %c0_22 = arith.constant 0 : index
    %c0_23 = arith.constant 0 : index
    %87 = vector.load %arg9[%c0_22, %c0_23] : memref<32x1xf32, #tpu.memory_space<vmem>>, vector<32x1xf32>
    %88 = vector.broadcast %87 : vector<32x1xf32> to vector<32x128xf32>
    %89 = arith.addf %86, %88 : vector<32x128xf32>
    %cst_24 = arith.constant 0.000000e+00 : f32
    %90 = vector.broadcast %cst_24 : f32 to vector<32x128xf32>
    %91 = arith.cmpf oge, %89, %90 : vector<32x128xf32>
    %cst_25 = arith.constant 0.00999999977 : f32
    %92 = vector.broadcast %cst_25 : f32 to vector<32x128xf32>
    %93 = arith.mulf %92, %89 : vector<32x128xf32>
    %94 = arith.select %91, %89, %93 : vector<32x128xi1>, vector<32x128xf32>
    %c0_26 = arith.constant 0 : index
    %c0_27 = arith.constant 0 : index
    %95 = vector.load %arg10[%c0_26, %c0_27] : memref<128x128xf32, #tpu.memory_space<vmem>>, vector<128x128xf32>
    %cst_28 = arith.constant dense<0.000000e+00> : vector<32x128xf32>
    %96 = tpu.matmul %94, %95, %cst_28 {dimension_numbers = #tpu.dot_dimension_numbers<[1], [0], [0], [1], [0, 0, 1, 1], [], []>} : vector<32x128xf32>, vector<128x128xf32>, vector<32x128xf32> -> vector<32x128xf32>
    %c0_29 = arith.constant 0 : index
    %c0_30 = arith.constant 0 : index
    %97 = vector.load %arg1[%c0_29, %c0_30] : memref<8x128xf32, #tpu.memory_space<vmem>>, vector<8x128xf32>
    %98 = tpu.concatenate %96, %97 in 0 : vector<32x128xf32>, vector<8x128xf32> -> vector<40x128xf32>
    %c0_31 = arith.constant 0 : index
    %c0_32 = arith.constant 0 : index
    %99 = vector.load %arg4[%c0_31, %c0_32] : memref<9x128xf32, #tpu.memory_space<vmem>>, vector<9x128xf32>
    %c9_i32 = arith.constant 9 : i32
    %100 = tpu.dynamic_rotate %98 by %c9_i32 dim 1 : vector<40x128xf32>, i32 -> vector<40x128xf32>
    %101 = vector.extract_strided_slice %99 {offsets = [0, 0], sizes = [1, 128], strides = [1, 1]} : vector<9x128xf32> to vector<1x128xf32>
    %102 = vector.broadcast %101 : vector<1x128xf32> to vector<40x128xf32>
    %103 = arith.mulf %100, %102 : vector<40x128xf32>
    %c8_i32 = arith.constant 8 : i32
    %104 = tpu.dynamic_rotate %98 by %c8_i32 dim 1 : vector<40x128xf32>, i32 -> vector<40x128xf32>
    %105 = vector.extract_strided_slice %99 {offsets = [1, 0], sizes = [1, 128], strides = [1, 1]} : vector<9x128xf32> to vector<1x128xf32>
    %106 = vector.broadcast %105 : vector<1x128xf32> to vector<40x128xf32>
    %107 = arith.mulf %104, %106 : vector<40x128xf32>
    %c7_i32 = arith.constant 7 : i32
    %108 = tpu.dynamic_rotate %98 by %c7_i32 dim 1 : vector<40x128xf32>, i32 -> vector<40x128xf32>
    %109 = vector.extract_strided_slice %99 {offsets = [2, 0], sizes = [1, 128], strides = [1, 1]} : vector<9x128xf32> to vector<1x128xf32>
    %110 = vector.broadcast %109 : vector<1x128xf32> to vector<40x128xf32>
    %111 = arith.mulf %108, %110 : vector<40x128xf32>
    %c1_i32_33 = arith.constant 1 : i32
    %112 = tpu.dynamic_rotate %98 by %c1_i32_33 dim 1 : vector<40x128xf32>, i32 -> vector<40x128xf32>
    %113 = vector.extract_strided_slice %99 {offsets = [3, 0], sizes = [1, 128], strides = [1, 1]} : vector<9x128xf32> to vector<1x128xf32>
    %114 = vector.broadcast %113 : vector<1x128xf32> to vector<40x128xf32>
    %115 = arith.mulf %112, %114 : vector<40x128xf32>
    %116 = vector.extract_strided_slice %99 {offsets = [4, 0], sizes = [1, 128], strides = [1, 1]} : vector<9x128xf32> to vector<1x128xf32>
    %117 = vector.broadcast %116 : vector<1x128xf32> to vector<40x128xf32>
    %118 = arith.mulf %98, %117 : vector<40x128xf32>
    %c127_i32_34 = arith.constant 127 : i32
    %119 = tpu.dynamic_rotate %98 by %c127_i32_34 dim 1 : vector<40x128xf32>, i32 -> vector<40x128xf32>
    %120 = vector.extract_strided_slice %99 {offsets = [5, 0], sizes = [1, 128], strides = [1, 1]} : vector<9x128xf32> to vector<1x128xf32>
    %121 = vector.broadcast %120 : vector<1x128xf32> to vector<40x128xf32>
    %122 = arith.mulf %119, %121 : vector<40x128xf32>
    %c121_i32 = arith.constant 121 : i32
    %123 = tpu.dynamic_rotate %98 by %c121_i32 dim 1 : vector<40x128xf32>, i32 -> vector<40x128xf32>
    %124 = vector.extract_strided_slice %99 {offsets = [6, 0], sizes = [1, 128], strides = [1, 1]} : vector<9x128xf32> to vector<1x128xf32>
    %125 = vector.broadcast %124 : vector<1x128xf32> to vector<40x128xf32>
    %126 = arith.mulf %123, %125 : vector<40x128xf32>
    %c120_i32 = arith.constant 120 : i32
    %127 = tpu.dynamic_rotate %98 by %c120_i32 dim 1 : vector<40x128xf32>, i32 -> vector<40x128xf32>
    %128 = vector.extract_strided_slice %99 {offsets = [7, 0], sizes = [1, 128], strides = [1, 1]} : vector<9x128xf32> to vector<1x128xf32>
    %129 = vector.broadcast %128 : vector<1x128xf32> to vector<40x128xf32>
    %130 = arith.mulf %127, %129 : vector<40x128xf32>
    %c119_i32 = arith.constant 119 : i32
    %131 = tpu.dynamic_rotate %98 by %c119_i32 dim 1 : vector<40x128xf32>, i32 -> vector<40x128xf32>
    %132 = vector.extract_strided_slice %99 {offsets = [8, 0], sizes = [1, 128], strides = [1, 1]} : vector<9x128xf32> to vector<1x128xf32>
    %133 = vector.broadcast %132 : vector<1x128xf32> to vector<40x128xf32>
    %134 = arith.mulf %131, %133 : vector<40x128xf32>
    %135 = tpu.concatenate %103, %107, %111, %115, %118, %122, %126, %130, %134 in 0 : vector<40x128xf32>, vector<40x128xf32>, vector<40x128xf32>, vector<40x128xf32>, vector<40x128xf32>, vector<40x128xf32>, vector<40x128xf32>, vector<40x128xf32>, vector<40x128xf32> -> vector<360x128xf32>
    %c0_35 = arith.constant 0 : index
    %c0_36 = arith.constant 0 : index
    %136 = vector.load %arg11[%c0_35, %c0_36] : memref<8x360xf32, #tpu.memory_space<vmem>>, vector<8x360xf32>
    %cst_37 = arith.constant dense<0.000000e+00> : vector<8x128xf32>
    %137 = tpu.matmul %136, %135, %cst_37 {dimension_numbers = #tpu.dot_dimension_numbers<[1], [0], [0], [1], [0, 0, 1, 1], [], []>} : vector<8x360xf32>, vector<360x128xf32>, vector<8x128xf32> -> vector<8x128xf32>
    %c0_38 = arith.constant 0 : index
    %c0_39 = arith.constant 0 : index
    %138 = vector.load %arg12[%c0_38, %c0_39] : memref<8x1xf32, #tpu.memory_space<vmem>>, vector<8x1xf32>
    %139 = vector.broadcast %138 : vector<8x1xf32> to vector<8x128xf32>
    %140 = arith.addf %137, %139 : vector<8x128xf32>
    %cst_40 = arith.constant 0.000000e+00 : f32
    %141 = vector.broadcast %cst_40 : f32 to vector<8x128xf32>
    %142 = arith.cmpf oge, %140, %141 : vector<8x128xf32>
    %cst_41 = arith.constant 0.00999999977 : f32
    %143 = vector.broadcast %cst_41 : f32 to vector<8x128xf32>
    %144 = arith.mulf %143, %140 : vector<8x128xf32>
    %145 = arith.select %142, %140, %144 : vector<8x128xi1>, vector<8x128xf32>
    %c0_42 = arith.constant 0 : index
    %c0_43 = arith.constant 0 : index
    %146 = vector.load %arg4[%c0_42, %c0_43] : memref<9x128xf32, #tpu.memory_space<vmem>>, vector<9x128xf32>
    %c9_i32_44 = arith.constant 9 : i32
    %147 = tpu.dynamic_rotate %145 by %c9_i32_44 dim 1 : vector<8x128xf32>, i32 -> vector<8x128xf32>
    %148 = vector.extract_strided_slice %146 {offsets = [0, 0], sizes = [1, 128], strides = [1, 1]} : vector<9x128xf32> to vector<1x128xf32>
    %149 = vector.broadcast %148 : vector<1x128xf32> to vector<8x128xf32>
    %150 = arith.mulf %147, %149 : vector<8x128xf32>
    %c8_i32_45 = arith.constant 8 : i32
    %151 = tpu.dynamic_rotate %145 by %c8_i32_45 dim 1 : vector<8x128xf32>, i32 -> vector<8x128xf32>
    %152 = vector.extract_strided_slice %146 {offsets = [1, 0], sizes = [1, 128], strides = [1, 1]} : vector<9x128xf32> to vector<1x128xf32>
    %153 = vector.broadcast %152 : vector<1x128xf32> to vector<8x128xf32>
    %154 = arith.mulf %151, %153 : vector<8x128xf32>
    %c7_i32_46 = arith.constant 7 : i32
    %155 = tpu.dynamic_rotate %145 by %c7_i32_46 dim 1 : vector<8x128xf32>, i32 -> vector<8x128xf32>
    %156 = vector.extract_strided_slice %146 {offsets = [2, 0], sizes = [1, 128], strides = [1, 1]} : vector<9x128xf32> to vector<1x128xf32>
    %157 = vector.broadcast %156 : vector<1x128xf32> to vector<8x128xf32>
    %158 = arith.mulf %155, %157 : vector<8x128xf32>
    %c1_i32_47 = arith.constant 1 : i32
    %159 = tpu.dynamic_rotate %145 by %c1_i32_47 dim 1 : vector<8x128xf32>, i32 -> vector<8x128xf32>
    %160 = vector.extract_strided_slice %146 {offsets = [3, 0], sizes = [1, 128], strides = [1, 1]} : vector<9x128xf32> to vector<1x128xf32>
    %161 = vector.broadcast %160 : vector<1x128xf32> to vector<8x128xf32>
    %162 = arith.mulf %159, %161 : vector<8x128xf32>
    %163 = vector.extract_strided_slice %146 {offsets = [4, 0], sizes = [1, 128], strides = [1, 1]} : vector<9x128xf32> to vector<1x128xf32>
    %164 = vector.broadcast %163 : vector<1x128xf32> to vector<8x128xf32>
    %165 = arith.mulf %145, %164 : vector<8x128xf32>
    %c127_i32_48 = arith.constant 127 : i32
    %166 = tpu.dynamic_rotate %145 by %c127_i32_48 dim 1 : vector<8x128xf32>, i32 -> vector<8x128xf32>
    %167 = vector.extract_strided_slice %146 {offsets = [5, 0], sizes = [1, 128], strides = [1, 1]} : vector<9x128xf32> to vector<1x128xf32>
    %168 = vector.broadcast %167 : vector<1x128xf32> to vector<8x128xf32>
    %169 = arith.mulf %166, %168 : vector<8x128xf32>
    %c121_i32_49 = arith.constant 121 : i32
    %170 = tpu.dynamic_rotate %145 by %c121_i32_49 dim 1 : vector<8x128xf32>, i32 -> vector<8x128xf32>
    %171 = vector.extract_strided_slice %146 {offsets = [6, 0], sizes = [1, 128], strides = [1, 1]} : vector<9x128xf32> to vector<1x128xf32>
    %172 = vector.broadcast %171 : vector<1x128xf32> to vector<8x128xf32>
    %173 = arith.mulf %170, %172 : vector<8x128xf32>
    %c120_i32_50 = arith.constant 120 : i32
    %174 = tpu.dynamic_rotate %145 by %c120_i32_50 dim 1 : vector<8x128xf32>, i32 -> vector<8x128xf32>
    %175 = vector.extract_strided_slice %146 {offsets = [7, 0], sizes = [1, 128], strides = [1, 1]} : vector<9x128xf32> to vector<1x128xf32>
    %176 = vector.broadcast %175 : vector<1x128xf32> to vector<8x128xf32>
    %177 = arith.mulf %174, %176 : vector<8x128xf32>
    %c119_i32_51 = arith.constant 119 : i32
    %178 = tpu.dynamic_rotate %145 by %c119_i32_51 dim 1 : vector<8x128xf32>, i32 -> vector<8x128xf32>
    %179 = vector.extract_strided_slice %146 {offsets = [8, 0], sizes = [1, 128], strides = [1, 1]} : vector<9x128xf32> to vector<1x128xf32>
    %180 = vector.broadcast %179 : vector<1x128xf32> to vector<8x128xf32>
    %181 = arith.mulf %178, %180 : vector<8x128xf32>
    %182 = tpu.concatenate %150, %154, %158, %162, %165, %169, %173, %177, %181 in 0 : vector<8x128xf32>, vector<8x128xf32>, vector<8x128xf32>, vector<8x128xf32>, vector<8x128xf32>, vector<8x128xf32>, vector<8x128xf32>, vector<8x128xf32>, vector<8x128xf32> -> vector<72x128xf32>
    %c0_52 = arith.constant 0 : index
    %c0_53 = arith.constant 0 : index
    %183 = vector.load %arg13[%c0_52, %c0_53] : memref<8x72xf32, #tpu.memory_space<vmem>>, vector<8x72xf32>
    %cst_54 = arith.constant dense<0.000000e+00> : vector<8x128xf32>
    %184 = tpu.matmul %183, %182, %cst_54 {dimension_numbers = #tpu.dot_dimension_numbers<[1], [0], [0], [1], [0, 0, 1, 1], [], []>} : vector<8x72xf32>, vector<72x128xf32>, vector<8x128xf32> -> vector<8x128xf32>
    %c0_55 = arith.constant 0 : index
    %c0_56 = arith.constant 0 : index
    %185 = vector.load %arg14[%c0_55, %c0_56] : memref<8x1xf32, #tpu.memory_space<vmem>>, vector<8x1xf32>
    %186 = vector.broadcast %185 : vector<8x1xf32> to vector<8x128xf32>
    %187 = arith.addf %184, %186 : vector<8x128xf32>
    %cst_57 = arith.constant 0.000000e+00 : f32
    %188 = vector.broadcast %cst_57 : f32 to vector<8x128xf32>
    %189 = arith.cmpf oge, %187, %188 : vector<8x128xf32>
    %cst_58 = arith.constant 0.00999999977 : f32
    %190 = vector.broadcast %cst_58 : f32 to vector<8x128xf32>
    %191 = arith.mulf %190, %187 : vector<8x128xf32>
    %192 = arith.select %189, %187, %191 : vector<8x128xi1>, vector<8x128xf32>
    %c0_59 = arith.constant 0 : index
    %c0_60 = arith.constant 0 : index
    %193 = vector.load %arg15[%c0_59, %c0_60] : memref<128x512xf32, #tpu.memory_space<vmem>>, vector<128x512xf32>
    %cst_61 = arith.constant dense<0.000000e+00> : vector<8x512xf32>
    %194 = tpu.matmul %192, %193, %cst_61 {dimension_numbers = #tpu.dot_dimension_numbers<[1], [0], [0], [1], [0, 0, 1, 1], [], []>} : vector<8x128xf32>, vector<128x512xf32>, vector<8x512xf32> -> vector<8x512xf32>
    %c0_62 = arith.constant 0 : index
    %c0_63 = arith.constant 0 : index
    %195 = vector.load %arg0[%c0_62, %c0_63] : memref<8x512xf32, #tpu.memory_space<vmem>>, vector<8x512xf32>
    %196 = tpu.concatenate %194, %195 in 0 : vector<8x512xf32>, vector<8x512xf32> -> vector<16x512xf32>
    %c0_64 = arith.constant 0 : index
    %c0_65 = arith.constant 0 : index
    %197 = vector.load %arg3[%c0_64, %c0_65] : memref<9x512xf32, #tpu.memory_space<vmem>>, vector<9x512xf32>
    %c17_i32 = arith.constant 17 : i32
    %198 = tpu.dynamic_rotate %196 by %c17_i32 dim 1 : vector<16x512xf32>, i32 -> vector<16x512xf32>
    %199 = vector.extract_strided_slice %197 {offsets = [0, 0], sizes = [1, 512], strides = [1, 1]} : vector<9x512xf32> to vector<1x512xf32>
    %200 = vector.broadcast %199 : vector<1x512xf32> to vector<16x512xf32>
    %201 = arith.mulf %198, %200 : vector<16x512xf32>
    %c16_i32 = arith.constant 16 : i32
    %202 = tpu.dynamic_rotate %196 by %c16_i32 dim 1 : vector<16x512xf32>, i32 -> vector<16x512xf32>
    %203 = vector.extract_strided_slice %197 {offsets = [1, 0], sizes = [1, 512], strides = [1, 1]} : vector<9x512xf32> to vector<1x512xf32>
    %204 = vector.broadcast %203 : vector<1x512xf32> to vector<16x512xf32>
    %205 = arith.mulf %202, %204 : vector<16x512xf32>
    %c15_i32 = arith.constant 15 : i32
    %206 = tpu.dynamic_rotate %196 by %c15_i32 dim 1 : vector<16x512xf32>, i32 -> vector<16x512xf32>
    %207 = vector.extract_strided_slice %197 {offsets = [2, 0], sizes = [1, 512], strides = [1, 1]} : vector<9x512xf32> to vector<1x512xf32>
    %208 = vector.broadcast %207 : vector<1x512xf32> to vector<16x512xf32>
    %209 = arith.mulf %206, %208 : vector<16x512xf32>
    %c1_i32_66 = arith.constant 1 : i32
    %210 = tpu.dynamic_rotate %196 by %c1_i32_66 dim 1 : vector<16x512xf32>, i32 -> vector<16x512xf32>
    %211 = vector.extract_strided_slice %197 {offsets = [3, 0], sizes = [1, 512], strides = [1, 1]} : vector<9x512xf32> to vector<1x512xf32>
    %212 = vector.broadcast %211 : vector<1x512xf32> to vector<16x512xf32>
    %213 = arith.mulf %210, %212 : vector<16x512xf32>
    %214 = vector.extract_strided_slice %197 {offsets = [4, 0], sizes = [1, 512], strides = [1, 1]} : vector<9x512xf32> to vector<1x512xf32>
    %215 = vector.broadcast %214 : vector<1x512xf32> to vector<16x512xf32>
    %216 = arith.mulf %196, %215 : vector<16x512xf32>
    %c511_i32 = arith.constant 511 : i32
    %217 = tpu.dynamic_rotate %196 by %c511_i32 dim 1 : vector<16x512xf32>, i32 -> vector<16x512xf32>
    %218 = vector.extract_strided_slice %197 {offsets = [5, 0], sizes = [1, 512], strides = [1, 1]} : vector<9x512xf32> to vector<1x512xf32>
    %219 = vector.broadcast %218 : vector<1x512xf32> to vector<16x512xf32>
    %220 = arith.mulf %217, %219 : vector<16x512xf32>
    %c497_i32 = arith.constant 497 : i32
    %221 = tpu.dynamic_rotate %196 by %c497_i32 dim 1 : vector<16x512xf32>, i32 -> vector<16x512xf32>
    %222 = vector.extract_strided_slice %197 {offsets = [6, 0], sizes = [1, 512], strides = [1, 1]} : vector<9x512xf32> to vector<1x512xf32>
    %223 = vector.broadcast %222 : vector<1x512xf32> to vector<16x512xf32>
    %224 = arith.mulf %221, %223 : vector<16x512xf32>
    %c496_i32 = arith.constant 496 : i32
    %225 = tpu.dynamic_rotate %196 by %c496_i32 dim 1 : vector<16x512xf32>, i32 -> vector<16x512xf32>
    %226 = vector.extract_strided_slice %197 {offsets = [7, 0], sizes = [1, 512], strides = [1, 1]} : vector<9x512xf32> to vector<1x512xf32>
    %227 = vector.broadcast %226 : vector<1x512xf32> to vector<16x512xf32>
    %228 = arith.mulf %225, %227 : vector<16x512xf32>
    %c495_i32 = arith.constant 495 : i32
    %229 = tpu.dynamic_rotate %196 by %c495_i32 dim 1 : vector<16x512xf32>, i32 -> vector<16x512xf32>
    %230 = vector.extract_strided_slice %197 {offsets = [8, 0], sizes = [1, 512], strides = [1, 1]} : vector<9x512xf32> to vector<1x512xf32>
    %231 = vector.broadcast %230 : vector<1x512xf32> to vector<16x512xf32>
    %232 = arith.mulf %229, %231 : vector<16x512xf32>
    %233 = tpu.concatenate %201, %205, %209, %213, %216, %220, %224, %228, %232 in 0 : vector<16x512xf32>, vector<16x512xf32>, vector<16x512xf32>, vector<16x512xf32>, vector<16x512xf32>, vector<16x512xf32>, vector<16x512xf32>, vector<16x512xf32>, vector<16x512xf32> -> vector<144x512xf32>
    %c0_67 = arith.constant 0 : index
    %c0_68 = arith.constant 0 : index
    %234 = vector.load %arg16[%c0_67, %c0_68] : memref<8x144xf32, #tpu.memory_space<vmem>>, vector<8x144xf32>
    %cst_69 = arith.constant dense<0.000000e+00> : vector<8x512xf32>
    %235 = tpu.matmul %234, %233, %cst_69 {dimension_numbers = #tpu.dot_dimension_numbers<[1], [0], [0], [1], [0, 0, 1, 1], [], []>} : vector<8x144xf32>, vector<144x512xf32>, vector<8x512xf32> -> vector<8x512xf32>
    %c0_70 = arith.constant 0 : index
    %c0_71 = arith.constant 0 : index
    %236 = vector.load %arg17[%c0_70, %c0_71] : memref<8x1xf32, #tpu.memory_space<vmem>>, vector<8x1xf32>
    %237 = vector.broadcast %236 : vector<8x1xf32> to vector<8x512xf32>
    %238 = arith.addf %235, %237 : vector<8x512xf32>
    %cst_72 = arith.constant 0.000000e+00 : f32
    %239 = vector.broadcast %cst_72 : f32 to vector<8x512xf32>
    %240 = arith.cmpf oge, %238, %239 : vector<8x512xf32>
    %cst_73 = arith.constant 0.00999999977 : f32
    %241 = vector.broadcast %cst_73 : f32 to vector<8x512xf32>
    %242 = arith.mulf %241, %238 : vector<8x512xf32>
    %243 = arith.select %240, %238, %242 : vector<8x512xi1>, vector<8x512xf32>
    %c0_74 = arith.constant 0 : index
    %c0_75 = arith.constant 0 : index
    %244 = vector.load %arg3[%c0_74, %c0_75] : memref<9x512xf32, #tpu.memory_space<vmem>>, vector<9x512xf32>
    %c17_i32_76 = arith.constant 17 : i32
    %245 = tpu.dynamic_rotate %243 by %c17_i32_76 dim 1 : vector<8x512xf32>, i32 -> vector<8x512xf32>
    %246 = vector.extract_strided_slice %244 {offsets = [0, 0], sizes = [1, 512], strides = [1, 1]} : vector<9x512xf32> to vector<1x512xf32>
    %247 = vector.broadcast %246 : vector<1x512xf32> to vector<8x512xf32>
    %248 = arith.mulf %245, %247 : vector<8x512xf32>
    %c16_i32_77 = arith.constant 16 : i32
    %249 = tpu.dynamic_rotate %243 by %c16_i32_77 dim 1 : vector<8x512xf32>, i32 -> vector<8x512xf32>
    %250 = vector.extract_strided_slice %244 {offsets = [1, 0], sizes = [1, 512], strides = [1, 1]} : vector<9x512xf32> to vector<1x512xf32>
    %251 = vector.broadcast %250 : vector<1x512xf32> to vector<8x512xf32>
    %252 = arith.mulf %249, %251 : vector<8x512xf32>
    %c15_i32_78 = arith.constant 15 : i32
    %253 = tpu.dynamic_rotate %243 by %c15_i32_78 dim 1 : vector<8x512xf32>, i32 -> vector<8x512xf32>
    %254 = vector.extract_strided_slice %244 {offsets = [2, 0], sizes = [1, 512], strides = [1, 1]} : vector<9x512xf32> to vector<1x512xf32>
    %255 = vector.broadcast %254 : vector<1x512xf32> to vector<8x512xf32>
    %256 = arith.mulf %253, %255 : vector<8x512xf32>
    %c1_i32_79 = arith.constant 1 : i32
    %257 = tpu.dynamic_rotate %243 by %c1_i32_79 dim 1 : vector<8x512xf32>, i32 -> vector<8x512xf32>
    %258 = vector.extract_strided_slice %244 {offsets = [3, 0], sizes = [1, 512], strides = [1, 1]} : vector<9x512xf32> to vector<1x512xf32>
    %259 = vector.broadcast %258 : vector<1x512xf32> to vector<8x512xf32>
    %260 = arith.mulf %257, %259 : vector<8x512xf32>
    %261 = vector.extract_strided_slice %244 {offsets = [4, 0], sizes = [1, 512], strides = [1, 1]} : vector<9x512xf32> to vector<1x512xf32>
    %262 = vector.broadcast %261 : vector<1x512xf32> to vector<8x512xf32>
    %263 = arith.mulf %243, %262 : vector<8x512xf32>
    %c511_i32_80 = arith.constant 511 : i32
    %264 = tpu.dynamic_rotate %243 by %c511_i32_80 dim 1 : vector<8x512xf32>, i32 -> vector<8x512xf32>
    %265 = vector.extract_strided_slice %244 {offsets = [5, 0], sizes = [1, 512], strides = [1, 1]} : vector<9x512xf32> to vector<1x512xf32>
    %266 = vector.broadcast %265 : vector<1x512xf32> to vector<8x512xf32>
    %267 = arith.mulf %264, %266 : vector<8x512xf32>
    %c497_i32_81 = arith.constant 497 : i32
    %268 = tpu.dynamic_rotate %243 by %c497_i32_81 dim 1 : vector<8x512xf32>, i32 -> vector<8x512xf32>
    %269 = vector.extract_strided_slice %244 {offsets = [6, 0], sizes = [1, 512], strides = [1, 1]} : vector<9x512xf32> to vector<1x512xf32>
    %270 = vector.broadcast %269 : vector<1x512xf32> to vector<8x512xf32>
    %271 = arith.mulf %268, %270 : vector<8x512xf32>
    %c496_i32_82 = arith.constant 496 : i32
    %272 = tpu.dynamic_rotate %243 by %c496_i32_82 dim 1 : vector<8x512xf32>, i32 -> vector<8x512xf32>
    %273 = vector.extract_strided_slice %244 {offsets = [7, 0], sizes = [1, 512], strides = [1, 1]} : vector<9x512xf32> to vector<1x512xf32>
    %274 = vector.broadcast %273 : vector<1x512xf32> to vector<8x512xf32>
    %275 = arith.mulf %272, %274 : vector<8x512xf32>
    %c495_i32_83 = arith.constant 495 : i32
    %276 = tpu.dynamic_rotate %243 by %c495_i32_83 dim 1 : vector<8x512xf32>, i32 -> vector<8x512xf32>
    %277 = vector.extract_strided_slice %244 {offsets = [8, 0], sizes = [1, 512], strides = [1, 1]} : vector<9x512xf32> to vector<1x512xf32>
    %278 = vector.broadcast %277 : vector<1x512xf32> to vector<8x512xf32>
    %279 = arith.mulf %276, %278 : vector<8x512xf32>
    %280 = tpu.concatenate %248, %252, %256, %260, %263, %267, %271, %275, %279 in 0 : vector<8x512xf32>, vector<8x512xf32>, vector<8x512xf32>, vector<8x512xf32>, vector<8x512xf32>, vector<8x512xf32>, vector<8x512xf32>, vector<8x512xf32>, vector<8x512xf32> -> vector<72x512xf32>
    %c0_84 = arith.constant 0 : index
    %c0_85 = arith.constant 0 : index
    %281 = vector.load %arg18[%c0_84, %c0_85] : memref<8x72xf32, #tpu.memory_space<vmem>>, vector<8x72xf32>
    %cst_86 = arith.constant dense<0.000000e+00> : vector<8x512xf32>
    %282 = tpu.matmul %281, %280, %cst_86 {dimension_numbers = #tpu.dot_dimension_numbers<[1], [0], [0], [1], [0, 0, 1, 1], [], []>} : vector<8x72xf32>, vector<72x512xf32>, vector<8x512xf32> -> vector<8x512xf32>
    %c0_87 = arith.constant 0 : index
    %c0_88 = arith.constant 0 : index
    %283 = vector.load %arg19[%c0_87, %c0_88] : memref<8x1xf32, #tpu.memory_space<vmem>>, vector<8x1xf32>
    %284 = vector.broadcast %283 : vector<8x1xf32> to vector<8x512xf32>
    %285 = arith.addf %282, %284 : vector<8x512xf32>
    %cst_89 = arith.constant 0.000000e+00 : f32
    %286 = vector.broadcast %cst_89 : f32 to vector<8x512xf32>
    %287 = arith.cmpf oge, %285, %286 : vector<8x512xf32>
    %cst_90 = arith.constant 0.00999999977 : f32
    %288 = vector.broadcast %cst_90 : f32 to vector<8x512xf32>
    %289 = arith.mulf %288, %285 : vector<8x512xf32>
    %290 = arith.select %287, %285, %289 : vector<8x512xi1>, vector<8x512xf32>
    %c0_91 = arith.constant 0 : index
    %c0_92 = arith.constant 0 : index
    %291 = vector.load %arg3[%c0_91, %c0_92] : memref<9x512xf32, #tpu.memory_space<vmem>>, vector<9x512xf32>
    %c17_i32_93 = arith.constant 17 : i32
    %292 = tpu.dynamic_rotate %290 by %c17_i32_93 dim 1 : vector<8x512xf32>, i32 -> vector<8x512xf32>
    %293 = vector.extract_strided_slice %291 {offsets = [0, 0], sizes = [1, 512], strides = [1, 1]} : vector<9x512xf32> to vector<1x512xf32>
    %294 = vector.broadcast %293 : vector<1x512xf32> to vector<8x512xf32>
    %295 = arith.mulf %292, %294 : vector<8x512xf32>
    %c16_i32_94 = arith.constant 16 : i32
    %296 = tpu.dynamic_rotate %290 by %c16_i32_94 dim 1 : vector<8x512xf32>, i32 -> vector<8x512xf32>
    %297 = vector.extract_strided_slice %291 {offsets = [1, 0], sizes = [1, 512], strides = [1, 1]} : vector<9x512xf32> to vector<1x512xf32>
    %298 = vector.broadcast %297 : vector<1x512xf32> to vector<8x512xf32>
    %299 = arith.mulf %296, %298 : vector<8x512xf32>
    %c15_i32_95 = arith.constant 15 : i32
    %300 = tpu.dynamic_rotate %290 by %c15_i32_95 dim 1 : vector<8x512xf32>, i32 -> vector<8x512xf32>
    %301 = vector.extract_strided_slice %291 {offsets = [2, 0], sizes = [1, 512], strides = [1, 1]} : vector<9x512xf32> to vector<1x512xf32>
    %302 = vector.broadcast %301 : vector<1x512xf32> to vector<8x512xf32>
    %303 = arith.mulf %300, %302 : vector<8x512xf32>
    %c1_i32_96 = arith.constant 1 : i32
    %304 = tpu.dynamic_rotate %290 by %c1_i32_96 dim 1 : vector<8x512xf32>, i32 -> vector<8x512xf32>
    %305 = vector.extract_strided_slice %291 {offsets = [3, 0], sizes = [1, 512], strides = [1, 1]} : vector<9x512xf32> to vector<1x512xf32>
    %306 = vector.broadcast %305 : vector<1x512xf32> to vector<8x512xf32>
    %307 = arith.mulf %304, %306 : vector<8x512xf32>
    %308 = vector.extract_strided_slice %291 {offsets = [4, 0], sizes = [1, 512], strides = [1, 1]} : vector<9x512xf32> to vector<1x512xf32>
    %309 = vector.broadcast %308 : vector<1x512xf32> to vector<8x512xf32>
    %310 = arith.mulf %290, %309 : vector<8x512xf32>
    %c511_i32_97 = arith.constant 511 : i32
    %311 = tpu.dynamic_rotate %290 by %c511_i32_97 dim 1 : vector<8x512xf32>, i32 -> vector<8x512xf32>
    %312 = vector.extract_strided_slice %291 {offsets = [5, 0], sizes = [1, 512], strides = [1, 1]} : vector<9x512xf32> to vector<1x512xf32>
    %313 = vector.broadcast %312 : vector<1x512xf32> to vector<8x512xf32>
    %314 = arith.mulf %311, %313 : vector<8x512xf32>
    %c497_i32_98 = arith.constant 497 : i32
    %315 = tpu.dynamic_rotate %290 by %c497_i32_98 dim 1 : vector<8x512xf32>, i32 -> vector<8x512xf32>
    %316 = vector.extract_strided_slice %291 {offsets = [6, 0], sizes = [1, 512], strides = [1, 1]} : vector<9x512xf32> to vector<1x512xf32>
    %317 = vector.broadcast %316 : vector<1x512xf32> to vector<8x512xf32>
    %318 = arith.mulf %315, %317 : vector<8x512xf32>
    %c496_i32_99 = arith.constant 496 : i32
    %319 = tpu.dynamic_rotate %290 by %c496_i32_99 dim 1 : vector<8x512xf32>, i32 -> vector<8x512xf32>
    %320 = vector.extract_strided_slice %291 {offsets = [7, 0], sizes = [1, 512], strides = [1, 1]} : vector<9x512xf32> to vector<1x512xf32>
    %321 = vector.broadcast %320 : vector<1x512xf32> to vector<8x512xf32>
    %322 = arith.mulf %319, %321 : vector<8x512xf32>
    %c495_i32_100 = arith.constant 495 : i32
    %323 = tpu.dynamic_rotate %290 by %c495_i32_100 dim 1 : vector<8x512xf32>, i32 -> vector<8x512xf32>
    %324 = vector.extract_strided_slice %291 {offsets = [8, 0], sizes = [1, 512], strides = [1, 1]} : vector<9x512xf32> to vector<1x512xf32>
    %325 = vector.broadcast %324 : vector<1x512xf32> to vector<8x512xf32>
    %326 = arith.mulf %323, %325 : vector<8x512xf32>
    %327 = tpu.concatenate %295, %299, %303, %307, %310, %314, %318, %322, %326 in 0 : vector<8x512xf32>, vector<8x512xf32>, vector<8x512xf32>, vector<8x512xf32>, vector<8x512xf32>, vector<8x512xf32>, vector<8x512xf32>, vector<8x512xf32>, vector<8x512xf32> -> vector<72x512xf32>
    %c0_101 = arith.constant 0 : index
    %c0_102 = arith.constant 0 : index
    %328 = vector.load %arg20[%c0_101, %c0_102] : memref<8x72xf32, #tpu.memory_space<vmem>>, vector<8x72xf32>
    %cst_103 = arith.constant dense<0.000000e+00> : vector<8x512xf32>
    %329 = tpu.matmul %328, %327, %cst_103 {dimension_numbers = #tpu.dot_dimension_numbers<[1], [0], [0], [1], [0, 0, 1, 1], [], []>} : vector<8x72xf32>, vector<72x512xf32>, vector<8x512xf32> -> vector<8x512xf32>
    %c0_104 = arith.constant 0 : index
    %c0_105 = arith.constant 0 : index
    %330 = vector.load %arg21[%c0_104, %c0_105] : memref<8x1xf32, #tpu.memory_space<vmem>>, vector<8x1xf32>
    %331 = vector.broadcast %330 : vector<8x1xf32> to vector<8x512xf32>
    %332 = arith.addf %329, %331 : vector<8x512xf32>
    %333 = vector.extract_strided_slice %332 {offsets = [0, 0], sizes = [1, 512], strides = [1, 1]} : vector<8x512xf32> to vector<1x512xf32>
    %c0_106 = arith.constant 0 : index
    %c0_107 = arith.constant 0 : index
    %334 = vector.load %arg22[%c0_106, %c0_107] : memref<1x512xf32, #tpu.memory_space<vmem>>, vector<1x512xf32>
    tpu.vector_store %arg22[%c0_106, %c0_107], %333 {strides = array<i32>} : memref<1x512xf32, #tpu.memory_space<vmem>>, vector<1x512xf32>,
    return
  }
}

</mosaic_0001>

<bundles_post_ra>
// kernel: tpu_custom_call.1
= control target key start
LH: loop header
LB: loop body
LE: loop exit
PB: predicated region body
PF: predicated region fallthrough
CT: control target
= control target key end

     0   :  { %s5570_s0 = inlined_call_operand.hbm [shape: f32[8,512], index: 0, kind: input, shape index: {}]   ;;  %s5571_s1 = inlined_call_operand.hbm [shape: f32[8,128], index: 1, kind: input, shape index: {}]   ;;  %s5572_s2 = inlined_call_operand.hbm [shape: f32[16,128], index: 2, kind: input, shape index: {}]   ;;  %s5573_s3 = inlined_call_operand.hbm [shape: f32[9,512], index: 3, kind: input, shape index: {}]   ;;  %s5574_s4 = inlined_call_operand.hbm [shape: f32[9,128], index: 4, kind: input, shape index: {}]   ;;  %s5575_s5 = inlined_call_operand.hbm [shape: f32[9,128], index: 5, kind: input, shape index: {}]   ;;  %s5576_s6 = inlined_call_operand.hbm [shape: f32[32,144], index: 6, kind: input, shape index: {}]   ;;  %s5577_s7 = inlined_call_operand.vmem [shape: f32[32,1], index: 7, kind: input, shape index: {}]   ;;  %s5578_s8 = inlined_call_operand.hbm [shape: f32[32,288], index: 8, kind: input, shape index: {}]   ;;  %s5579_s9 = inlined_call_operand.vmem [shape: f32[32,1], index: 9, kind: input, shape index: {}]   ;;  %s5580_s10 = inlined_call_operand.vmem [shape: f32[128,128], index: 10, kind: input, shape index: {}]   ;;  %s5581_s11 = inlined_call_operand.vmem [shape: f32[8,360], index: 11, kind: input, shape index: {}]   ;;  %s5582_s12 = inlined_call_operand.vmem [shape: f32[8,1], index: 12, kind: input, shape index: {}]   ;;  %s5583_s13 = inlined_call_operand.hbm [shape: f32[8,72], index: 13, kind: input, shape index: {}]   ;;  %s5584_s14 = inlined_call_operand.vmem [shape: f32[8,1], index: 14, kind: input, shape index: {}]   ;;  %s5585_s15 = inlined_call_operand.hbm [shape: f32[128,512], index: 15, kind: input, shape index: {}]   ;;  %s5586_s16 = inlined_call_operand.vmem [shape: f32[8,144], index: 16, kind: input, shape index: {}]   ;;  %s5587_s17 = inlined_call_operand.vmem [shape: f32[8,1], index: 17, kind: input, shape index: {}]   ;;  %s5588_s18 = inlined_call_operand.vmem [shape: f32[8,72], index: 18, kind: input, shape index: {}]   ;;  %s5589_s19 = inlined_call_operand.vmem [shape: f32[8,1], index: 19, kind: input, shape index: {}]   ;;  %s5590_s20 = inlined_call_operand.vmem [shape: f32[8,72], index: 20, kind: input, shape index: {}]   ;;  %s5591_s21 = inlined_call_operand.vmem [shape: f32[8,1], index: 21, kind: input, shape index: {}]   ;;  %s5592_s22 = inlined_call_operand.hbm [shape: f32[1,512], index: 22, kind: output, shape index: {}]  }
   0x1   :  { %5624 = sst [smem:[#allocation40_spill]] %s5570_s0 }
   0x2   :  { %5625 = sst [smem:[#allocation41_spill]] %s5571_s1 }
   0x3   :  { %5626 = sst [smem:[#allocation42_spill]] %s5572_s2 }
   0x4   :  { %5627 = sst [smem:[#allocation43_spill]] %s5573_s3 }
   0x5   :  { %5628 = sst [smem:[#allocation44_spill]] %s5574_s4 }
   0x6   :  { %5629 = sst [smem:[#allocation45_spill]] %s5575_s5 }
   0x7   :  { %5630 = sst [smem:[#allocation46_spill]] %s5576_s6 }
   0x8   :  { %5631 = sst [smem:[#allocation47_spill]] %s5590_s20 }
   0x9   :  { %5632 = sst [smem:[#allocation48_spill]] %s5591_s21 }
   0xa   :  { %5633 = sst [smem:[#allocation49_spill]] %s5592_s22 }
   0xb   :  { %27 = vsyncpa [#allocation3], 0 }
   0xc   :  { %28 = vsyncpa [#allocation6], 0 }
   0xd   :  { %29 = vsyncpa [#allocation9], 0 }
   0xe   :  { %30 = vsyncpa [#allocation12], 0 }
   0xf   :  { %31 = vsyncpa [#allocation15], 0 }
  0x10   :  { %32 = vsyncpa [#allocation18], 0 }
  0x11   :  { %33 = vsyncpa [#allocation4], 0  ;;  %s3646_s3 = smov [#allocation5]   ;;  %s3647_s29 = smov [#allocation8]  }
  0x12   :  { %s50_s28 = sshll.u32 %s3646_s3, 4  ;;  %s71_s30 = sshll.u32 %s3647_s29, 4  ;;  %s51_s28 = int_to_ptr.vmem [resolvable:$true] %s50_s28  ;;  %s3803_s30 = int_to_ptr.vmem [resolvable:$true] %s71_s30 }
  0x13   :  { %s5634_s23 = sld [smem:[#allocation41_spill]] }
  0x19   :  { %s3390_s1 = scalar_lea.hbm %s5634_s23, 128 }
  0x1a   :  { %p3391_p0 = scmp.ne.s32.totalorder %s5634_s23, %s3390_s1  ;;  %p3394_p1 = scmp.lt.u32.totalorder %s3390_s1, %s5634_s23 }
  0x1c   :  { %p3396_p2 = pnand %p3394_p1, %p3391_p0 }
  0x1e   :  { %3399 = shalt.err (!%p3396_p2)
}
  0x1f   :  { %s3400_s26 = scalar_lea.vmem %s51_s28, 128  ;;  %p3405_p4 = scmp.lt.s32.totalorder %s51_s28, %s51_s28 }
  0x20   :  { %p3401_p3 = scmp.ne.s32.totalorder %s51_s28, %s3400_s26  ;;  %p3406_p5 = scmp.lt.s32.totalorder %s3400_s26, %s3400_s26 }
  0x22   :  { %p3407_p6 = por %p3406_p5, %p3405_p4 }
  0x24   :  { %p3408_p7 = pnand %p3407_p6, %p3401_p3 }
  0x26   :  { %3411 = shalt.err (!%p3408_p7)
}
  0x27   :  { %53 = dma.hbm_to_vmem [thread:$0]  %s5634_s23, 128, %s51_s28, [#allocation6]  }
  0x28   :  { %s5635_s4 = sld [smem:[#allocation43_spill]] }
  0x2e   :  { %s3412_s0 = scalar_lea.hbm %s5635_s4, 1024 }
  0x2f   :  { %p3413_p8 = scmp.ne.s32.totalorder %s5635_s4, %s3412_s0  ;;  %p3416_p9 = scmp.lt.u32.totalorder %s3412_s0, %s5635_s4 }
  0x31   :  { %p3418_p10 = pnand %p3416_p9, %p3413_p8 }
  0x33   :  { %3421 = shalt.err (!%p3418_p10)
}
  0x34   :  { %s3422_s25 = scalar_lea.vmem %s3803_s30, 1024  ;;  %p3427_p12 = scmp.lt.s32.totalorder %s3803_s30, %s3803_s30 }
  0x35   :  { %p3423_p11 = scmp.ne.s32.totalorder %s3803_s30, %s3422_s25  ;;  %p3428_p13 = scmp.lt.s32.totalorder %s3422_s25, %s3422_s25 }
  0x37   :  { %p3429_p0 = por %p3428_p13, %p3427_p12 }
  0x39   :  { %p3430_p1 = pnand %p3429_p0, %p3423_p11 }
  0x3b   :  { %3433 = shalt.err (!%p3430_p1)
}
  0x3c   :  { %s5601_s28 = smov 512   ;;  %s5602_s23 = smov 32  }
  0x3d   :  { %77 = dma.hbm_to_vmem [thread:$0]  %s5635_s4, 1024, %s3803_s30, [#allocation9], %s5601_s28, %s5601_s28, %s5602_s23  }
  0x3e   :  { %s3650_s27 = smov [#allocation11]   ;;  %s3651_s29 = smov [#allocation14]  }
  0x3f   :  { %s95_s3 = sshll.u32 %s3650_s27, 4  ;;  %s121_s0 = sshll.u32 %s3651_s29, 4  ;;  %s96_s3 = int_to_ptr.vmem [resolvable:$true] %s95_s3  ;;  %s3837_s0 = int_to_ptr.vmem [resolvable:$true] %s121_s0 }
  0x40   :  { %s5636_s1 = sld [smem:[#allocation45_spill]] }
  0x46   :  { %s3434_s6 = scalar_lea.hbm %s5636_s1, 256 }
  0x47   :  { %p3435_p2 = scmp.ne.s32.totalorder %s5636_s1, %s3434_s6  ;;  %p3438_p3 = scmp.lt.u32.totalorder %s3434_s6, %s5636_s1 }
  0x49   :  { %p3440_p4 = pnand %p3438_p3, %p3435_p2 }
  0x4b   :  { %3443 = shalt.err (!%p3440_p4)
}
  0x4c   :  { %s3444_s30 = scalar_lea.vmem %s96_s3, 256  ;;  %p3449_p6 = scmp.lt.s32.totalorder %s96_s3, %s96_s3 }
  0x4d   :  { %p3445_p5 = scmp.ne.s32.totalorder %s96_s3, %s3444_s30  ;;  %p3450_p7 = scmp.lt.s32.totalorder %s3444_s30, %s3444_s30 }
  0x4f   :  { %p3451_p8 = por %p3450_p7, %p3449_p6 }
  0x51   :  { %p3452_p9 = pnand %p3451_p8, %p3445_p5 }
  0x53   :  { %3455 = shalt.err (!%p3452_p9)
}
  0x54   :  { %s5603_s4 = smov 128   ;;  %s3653_s26 = smov 8  }
  0x55   :  { %101 = dma.hbm_to_vmem [thread:$0]  %s5636_s1, 256, %s96_s3, [#allocation12], %s5603_s4, %s5603_s4, %s3653_s26  }
  0x56   :  { %s3456_s27 = scalar_lea.hbm %s5578_s8, 1536 }
  0x57   :  { %p3457_p10 = scmp.ne.s32.totalorder %s5578_s8, %s3456_s27  ;;  %p3460_p11 = scmp.lt.u32.totalorder %s3456_s27, %s5578_s8 }
  0x59   :  { %p3462_p12 = pnand %p3460_p11, %p3457_p10 }
  0x5b   :  { %3465 = shalt.err (!%p3462_p12)
}
  0x5c   :  { %s3466_s25 = scalar_lea.vmem %s3837_s0, 1536  ;;  %p3471_p0 = scmp.lt.s32.totalorder %s3837_s0, %s3837_s0 }
  0x5d   :  { %p3467_p13 = scmp.ne.s32.totalorder %s3837_s0, %s3466_s25  ;;  %p3472_p1 = scmp.lt.s32.totalorder %s3466_s25, %s3466_s25 }
  0x5f   :  { %p3473_p2 = por %p3472_p1, %p3471_p0 }
  0x61   :  { %p3474_p3 = pnand %p3473_p2, %p3467_p13 }
  0x63   :  { %3477 = shalt.err (!%p3474_p3)
}
  0x64   :  { %s3654_s3 = smov 384   ;;  %s3655_s1 = smov 24  }
  0x65   :  { %127 = dma.hbm_to_vmem [thread:$0]  %s5578_s8, 1536, %s3837_s0, [#allocation15], %s3654_s3, %s3654_s3, %s3655_s1  }
  0x66   :  { %s3656_s2 = smov [#allocation2]   ;;  %s3657_s21 = smov [#allocation7]  }
  0x67   :  { %s40_s20 = sshll.u32 %s3656_s2, 4  ;;  %s59_s27 = sshll.u32 %s3657_s21, 4  ;;  %s41_s20 = int_to_ptr.vmem [resolvable:$true] %s40_s20  ;;  %s3871_s27 = int_to_ptr.vmem [resolvable:$true] %s59_s27 }
  0x68   :  { %s5637_s24 = sld [smem:[#allocation40_spill]] }
  0x6e   :  { %s3478_s6 = scalar_lea.hbm %s5637_s24, 512 }
  0x6f   :  { %p3479_p4 = scmp.ne.s32.totalorder %s5637_s24, %s3478_s6  ;;  %p3482_p5 = scmp.lt.u32.totalorder %s3478_s6, %s5637_s24 }
  0x71   :  { %p3484_p6 = pnand %p3482_p5, %p3479_p4 }
  0x73   :  { %3487 = shalt.err (!%p3484_p6)
}
  0x74   :  { %s3488_s8 = scalar_lea.vmem %s41_s20, 512  ;;  %p3493_p8 = scmp.lt.s32.totalorder %s41_s20, %s41_s20 }
  0x75   :  { %p3489_p7 = scmp.ne.s32.totalorder %s41_s20, %s3488_s8  ;;  %p3494_p9 = scmp.lt.s32.totalorder %s3488_s8, %s3488_s8 }
  0x77   :  { %p3495_p10 = por %p3494_p9, %p3493_p8 }
  0x79   :  { %p3496_p11 = pnand %p3495_p10, %p3489_p7 }
  0x7b   :  { %3499 = shalt.err (!%p3496_p11)
}
  0x7c   :  { %43 = dma.hbm_to_vmem [thread:$0]  %s5637_s24, 512, %s41_s20, [#allocation3]  }
  0x7d   :  { %s5638_s30 = sld [smem:[#allocation42_spill]] }
  0x83   :  { %s3500_s22 = scalar_lea.hbm %s5638_s30, 256 }
  0x84   :  { %p3501_p12 = scmp.ne.s32.totalorder %s5638_s30, %s3500_s22  ;;  %p3504_p13 = scmp.lt.u32.totalorder %s3500_s22, %s5638_s30 }
  0x86   :  { %p3506_p0 = pnand %p3504_p13, %p3501_p12 }
  0x88   :  { %3509 = shalt.err (!%p3506_p0)
}
  0x89   :  { %s3510_s29 = scalar_lea.vmem %s3871_s27, 256  ;;  %p3515_p2 = scmp.lt.s32.totalorder %s3871_s27, %s3871_s27 }
  0x8a   :  { %p3511_p1 = scmp.ne.s32.totalorder %s3871_s27, %s3510_s29  ;;  %p3516_p3 = scmp.lt.s32.totalorder %s3510_s29, %s3510_s29 }
  0x8c   :  { %p3517_p4 = por %p3516_p3, %p3515_p2 }
  0x8e   :  { %p3518_p5 = pnand %p3517_p4, %p3511_p1 }
  0x90   :  { %3521 = shalt.err (!%p3518_p5)
}
  0x91   :  { %s5639_s20 = smov 128   ;;  %s3658_s6 = smov [#allocation10]  }
  0x92   :  { %65 = dma.hbm_to_vmem [thread:$0]  %s5638_s30, 256, %s3871_s27, [#allocation6], %s5639_s20, %s5639_s20, %s3653_s26  }
  0x93   :  { %s83_s25 = sshll.u32 %s3658_s6, 4  ;;  %s3659_s8 = smov [#allocation13]   ;;  %s84_s25 = int_to_ptr.vmem [resolvable:$true] %s83_s25 }
  0x94   :  { %s107_s0 = sshll.u32 %s3659_s8, 4  ;;  %s5640_s28 = sld [smem:[#allocation44_spill]]  ;;  %s3905_s0 = int_to_ptr.vmem [resolvable:$true] %s107_s0 }
  0x9a   :  { %s3522_s22 = scalar_lea.hbm %s5640_s28, 256 }
  0x9b   :  { %p3523_p6 = scmp.ne.s32.totalorder %s5640_s28, %s3522_s22  ;;  %p3526_p7 = scmp.lt.u32.totalorder %s3522_s22, %s5640_s28 }
  0x9d   :  { %p3528_p8 = pnand %p3526_p7, %p3523_p6 }
  0x9f   :  { %3531 = shalt.err (!%p3528_p8)
}
  0xa0   :  { %s3532_s27 = scalar_lea.vmem %s84_s25, 256  ;;  %p3537_p10 = scmp.lt.s32.totalorder %s84_s25, %s84_s25 }
  0xa1   :  { %p3533_p9 = scmp.ne.s32.totalorder %s84_s25, %s3532_s27  ;;  %p3538_p11 = scmp.lt.s32.totalorder %s3532_s27, %s3532_s27 }
  0xa3   :  { %p3539_p12 = por %p3538_p11, %p3537_p10 }
  0xa5   :  { %p3540_p13 = pnand %p3539_p12, %p3533_p9 }
  0xa7   :  { %3543 = shalt.err (!%p3540_p13)
}
  0xa8   :  { %89 = dma.hbm_to_vmem [thread:$0]  %s5640_s28, 256, %s84_s25, [#allocation9], %s5639_s20, %s5639_s20, %s3653_s26  }
  0xa9   :  { %s5641_s6 = sld [smem:[#allocation46_spill]] }
  0xaf   :  { %s3544_s8 = scalar_lea.hbm %s5641_s6, 1024 }
  0xb0   :  { %p3545_p0 = scmp.ne.s32.totalorder %s5641_s6, %s3544_s8  ;;  %p3548_p1 = scmp.lt.u32.totalorder %s3544_s8, %s5641_s6 }
  0xb2   :  { %p3550_p2 = pnand %p3548_p1, %p3545_p0 }
  0xb4   :  { %3553 = shalt.err (!%p3550_p2)
}
  0xb5   :  { %s3554_s23 = scalar_lea.vmem %s3905_s0, 1024  ;;  %p3559_p4 = scmp.lt.s32.totalorder %s3905_s0, %s3905_s0 }
  0xb6   :  { %p3555_p3 = scmp.ne.s32.totalorder %s3905_s0, %s3554_s23  ;;  %p3560_p5 = scmp.lt.s32.totalorder %s3554_s23, %s3554_s23 }
  0xb8   :  { %p3561_p6 = por %p3560_p5, %p3559_p4 }
  0xba   :  { %p3562_p7 = pnand %p3561_p6, %p3555_p3 }
  0xbc   :  { %3565 = shalt.err (!%p3562_p7)
}
  0xbd   :  { %s3660_s20 = smov 256   ;;  %s3661_s25 = smov 16  }
  0xbe   :  { %113 = dma.hbm_to_vmem [thread:$0]  %s5641_s6, 1024, %s3905_s0, [#allocation12], %s3660_s20, %s3660_s20, %s3661_s25  }
  0xbf   :  { %s3662_s21 = smov [#allocation16]   ;;  %s3663_s30 = smov [#allocation17]  }
  0xc0   :  { %s142_s27 = sshll.u32 %s3662_s21, 4  ;;  %s153_s29 = sshll.u32 %s3663_s30, 4  ;;  %s143_s27 = int_to_ptr.vmem [resolvable:$true] %s142_s27  ;;  %s3940_s29 = int_to_ptr.vmem [resolvable:$true] %s153_s29 }
  0xc1   :  { %s3566_s8 = scalar_lea.hbm %s5583_s13, 128 }
  0xc2   :  { %p3567_p8 = scmp.ne.s32.totalorder %s5583_s13, %s3566_s8  ;;  %p3570_p9 = scmp.lt.u32.totalorder %s3566_s8, %s5583_s13 }
  0xc4   :  { %p3572_p10 = pnand %p3570_p9, %p3567_p8 }
  0xc6   :  { %3575 = shalt.err (!%p3572_p10)
}
  0xc7   :  { %s3576_s0 = scalar_lea.vmem %s143_s27, 128  ;;  %p3581_p12 = scmp.lt.s32.totalorder %s143_s27, %s143_s27 }
  0xc8   :  { %p3577_p11 = scmp.ne.s32.totalorder %s143_s27, %s3576_s0  ;;  %p3582_p13 = scmp.lt.s32.totalorder %s3576_s0, %s3576_s0 }
  0xca   :  { %p3583_p0 = por %p3582_p13, %p3581_p12 }
  0xcc   :  { %p3584_p1 = pnand %p3583_p0, %p3577_p11 }
  0xce   :  { %3587 = shalt.err (!%p3584_p1)
}
  0xcf   :  { %145 = dma.hbm_to_vmem [thread:$0]  %s5583_s13, 128, %s143_s27, [#allocation15]  }
  0xd0   :  { %s3588_s4 = scalar_lea.hbm %s5585_s15, 8192 }
  0xd1   :  { %p3589_p2 = scmp.ne.s32.totalorder %s5585_s15, %s3588_s4  ;;  %p3592_p3 = scmp.lt.u32.totalorder %s3588_s4, %s5585_s15 }
  0xd3   :  { %p3594_p4 = pnand %p3592_p3, %p3589_p2 }
  0xd5   :  { %3597 = shalt.err (!%p3594_p4)
}
  0xd6   :  { %s3598_s8 = scalar_lea.vmem %s3940_s29, 8192  ;;  %p3603_p6 = scmp.lt.s32.totalorder %s3940_s29, %s3940_s29 }
  0xd7   :  { %p3599_p5 = scmp.ne.s32.totalorder %s3940_s29, %s3598_s8  ;;  %p3604_p7 = scmp.lt.s32.totalorder %s3598_s8, %s3598_s8 }
  0xd9   :  { %p3605_p8 = por %p3604_p7, %p3603_p6 }
  0xdb   :  { %p3606_p9 = pnand %p3605_p8, %p3599_p5 }
  0xdd   :  { %3609 = shalt.err (!%p3606_p9)
}
  0xde   :  { %s5642_s13 = smov 32   ;;  %s5643_s27 = smov 512  }
  0xdf   :  { %159 = dma.hbm_to_vmem [thread:$0]  %s5585_s15, 8192, %s3940_s29, [#allocation18], %s5643_s27, %s5643_s27, %s5642_s13  }
  0xe0   :  { %3632 = dma.done.wait [#allocation3], 512  }
  0xe1   :  { %3633 = vsyncadd [#allocation3], 4294966784 }
  0xe2   :  { %3634 = dma.done.wait [#allocation6], 384  }
  0xe3   :  { %3635 = vsyncadd [#allocation6], 4294966912 }
  0xe4   :  { %3636 = dma.done.wait [#allocation9], 1280  }
  0xe5   :  { %3637 = vsyncadd [#allocation9], 4294966016 }
  0xe6   :  { %3638 = dma.done.wait [#allocation12], 1280  }
  0xe7   :  { %3639 = vsyncadd [#allocation12], 4294966016 }
  0xe8   :  { %3640 = dma.done.wait [#allocation15], 1664  }
  0xe9   :  { %3641 = vsyncadd [#allocation15], 4294965632 }
  0xea   :  { %3642 = dma.done.wait [#allocation18], 8192  }
  0xeb   :  { %3643 = vsyncadd [#allocation18], 4294959104  ;;  %v3664_v0 = vmov 0.0|0.0   ;;  %v5605_v1 = vlaneseq  ;;  %v202_v2 = vld [vmem:[#allocation7] sm:$0xff]  ;;  %s3665_s22 = smov 4   ;;  %s3666_s15 = smov 5  }
  0xec   :  { %2985 = vmatprep.subr.bf16.mxu0 %v3664_v0  ;;  %216 = vrot.lane.b32.xlu1 %v202_v2, %s3665_s22  ;;  %v203_v3 = vld [vmem:[#allocation7 + $0x8] sm:$0xff]  ;;  %v3985_v6 = vld [vmem:[#allocation11] sm:$0xff]  ;;  %s3667_s29 = smov 3   ;;  %s3668_s2 = smov 1   ;;  %v293_v11 = vld [vmem:[#allocation13 + $0x8] sm:$0xff]  ;;  %vm324_vm0 = vcmask 130048  }
  0xed   :  { %206 = vrot.lane.b32.xlu0 %v202_v2, %s3666_s15  ;;  %v3978_v4 = vshrl.u32 %v5605_v1, 7  ;;  %s3669_s0 = smov 127   ;;  %s3670_s6 = smov 125   ;;  %2731 = vmatprep.mubr.msk.f32.mxu0 %vm324_vm0, %v293_v11  ;;  %v301_v12 = vld [vmem:[%s5577_s7 + $0x8] sm:$0xff]  ;;  %v300_v13 = vld [vmem:[%s5577_s7] sm:$0xff]  ;;  %v3673_v14 = vmov 0  }
  0xee   :  { %s3671_s23 = smov 124   ;;  %s3672_s20 = smov 123   ;;  %3389 = vset.pattern.permute.xlu1 %v3673_v14  ;;  %3388 = vset.pattern.permute.xlu0 %v3673_v14  ;;  %v302_v15 = vld [vmem:[%s5577_s7 + $0x10] sm:$0xff]  ;;  %v303_v16 = vld [vmem:[%s5577_s7 + $0x18] sm:$0xff]  ;;  %vm570_vm5 = vcmask 261120   ;;  %vm3679_vm10 = vmmov 0  }
  0xef   :  { %5644 = vst [vmem:[#allocation27_spill] sm:$0xff] %v3978_v4  ;;  %v3981_v5 = vsub.s32 4, %v3978_v4  ;;  %v4025_v17 = vsub.s32 0, %v3978_v4  ;;  %v4028_v18 = vsub.s32 1, %v3978_v4  ;;  %v4035_v22 = vsub.s32 2, %v3978_v4  ;;  %v295_v14 = vld [vmem:[#allocation13 + $0x18] sm:$0xff] }
  0xf0   :  { %218 = vrot.lane.b32.xlu1 %v203_v3, %s3665_s22  ;;  %v4048_v29 = vsub.s32 3, %v3978_v4  ;;  %v4062_v44 = vsub.s32 5, %v3978_v4  ;;  %v4070_v49 = vsub.s32 6, %v3978_v4  ;;  %v4080_v55 = vsub.s32 7, %v3978_v4  ;;  %s3674_s3 = smov 9   ;;  %s3675_s1 = smov 121  }
  0xf1   :  { %208 = vrot.lane.b32.xlu0 %v203_v3, %s3666_s15  ;;  %v3989_v7 = vrot.slane %v3985_v6, %v3981_v5  ;;  %v4032_v21 = vrot.slane %v3985_v6, %v4025_v17  ;;  %v4039_v23 = vrot.slane %v3985_v6, %v4028_v18  ;;  %v4045_v28 = vrot.slane %v3985_v6, %v4035_v22  ;;  %s3682_s30 = smov 15   ;;  %s3683_s5 = smov 113  }
  0xf2   :  { %v4056_v37 = vrot.slane %v3985_v6, %v4048_v29  ;;  %v4067_v48 = vrot.slane %v3985_v6, %v4062_v44  ;;  %v4077_v54 = vrot.slane %v3985_v6, %v4070_v49  ;;  %5645 = vst [vmem:[#allocation28_spill] sm:$0xff] %v4080_v55  ;;  %v4090_v61 = vrot.slane %v3985_v6, %v4080_v55  ;;  %s3684_s24 = smov 112  }
  0xf3   :  { %v3992_v8 = vmul.f32 %v3989_v7, %v202_v2  ;;  %v3995_v9 = vmul.f32 %v3989_v7, %v203_v3  ;;  %vm1039_vm11 = vcmask 850944   ;;  %vm1218_vm13 = vcmask 588800  }
  0xf4   :  { %228 = vrot.lane.b32.xlu1 %v203_v3, %s3667_s29 }
  0xf5   :  { %226 = vrot.lane.b32.xlu0 %v202_v2, %s3667_s29  ;;  %v2998_v10 = vpack.c.bf16 %v3995_v9, %v3992_v8 }
  0xf8   :  { %238 = vrot.lane.b32.xlu1 %v203_v3, %s3668_s2 }
  0xf9   :  { %236 = vrot.lane.b32.xlu0 %v202_v2, %s3668_s2 }
  0xfc   :  { %254 = vrot.lane.b32.xlu1 %v203_v3, %s3669_s0 }
  0xfd   :  { %252 = vrot.lane.b32.xlu0 %v202_v2, %s3669_s0 }
 0x100   :  { %264 = vrot.lane.b32.xlu1 %v203_v3, %s3670_s6 }
 0x101   :  { %262 = vrot.lane.b32.xlu0 %v202_v2, %s3670_s6 }
 0x104   :  { %274 = vrot.lane.b32.xlu1 %v203_v3, %s3671_s23 }
 0x105   :  { %272 = vrot.lane.b32.xlu0 %v202_v2, %s3671_s23 }
 0x108   :  { %284 = vrot.lane.b32.xlu1 %v203_v3, %s3672_s20  ;;  %v4096_v3 = vld [vmem:[#allocation11 + $0x8] ss:$0 sm:$0xff] }
 0x109   :  { %282 = vrot.lane.b32.xlu0 %v202_v2, %s3672_s20 }
 0x10c   :  { %311 = vperm.xlu1 %3389, %v301_v12  }
 0x10d   :  { %306 = vperm.xlu0 %3388, %v300_v13   ;;  %v292_v13 = vld [vmem:[#allocation13] sm:$0xff] }
 0x110   :  { %316 = vperm.xlu1 %3389, %v302_v15   ;;  %v294_v15 = vld [vmem:[#allocation13 + $0x10] sm:$0xff] }
 0x111   :  { %321 = vperm.xlu0 %3388, %v303_v16   ;;  %v297_v16 = vld [vmem:[#allocation13 + $0x28] sm:$0xff] }
 0x15e   :  { %v217_v19 = vpop.permute.xlu1 %216 }
 0x15f   :  { %v207_v20 = vpop.permute.xlu0 %206  ;;  %v224_v30 = vmul.f32 %v4039_v23, %v217_v19  ;;  %v296_v19 = vld [vmem:[#allocation13 + $0x20] sm:$0xff] }
 0x160   :  { %v214_v26 = vmul.f32 %v4032_v21, %v207_v20  ;;  %v299_v20 = vld [vmem:[#allocation13 + $0x38] sm:$0xff] }
 0x162   :  { %v219_v24 = vpop.permute.xlu1 %218 }
 0x163   :  { %v209_v25 = vpop.permute.xlu0 %208  ;;  %v225_v31 = vmul.f32 %v4039_v23, %v219_v24  ;;  %v298_v24 = vld [vmem:[#allocation13 + $0x30] sm:$0xff] }
 0x164   :  { %v215_v27 = vmul.f32 %v4032_v21, %v209_v25 }
 0x165   :  { %v2989_v38 = vpack.c.bf16 %v225_v31, %v224_v30 }
 0x166   :  { %v2986_v32 = vpack.c.bf16 %v215_v27, %v214_v26  ;;  %v229_v33 = vpop.permute.xlu1 %228 }
 0x167   :  { %v227_v34 = vpop.permute.xlu0 %226  ;;  %v235_v35 = vmul.f32 %v4045_v28, %v229_v33 }
 0x168   :  { %2987 = vmatpush1.bf16.msra.mxu0 %v2986_v32  ;;  %v234_v36 = vmul.f32 %v4045_v28, %v227_v34 }
 0x169   :  { %2988 = vmatprep.subr.bf16.mxu0 %v3664_v0 }
 0x16a   :  { %v239_v39 = vpop.permute.xlu1 %238  ;;  %v2992_v41 = vpack.c.bf16 %v235_v35, %v234_v36 }
 0x16b   :  { %v237_v40 = vpop.permute.xlu0 %236  ;;  %v245_v42 = vmul.f32 %v4056_v37, %v239_v39 }
 0x16c   :  { %2990 = vmatpush1.bf16.msra.mxu0 %v2989_v38  ;;  %v244_v43 = vmul.f32 %v4056_v37, %v237_v40 }
 0x16d   :  { %2991 = vmatprep.subr.bf16.mxu0 %v3664_v0 }
 0x16e   :  { %v255_v45 = vpop.permute.xlu1 %254  ;;  %v2995_v47 = vpack.c.bf16 %v245_v42, %v244_v43 }
 0x16f   :  { %v253_v46 = vpop.permute.xlu0 %252  ;;  %v261_v52 = vmul.f32 %v4067_v48, %v255_v45 }
 0x170   :  { %2993 = vmatpush1.bf16.msra.mxu0 %v2992_v41  ;;  %v260_v53 = vmul.f32 %v4067_v48, %v253_v46 }
 0x171   :  { %2994 = vmatprep.subr.bf16.mxu0 %v3664_v0 }
 0x172   :  { %v265_v50 = vpop.permute.xlu1 %264  ;;  %v3001_v58 = vpack.c.bf16 %v261_v52, %v260_v53 }
 0x173   :  { %v263_v51 = vpop.permute.xlu0 %262  ;;  %v271_v59 = vmul.f32 %v4077_v54, %v265_v50 }
 0x174   :  { %2996 = vmatpush1.bf16.msra.mxu0 %v2995_v47  ;;  %v270_v60 = vmul.f32 %v4077_v54, %v263_v51 }
 0x175   :  { %2997 = vmatprep.subr.bf16.mxu0 %v3664_v0 }
 0x176   :  { %v275_v56 = vpop.permute.xlu1 %274  ;;  %v3004_v62 = vpack.c.bf16 %v271_v59, %v270_v60 }
 0x177   :  { %v273_v57 = vpop.permute.xlu0 %272  ;;  %v281_v63 = vmul.f32 %v4090_v61, %v275_v56 }
 0x178   :  { %2999 = vmatpush1.bf16.msra.mxu0 %v2998_v10  ;;  %v280_v2 = vmul.f32 %v4090_v61, %v273_v57 }
 0x179   :  { %3000 = vmatprep.subr.bf16.mxu0 %v3664_v0 }
 0x17a   :  { %v285_v8 = vpop.permute.xlu1 %284  ;;  %v3007_v10 = vpack.c.bf16 %v281_v63, %v280_v2  ;;  %v546_v2 = vld [vmem:[%s5579_s9] sm:$0xff] }
 0x17b   :  { %v283_v9 = vpop.permute.xlu0 %282  ;;  %v291_v11 = vmul.f32 %v4096_v3, %v285_v8  ;;  %v547_v8 = vld [vmem:[%s5579_s9 + $0x8] sm:$0xff] }
 0x17c   :  { %3002 = vmatpush1.bf16.msra.mxu0 %v3001_v58  ;;  %v290_v6 = vmul.f32 %v4096_v3, %v283_v9  ;;  %v548_v9 = vld [vmem:[%s5579_s9 + $0x10] sm:$0xff] }
 0x17d   :  { %3003 = vmatprep.subr.bf16.mxu0 %v3664_v0 }
 0x17e   :  { %v3010_v12 = vpack.c.bf16 %v291_v11, %v290_v6  ;;  %v765_v11 = vld [vmem:[%s5580_s10] sm:$0xff]  ;;  %v766_v6 = vld [vmem:[%s5580_s10 + $0x8] sm:$0xff] }
 0x180   :  { %3005 = vmatpush1.bf16.msra.mxu0 %v3004_v62 }
 0x181   :  { %3006 = vmatprep.subr.bf16.mxu0 %v3664_v0 }
 0x184   :  { %3008 = vmatpush1.bf16.msra.mxu0 %v3007_v10  ;;  %v549_v10 = vld [vmem:[%s5579_s9 + $0x18] sm:$0xff]  ;;  %s3685_s9 = smov 111  }
 0x185   :  { %3009 = vmatprep.subr.bf16.mxu0 %v3664_v0 }
 0x188   :  { %3011 = vmatpush1.bf16.msra.mxu0 %v3010_v12  ;;  %v767_v12 = vld [vmem:[%s5580_s10 + $0x10] sm:$0xff] }
 0x18b   :  { %402 = vmatmul.mubr.f32.vlgmr.msra.gmra.mrb[0].mxu0 %v292_v13  ;;  %v312_v31 = vpop.permute.xlu1 %311  ;;  %v3052_v13 = vpack.c.bf16 %v766_v6, %v765_v11 }
 0x18c   :  { %2732 = vmatprep.mubr.msk.f32.mxu0 %vm324_vm0, %v295_v14  ;;  %v307_v25 = vpop.permute.xlu0 %306  ;;  %v768_v14 = vld [vmem:[%s5580_s10 + $0x18] sm:$0xff] }
 0x18d   :  { %3053 = vmatprep.subr.bf16.mxu0 %v3052_v13 }
 0x18e   :  { %3055 = vmatpush3.bf16.msra.mxu0 %v3052_v13 }
 0x18f   :  { %407 = vmatmul.mubr.f32.gmra.mrb[2].mxu0 %v294_v15  ;;  %v317_v39 = vpop.permute.xlu1 %316  ;;  %v3056_v15 = vpack.c.bf16 %v768_v14, %v767_v12 }
 0x190   :  { %2733 = vmatprep.mubr.msk.f32.mxu0 %vm324_vm0, %v297_v16  ;;  %v322_v50 = vpop.permute.xlu0 %321 }
 0x191   :  { %3057 = vmatprep.subr.bf16.mxu0 %v3056_v15 }
 0x192   :  { %3059 = vmatpush3.bf16.msra.mxu0 %v3056_v15 }
 0x193   :  { %412 = vmatmul.mubr.f32.gmra.mrb[4].mxu0 %v296_v19 }
 0x194   :  { %2734 = vmatprep.mubr.msk.f32.mxu0 %vm324_vm0, %v299_v20 }
 0x197   :  { %417 = vmatmul.mubr.f32.gmra.mrb[6].mxu0 %v298_v24 }
 0x25e   :  { %v403_v26 = vpop.f32.mrb[0].mxu0 }
 0x25f   :  { %v404_v27 = vadd.f32 %v403_v26, %v307_v25  ;;  %v405_v30 = vpop.f32.mrb[1].mxu0 }
 0x261   :  { %vm422_vm1 = vcmp.ge.f32.partialorder %v404_v27, 0.0  ;;  %v426_v32 = vmul.f32 0.01, %v404_v27 }
 0x262   :  { %v408_v33 = vpop.f32.mrb[2].mxu0 }
 0x263   :  { %v430_v34 = vsel %vm422_vm1, %v404_v27, %v426_v32  ;;  %v409_v35 = vadd.f32 %v408_v33, %v312_v31  ;;  %v410_v36 = vpop.f32.mrb[3].mxu0 }
 0x264   :  { %434 = vrot.lane.b32.xlu1 %v430_v34, %s3666_s15  ;;  %v482_v45 = vmul.f32 %v430_v34, %v3989_v7 }
 0x265   :  { %vm423_vm2 = vcmp.ge.f32.partialorder %v409_v35, 0.0  ;;  %v427_v38 = vmul.f32 0.01, %v409_v35 }
 0x266   :  { %v413_v40 = vpop.f32.mrb[4].mxu0 }
 0x267   :  { %v431_v41 = vsel %vm423_vm2, %v409_v35, %v427_v38  ;;  %v414_v42 = vadd.f32 %v413_v40, %v317_v39  ;;  %v415_v43 = vpop.f32.mrb[5].mxu0 }
 0x268   :  { %436 = vrot.lane.b32.xlu0 %v431_v41, %s3666_s15  ;;  %486 = vrot.lane.b32.xlu1 %v430_v34, %s3669_s0  ;;  %v483_v46 = vmul.f32 %v431_v41, %v3989_v7 }
 0x269   :  { %v428_v47 = vmul.f32 0.01, %v414_v42  ;;  %vm424_vm3 = vcmp.ge.f32.partialorder %v414_v42, 0.0 }
 0x26a   :  { %v418_v51 = vpop.f32.mrb[6].mxu0  ;;  %v3012_v52 = vpack.c.bf16 %v483_v46, %v482_v45 }
 0x26b   :  { %v419_v53 = vadd.f32 %v418_v51, %v322_v50  ;;  %v420_v56 = vpop.f32.mrb[7].mxu0  ;;  %v432_v57 = vsel %vm424_vm3, %v414_v42, %v428_v47 }
 0x26c   :  { %488 = vrot.lane.b32.xlu0 %v431_v41, %s3669_s0  ;;  %446 = vrot.lane.b32.xlu1 %v430_v34, %s3665_s22  ;;  %v484_v60 = vmul.f32 %v432_v57, %v3989_v7 }
 0x26d   :  { %vm425_vm4 = vcmp.ge.f32.partialorder %v419_v53, 0.0  ;;  %v429_v58 = vmul.f32 0.01, %v419_v53  ;;  %3013 = vmatprep.subr.bf16.mxu1 %v3012_v52 }
 0x26f   :  { %v433_v59 = vsel %vm425_vm4, %v419_v53, %v429_v58 }
 0x270   :  { %448 = vrot.lane.b32.xlu0 %v431_v41, %s3665_s22  ;;  %498 = vrot.lane.b32.xlu1 %v430_v34, %s3670_s6  ;;  %v485_v62 = vmul.f32 %v433_v59, %v3989_v7  ;;  %v535_v7 = vld [vmem:[#allocation14 + $0x8] sm:$0xff] }
 0x271   :  { %647 = vmatprep.mubr.f32.mxu1 %v535_v7 }
 0x272   :  { %v3016_v63 = vpack.c.bf16 %v485_v62, %v484_v60 }
 0x274   :  { %500 = vrot.lane.b32.xlu0 %v431_v41, %s3670_s6  ;;  %458 = vrot.lane.b32.xlu1 %v430_v34, %s3667_s29 }
 0x278   :  { %460 = vrot.lane.b32.xlu0 %v431_v41, %s3667_s29  ;;  %510 = vrot.lane.b32.xlu1 %v430_v34, %s3671_s23 }
 0x27c   :  { %512 = vrot.lane.b32.xlu0 %v431_v41, %s3671_s23  ;;  %470 = vrot.lane.b32.xlu1 %v430_v34, %s3668_s2 }
 0x280   :  { %472 = vrot.lane.b32.xlu0 %v431_v41, %s3668_s2  ;;  %438 = vrot.lane.b32.xlu1 %v432_v57, %s3666_s15 }
 0x284   :  { %440 = vrot.lane.b32.xlu0 %v433_v59, %s3666_s15  ;;  %490 = vrot.lane.b32.xlu1 %v432_v57, %s3669_s0  ;;  %s3678_s15 = smov 119  }
 0x288   :  { %492 = vrot.lane.b32.xlu0 %v433_v59, %s3669_s0  ;;  %450 = vrot.lane.b32.xlu1 %v432_v57, %s3665_s22 }
 0x28c   :  { %452 = vrot.lane.b32.xlu0 %v433_v59, %s3665_s22  ;;  %502 = vrot.lane.b32.xlu1 %v432_v57, %s3670_s6  ;;  %s3677_s22 = smov 7  }
 0x290   :  { %504 = vrot.lane.b32.xlu0 %v433_v59, %s3670_s6  ;;  %462 = vrot.lane.b32.xlu1 %v432_v57, %s3667_s29 }
 0x294   :  { %464 = vrot.lane.b32.xlu0 %v433_v59, %s3667_s29  ;;  %514 = vrot.lane.b32.xlu1 %v432_v57, %s3671_s23  ;;  %s3687_s29 = smov [#allocation19]  }
 0x295   :  { %s2716_s6 = sshll.u32 %s3687_s29, 4  ;;  %s2717_s6 = int_to_ptr.vmem [resolvable:$true] %s2716_s6 }
 0x296   :  { %p3615_p11 = scmp.lt.s32.totalorder %s2717_s6, %s2717_s6 }
 0x298   :  { %516 = vrot.lane.b32.xlu0 %v433_v59, %s3671_s23  ;;  %474 = vrot.lane.b32.xlu1 %v432_v57, %s3668_s2  ;;  %s3610_s23 = scalar_lea.vmem %s2717_s6, 64 }
 0x299   :  { %p3611_p10 = scmp.ne.s32.totalorder %s2717_s6, %s3610_s23  ;;  %p3616_p12 = scmp.lt.s32.totalorder %s3610_s23, %s3610_s23 }
 0x29b   :  { %p3617_p13 = por %p3616_p12, %p3615_p11 }
 0x29c   :  { %476 = vrot.lane.b32.xlu0 %v433_v59, %s3668_s2  ;;  %522 = vrot.lane.b32.xlu1 %v430_v34, %s3672_s20 }
 0x29d   :  { %p3618_p0 = pnand %p3617_p13, %p3611_p10 }
 0x2a0   :  { %524 = vrot.lane.b32.xlu0 %v431_v41, %s3672_s20  ;;  %526 = vrot.lane.b32.xlu1 %v432_v57, %s3672_s20 }
 0x2a4   :  { %528 = vrot.lane.b32.xlu0 %v433_v59, %s3672_s20  ;;  %552 = vperm.xlu1 %3389, %v546_v2  }
 0x2a8   :  { %557 = vperm.xlu0 %3388, %v547_v8   ;;  %562 = vperm.xlu1 %3389, %v548_v9  }
 0x2ac   :  { %567 = vperm.xlu0 %3388, %v549_v10  }
 0x2d6   :  { %v435_v16 = vpop.permute.xlu1 %434 }
 0x2d7   :  { %v442_v24 = vmul.f32 %v435_v16, %v4032_v21 }
 0x2da   :  { %v437_v19 = vpop.permute.xlu0 %436  ;;  %v487_v20 = vpop.permute.xlu1 %486 }
 0x2db   :  { %v443_v25 = vmul.f32 %v437_v19, %v4032_v21  ;;  %v494_v50 = vmul.f32 %v487_v20, %v4067_v48 }
 0x2dd   :  { %v3014_v26 = vpack.c.bf16 %v443_v25, %v442_v24 }
 0x2de   :  { %v489_v27 = vpop.permute.xlu0 %488  ;;  %v447_v30 = vpop.permute.xlu1 %446 }
 0x2df   :  { %3015 = vmatpush3.bf16.msra.mxu1 %v3014_v26  ;;  %v495_v42 = vmul.f32 %v489_v27, %v4067_v48  ;;  %v454_v58 = vmul.f32 %v447_v30, %v4039_v23 }
 0x2e0   :  { %3017 = vmatprep.subr.bf16.mxu1 %v3016_v63 }
 0x2e1   :  { %v3020_v53 = vpack.c.bf16 %v495_v42, %v494_v50 }
 0x2e2   :  { %v449_v31 = vpop.permute.xlu0 %448  ;;  %v499_v32 = vpop.permute.xlu1 %498 }
 0x2e3   :  { %v455_v51 = vmul.f32 %v449_v31, %v4039_v23  ;;  %v506_v10 = vmul.f32 %v499_v32, %v4077_v54 }
 0x2e5   :  { %v3022_v62 = vpack.c.bf16 %v455_v51, %v454_v58 }
 0x2e6   :  { %v501_v33 = vpop.permute.xlu0 %500  ;;  %v459_v34 = vpop.permute.xlu1 %458 }
 0x2e7   :  { %v466_v14 = vmul.f32 %v459_v34, %v4045_v28 }
 0x2ea   :  { %v461_v35 = vpop.permute.xlu0 %460  ;;  %v511_v36 = vpop.permute.xlu1 %510 }
 0x2eb   :  { %v467_v11 = vmul.f32 %v461_v35, %v4045_v28  ;;  %v518_v30 = vmul.f32 %v511_v36, %v4090_v61 }
 0x2ed   :  { %v3030_v19 = vpack.c.bf16 %v467_v11, %v466_v14  ;;  %v774_v14 = vld [vmem:[%s5580_s10 + $0x48] sm:$0xff] }
 0x2ee   :  { %v513_v38 = vpop.permute.xlu0 %512  ;;  %v471_v39 = vpop.permute.xlu1 %470 }
 0x2ef   :  { %v519_v20 = vmul.f32 %v513_v38, %v4090_v61  ;;  %v478_v35 = vmul.f32 %v471_v39, %v4056_v37 }
 0x2f2   :  { %v473_v40 = vpop.permute.xlu0 %472  ;;  %v439_v41 = vpop.permute.xlu1 %438 }
 0x2f3   :  { %v444_v46 = vmul.f32 %v439_v41, %v4032_v21  ;;  %v479_v31 = vmul.f32 %v473_v40, %v4056_v37 }
 0x2f5   :  { %v3038_v42 = vpack.c.bf16 %v479_v31, %v478_v35  ;;  %v4234_v31 = vld [vmem:[#allocation5] sm:$0xff] }
 0x2f6   :  { %v441_v43 = vpop.permute.xlu0 %440  ;;  %v491_v45 = vpop.permute.xlu1 %490  ;;  %934 = vrot.lane.b32.xlu0 %v4234_v31, %s3668_s2  ;;  %877 = vrot.lane.b32.xlu1 %v4234_v31, %s3674_s3 }
 0x2f7   :  { %v445_v47 = vmul.f32 %v441_v43, %v4032_v21  ;;  %v496_v59 = vmul.f32 %v491_v45, %v4067_v48  ;;  %v507_v21 = vmul.f32 %v501_v33, %v4077_v54 }
 0x2f9   :  { %v3018_v52 = vpack.c.bf16 %v445_v47, %v444_v46 }
 0x2fa   :  { %v493_v56 = vpop.permute.xlu0 %492  ;;  %v451_v57 = vpop.permute.xlu1 %450  ;;  %981 = vrot.lane.b32.xlu0 %v4234_v31, %s3675_s1  ;;  %896 = vrot.lane.b32.xlu1 %v4234_v31, %s3653_s26 }
 0x2fb   :  { %v497_v60 = vmul.f32 %v493_v56, %v4067_v48  ;;  %3019 = vmatpush3.bf16.msra.mxu1 %v3018_v52  ;;  %v456_v8 = vmul.f32 %v451_v57, %v4039_v23  ;;  %v3028_v48 = vpack.c.bf16 %v507_v21, %v506_v10  ;;  %v538_v52 = vld [vmem:[#allocation14 + $0x20] sm:$0xff]  ;;  %v543_v21 = vld [vmem:[#allocation14 + $0x48] sm:$0xff]  ;;  %v770_v10 = vld [vmem:[%s5580_s10 + $0x28] sm:$0xff] }
 0x2fc   :  { %3021 = vmatprep.subr.bf16.mxu1 %v3020_v53 }
 0x2fd   :  { %v3024_v63 = vpack.c.bf16 %v497_v60, %v496_v59  ;;  %v541_v59 = vld [vmem:[#allocation14 + $0x38] sm:$0xff] }
 0x2fe   :  { %v453_v7 = vpop.permute.xlu0 %452  ;;  %v503_v2 = vpop.permute.xlu1 %502 }
 0x2ff   :  { %v457_v9 = vmul.f32 %v453_v7, %v4039_v23  ;;  %3023 = vmatpush3.bf16.msra.mxu1 %v3022_v62  ;;  %v508_v15 = vmul.f32 %v503_v2, %v4077_v54  ;;  %v540_v62 = vld [vmem:[#allocation14 + $0x30] sm:$0xff]  ;;  %v542_v2 = vld [vmem:[#allocation14 + $0x40] sm:$0xff] }
 0x300   :  { %3025 = vmatprep.subr.bf16.mxu1 %v3024_v63  ;;  %v544_v63 = vld [vmem:[#allocation14 + $0x50] sm:$0xff] }
 0x301   :  { %v3026_v6 = vpack.c.bf16 %v457_v9, %v456_v8  ;;  %v536_v7 = vld [vmem:[#allocation14 + $0x10] sm:$0xff]  ;;  %v545_v8 = vld [vmem:[#allocation14 + $0x58] sm:$0xff]  ;;  %v769_v9 = vld [vmem:[%s5580_s10 + $0x20] sm:$0xff] }
 0x302   :  { %v505_v12 = vpop.permute.xlu0 %504  ;;  %v463_v13 = vpop.permute.xlu1 %462  ;;  %v3060_v11 = vpack.c.bf16 %v770_v10, %v769_v9 }
 0x303   :  { %v509_v16 = vmul.f32 %v505_v12, %v4077_v54  ;;  %3027 = vmatpush3.bf16.msra.mxu1 %v3026_v6  ;;  %v468_v26 = vmul.f32 %v463_v13, %v4045_v28  ;;  %v3036_v54 = vpack.c.bf16 %v519_v20, %v518_v30  ;;  %v771_v6 = vld [vmem:[%s5580_s10 + $0x30] sm:$0xff]  ;;  %v773_v13 = vld [vmem:[%s5580_s10 + $0x40] sm:$0xff] }
 0x304   :  { %3029 = vmatprep.subr.bf16.mxu1 %v3028_v48  ;;  %3061 = vmatprep.subr.bf16.mxu0 %v3060_v11  ;;  %v772_v48 = vld [vmem:[%s5580_s10 + $0x38] sm:$0xff]  ;;  %v777_v20 = vld [vmem:[%s5580_s10 + $0x60] sm:$0xff] }
 0x305   :  { %v3032_v23 = vpack.c.bf16 %v509_v16, %v508_v15  ;;  %3063 = vmatpush3.bf16.msra.mxu0 %v3060_v11  ;;  %v3064_v12 = vpack.c.bf16 %v772_v48, %v771_v6  ;;  %v3068_v15 = vpack.c.bf16 %v774_v14, %v773_v13  ;;  %v775_v16 = vld [vmem:[%s5580_s10 + $0x50] sm:$0xff]  ;;  %v4244_v11 = vld [vmem:[#allocation10] sm:$0xff] }
 0x306   :  { %v465_v24 = vpop.permute.xlu0 %464  ;;  %v515_v25 = vpop.permute.xlu1 %514  ;;  %v4248_v6 = vrot.slane %v4244_v11, %v3981_v5 }
 0x307   :  { %v469_v27 = vmul.f32 %v465_v24, %v4045_v28  ;;  %3031 = vmatpush3.bf16.msra.mxu1 %v3030_v19  ;;  %v520_v38 = vmul.f32 %v515_v25, %v4090_v61  ;;  %3065 = vmatprep.subr.bf16.mxu0 %v3064_v12  ;;  %v776_v19 = vld [vmem:[%s5580_s10 + $0x58] sm:$0xff]  ;;  %v778_v24 = vld [vmem:[%s5580_s10 + $0x68] sm:$0xff] }
 0x308   :  { %3033 = vmatprep.subr.bf16.mxu1 %v3032_v23  ;;  %v3072_v23 = vpack.c.bf16 %v776_v19, %v775_v16  ;;  %v3076_v25 = vpack.c.bf16 %v778_v24, %v777_v20 }
 0x309   :  { %v3034_v32 = vpack.c.bf16 %v469_v27, %v468_v26  ;;  %3067 = vmatpush3.bf16.msra.mxu0 %v3064_v12  ;;  %v779_v26 = vld [vmem:[%s5580_s10 + $0x70] sm:$0xff]  ;;  %v780_v27 = vld [vmem:[%s5580_s10 + $0x78] sm:$0xff]  ;;  %s3676_s10 = smov 120  }
 0x30a   :  { %v517_v33 = vpop.permute.xlu0 %516  ;;  %v475_v34 = vpop.permute.xlu1 %474  ;;  %3069 = vmatprep.subr.bf16.mxu0 %v3068_v15  ;;  %v3080_v30 = vpack.c.bf16 %v780_v27, %v779_v26  ;;  %v5606_v26 = vmov 0.0   ;;  %v1033_v27 = vld [vmem:[%s5582_s12] sm:$0xff] }
 0x30b   :  { %v521_v41 = vmul.f32 %v517_v33, %v4090_v61  ;;  %3035 = vmatpush3.bf16.msra.mxu1 %v3034_v32  ;;  %v480_v36 = vmul.f32 %v475_v34, %v4056_v37  ;;  %v534_v61 = vld [vmem:[#allocation14] sm:$0xff] }
 0x30c   :  { %3037 = vmatprep.subr.bf16.mxu1 %v3036_v54 }
 0x30d   :  { %v3040_v28 = vpack.c.bf16 %v521_v41, %v520_v38  ;;  %3071 = vmatpush3.bf16.msra.mxu0 %v3068_v15 }
 0x30e   :  { %v477_v43 = vpop.permute.xlu0 %476  ;;  %v523_v45 = vpop.permute.xlu1 %522  ;;  %3073 = vmatprep.subr.bf16.mxu0 %v3072_v23 }
 0x30f   :  { %v481_v40 = vmul.f32 %v477_v43, %v4056_v37  ;;  %3039 = vmatpush3.bf16.msra.mxu1 %v3038_v42  ;;  %v530_v39 = vmul.f32 %v4096_v3, %v523_v45  ;;  %v537_v37 = vld [vmem:[#allocation14 + $0x18] sm:$0xff] }
 0x310   :  { %3041 = vmatprep.subr.bf16.mxu1 %v3040_v28 }
 0x311   :  { %v3042_v46 = vpack.c.bf16 %v481_v40, %v480_v36  ;;  %3075 = vmatpush3.bf16.msra.mxu0 %v3072_v23 }
 0x312   :  { %v525_v47 = vpop.permute.xlu0 %524  ;;  %v527_v51 = vpop.permute.xlu1 %526  ;;  %3077 = vmatprep.subr.bf16.mxu0 %v3076_v25 }
 0x313   :  { %v531_v50 = vmul.f32 %v4096_v3, %v525_v47  ;;  %3043 = vmatpush3.bf16.msra.mxu1 %v3042_v46  ;;  %v532_v57 = vmul.f32 %v4096_v3, %v527_v51 }
 0x315   :  { %v3044_v53 = vpack.c.bf16 %v531_v50, %v530_v39  ;;  %3079 = vmatpush3.bf16.msra.mxu0 %v3076_v25  ;;  %v1031_v25 = vld [vmem:[%s5581_s11 + $0x8] sm:$0xff] }
 0x316   :  { %v529_v56 = vpop.permute.xlu0 %528  ;;  %648 = vmatmul.mubr.f32.vlgmr.msra.gmra.mrb[0].mxu1 %v534_v61  ;;  %3081 = vmatprep.subr.bf16.mxu0 %v3080_v30 }
 0x317   :  { %v533_v58 = vmul.f32 %v4096_v3, %v529_v56  ;;  %3045 = vmatprep.subr.bf16.mxu1 %v3044_v53  ;;  %652 = vmatprep.mubr.f32.mxu1 %v538_v52  ;;  %v539_v3 = vld [vmem:[#allocation14 + $0x28] sm:$0xff] }
 0x318   :  { %3047 = vmatpush3.bf16.msra.mxu1 %v3044_v53 }
 0x319   :  { %v3048_v60 = vpack.c.bf16 %v533_v58, %v532_v57  ;;  %3083 = vmatpush3.bf16.msra.mxu0 %v3080_v30 }
 0x31a   :  { %653 = vmatmul.mubr.f32.gmra.mrb[2].mxu1 %v537_v37  ;;  %3116 = vmatprep.subr.bf16.mxu0 %v3664_v0 }
 0x31b   :  { %3049 = vmatprep.subr.bf16.mxu1 %v3048_v60  ;;  %657 = vmatprep.mubr.f32.mxu1 %v541_v59 }
 0x31c   :  { %3051 = vmatpush3.bf16.msra.mxu1 %v3048_v60 }
 0x31e   :  { %658 = vmatmul.mubr.f32.gmra.mrb[4].mxu1 %v540_v62 }
 0x31f   :  { %662 = vmatprep.mubr.f32.mxu1 %v544_v63 }
 0x322   :  { %663 = vmatmul.mubr.f32.gmra.mrb[6].mxu1 %v543_v21 }
 0x323   :  { %2891 = vmatprep.mubr.msk.f32.mxu1 %vm570_vm5, %v536_v7  ;;  %v553_v36 = vpop.permute.xlu1 %552 }
 0x326   :  { %2892 = vmatmul.mubr.msk.f32.vlgmr.msra.gmra.mrb[8].mxu1 %vm570_vm5, %v539_v3 }
 0x327   :  { %2894 = vmatprep.mubr.msk.f32.mxu1 %vm570_vm5, %v542_v2  ;;  %v558_v43 = vpop.permute.xlu0 %557  ;;  %v563_v56 = vpop.permute.xlu1 %562 }
 0x32a   :  { %2895 = vmatmul.mubr.msk.f32.gmra.mrb[10].mxu1 %vm570_vm5, %v545_v8 }
 0x32b   :  { %v568_v52 = vpop.permute.xlu0 %567  ;;  %1107 = vmatprep.mubr.f32.mxu1 %v1031_v25 }
 0x368   :  { %v935_v30 = vpop.permute.xlu0 %934 }
 0x3e9   :  { %v2784_v32 = vpop.f32.mrb[0].mxu1 }
 0x3ea   :  { %v2785_v54 = vpop.f32.mrb[1].mxu1 }
 0x3eb   :  { %v2786_v33 = vadd.f32 %v2785_v54, %v2784_v32  ;;  %v878_v32 = vpop.permute.xlu1 %877  ;;  %v982_v54 = vpop.permute.xlu0 %981 }
 0x3ed   :  { %v2787_v34 = vpop.f32.mrb[2].mxu1  ;;  %v650_v50 = vadd.f32 %v2786_v33, %v553_v36 }
 0x3ee   :  { %v2788_v35 = vpop.f32.mrb[3].mxu1 }
 0x3ef   :  { %v2789_v38 = vadd.f32 %v2788_v35, %v2787_v34  ;;  %v4314_v33 = vpop.permute.xlu1 %896 }
 0x3f1   :  { %v2790_v41 = vpop.f32.mrb[4].mxu1  ;;  %v655_v47 = vadd.f32 %v2789_v38, %v558_v43 }
 0x3f2   :  { %v2791_v42 = vpop.f32.mrb[5].mxu1 }
 0x3f3   :  { %v2792_v28 = vadd.f32 %v2791_v42, %v2790_v41 }
 0x3f5   :  { %v2793_v45 = vpop.f32.mrb[6].mxu1  ;;  %v660_v60 = vadd.f32 %v2792_v28, %v563_v56 }
 0x3f6   :  { %v2794_v40 = vpop.f32.mrb[7].mxu1 }
 0x3f7   :  { %v2795_v46 = vadd.f32 %v2794_v40, %v2793_v45 }
 0x3f9   :  { %v2893_v39 = vpop.f32.mrb[8].mxu1  ;;  %v665_v58 = vadd.f32 %v2795_v46, %v568_v52  ;;  %v4328_v52 = vrot.slane %v4244_v11, %v4025_v17 }
 0x3fa   :  { %v740_v61 = vadd.f32 %v2893_v39, %v655_v47  ;;  %v734_v51 = vpop.f32.mrb[9].mxu1 }
 0x3fb   :  { %v735_v53 = vadd.f32 %v734_v51, %v650_v50 }
 0x3fc   :  { %v758_v57 = vmul.f32 0.01, %v740_v61  ;;  %vm754_vm6 = vcmp.ge.f32.partialorder %v740_v61, 0.0 }
 0x3fd   :  { %v757_v37 = vmul.f32 0.01, %v735_v53  ;;  %v2896_v59 = vpop.f32.mrb[10].mxu1  ;;  %vm753_vm7 = vcmp.ge.f32.partialorder %v735_v53, 0.0 }
 0x3fe   :  { %v750_v62 = vadd.f32 %v2896_v59, %v665_v58  ;;  %v744_v63 = vpop.f32.mrb[11].mxu1  ;;  %v762_v3 = vsel %vm754_vm6, %v740_v61, %v758_v57 }
 0x3ff   :  { %v745_v21 = vadd.f32 %v744_v63, %v660_v60  ;;  %v761_v7 = vsel %vm753_vm7, %v735_v53, %v757_v37  ;;  %v4332_v53 = vrot.slane %v4244_v11, %v4048_v29 }
 0x400   :  { %v760_v2 = vmul.f32 0.01, %v750_v62  ;;  %2929 = vmatprep.mubr.f32.mxu0 %v761_v7  ;;  %vm756_vm9 = vcmp.ge.f32.partialorder %v750_v62, 0.0 }
 0x401   :  { %v759_v8 = vmul.f32 0.01, %v745_v21  ;;  %2930 = vmatmul.mubr.f32.vlgmr.msra.gmra.mrb[8].mxu0 %v762_v3  ;;  %vm755_vm8 = vcmp.ge.f32.partialorder %v745_v21, 0.0  ;;  %v944_v63 = vmul.f32 %v4332_v53, %v935_v30 }
 0x402   :  { %v764_v10 = vsel %vm756_vm9, %v750_v62, %v760_v2 }
 0x403   :  { %v763_v9 = vsel %vm755_vm8, %v745_v21, %v759_v8 }
 0x404   :  { %2932 = vmatprep.mubr.f32.mxu0 %v763_v9 }
 0x405   :  { %2933 = vmatmul.mubr.f32.gmra.mrb[10].mxu0 %v764_v10 }
 0x406   :  { %2961 = vmatprep.mubr.msk.f32.mxu0 %vm3679_vm10, %v5606_v26 }
 0x4d4   :  { %v2931_v48 = vpop.f32.mrb[8].mxu0 }
 0x4d5   :  { %871 = vrot.lane.b32.xlu0 %v2931_v48, %s3674_s3  ;;  %928 = vrot.lane.b32.xlu1 %v2931_v48, %s3668_s2  ;;  %v847_v12 = vpop.f32.mrb[9].mxu0  ;;  %v4253_v13 = vmul.f32 %v2931_v48, %v4248_v6 }
 0x4d6   :  { %v4256_v14 = vmul.f32 %v4248_v6, %v847_v12 }
 0x4d8   :  { %v2934_v15 = vpop.f32.mrb[10].mxu0  ;;  %v3092_v16 = vpack.c.bf16 %v4253_v13, %v4256_v14 }
 0x4d9   :  { %956 = vrot.lane.b32.xlu0 %v2931_v48, %s3669_s0  ;;  %890 = vrot.lane.b32.xlu1 %v2931_v48, %s3653_s26  ;;  %v857_v19 = vpop.f32.mrb[11].mxu0  ;;  %v4263_v23 = vmul.f32 %v2934_v15, %v4248_v6 }
 0x4da   :  { %v4266_v20 = vmul.f32 %v4248_v6, %v857_v19 }
 0x4dc   :  { %v3096_v24 = vpack.c.bf16 %v4263_v23, %v4266_v20 }
 0x4dd   :  { %994 = vrot.lane.b32.xlu0 %v2931_v48, %s3676_s10  ;;  %909 = vrot.lane.b32.xlu1 %v2931_v48, %s3677_s22 }
 0x4e1   :  { %888 = vrot.lane.b32.xlu0 %v847_v12, %s3653_s26  ;;  %869 = vrot.lane.b32.xlu1 %v847_v12, %s3674_s3 }
 0x4e5   :  { %907 = vrot.lane.b32.xlu0 %v847_v12, %s3677_s22  ;;  %954 = vrot.lane.b32.xlu1 %v847_v12, %s3669_s0 }
 0x4e9   :  { %992 = vrot.lane.b32.xlu1 %v847_v12, %s3676_s10  ;;  %875 = vrot.lane.b32.xlu0 %v2934_v15, %s3674_s3 }
 0x4ed   :  { %979 = vrot.lane.b32.xlu0 %v2934_v15, %s3675_s1  ;;  %932 = vrot.lane.b32.xlu1 %v2934_v15, %s3668_s2 }
 0x4f1   :  { %894 = vrot.lane.b32.xlu0 %v2934_v15, %s3653_s26  ;;  %962 = vrot.lane.b32.xlu1 %v4234_v31, %s3669_s0 }
 0x4f5   :  { %1000 = vrot.lane.b32.xlu1 %v4234_v31, %s3676_s10  ;;  %930 = vrot.lane.b32.xlu0 %v857_v19, %s3668_s2 }
 0x4f9   :  { %913 = vrot.lane.b32.xlu1 %v2934_v15, %s3677_s22  ;;  %960 = vrot.lane.b32.xlu0 %v2934_v15, %s3669_s0 }
 0x4fd   :  { %873 = vrot.lane.b32.xlu1 %v857_v19, %s3674_s3  ;;  %998 = vrot.lane.b32.xlu0 %v2934_v15, %s3676_s10 }
 0x501   :  { %977 = vrot.lane.b32.xlu1 %v857_v19, %s3675_s1  ;;  %892 = vrot.lane.b32.xlu0 %v857_v19, %s3653_s26 }
 0x505   :  { %975 = vrot.lane.b32.xlu1 %v2931_v48, %s3675_s1  ;;  %973 = vrot.lane.b32.xlu0 %v847_v12, %s3675_s1 }
 0x509   :  { %958 = vrot.lane.b32.xlu1 %v857_v19, %s3669_s0  ;;  %1011 = vrot.lane.b32.xlu0 %v847_v12, %s3678_s15 }
 0x50d   :  { %996 = vrot.lane.b32.xlu1 %v857_v19, %s3676_s10  ;;  %911 = vrot.lane.b32.xlu0 %v857_v19, %s3677_s22 }
 0x511   :  { %1013 = vrot.lane.b32.xlu1 %v2931_v48, %s3678_s15  ;;  %915 = vrot.lane.b32.xlu0 %v4234_v31, %s3677_s22  ;;  %v4346_v48 = vrot.slane %v4244_v11, %v4028_v18 }
 0x515   :  { %926 = vrot.lane.b32.xlu1 %v847_v12, %s3668_s2  ;;  %1015 = vrot.lane.b32.xlu0 %v857_v19, %s3678_s15  ;;  %v4352_v19 = vrot.slane %v4244_v11, %v4070_v49 }
 0x519   :  { %1017 = vrot.lane.b32.xlu1 %v2934_v15, %s3678_s15  ;;  %1019 = vrot.lane.b32.xlu0 %v4234_v31, %s3678_s15 }
 0x51d   :  { %1036 = vperm.xlu1 %3389, %v1033_v27  }
 0x547   :  { %v872_v34 = vpop.permute.xlu0 %871  ;;  %v929_v35 = vpop.permute.xlu1 %928 }
 0x548   :  { %v941_v37 = vmul.f32 %v4332_v53, %v929_v35  ;;  %v884_v62 = vmul.f32 %v4328_v52, %v872_v34  ;;  %v887_v35 = vmul.f32 %v4328_v52, %v878_v32 }
 0x54b   :  { %v4316_v38 = vpop.permute.xlu0 %956  ;;  %v891_v41 = vpop.permute.xlu1 %890 }
 0x54f   :  { %v4318_v42 = vpop.permute.xlu0 %994  ;;  %v4320_v28 = vpop.permute.xlu1 %909 }
 0x553   :  { %v889_v43 = vpop.permute.xlu0 %888  ;;  %v870_v45 = vpop.permute.xlu1 %869 }
 0x554   :  { %v883_v56 = vmul.f32 %v4328_v52, %v870_v45  ;;  %v902_v25 = vmul.f32 %v4346_v48, %v889_v43  ;;  %v4358_v45 = vrot.slane %v4244_v11, %v4080_v55 }
 0x556   :  { %v3086_v7 = vpack.c.bf16 %v884_v62, %v883_v56  ;;  %v4364_v56 = vrot.slane %v4244_v11, %v4062_v44  ;;  %v3094_v43 = vpack.c.bf16 %v902_v25, %v887_v35 }
 0x557   :  { %v4322_v36 = vpop.permute.xlu0 %907  ;;  %v955_v40 = vpop.permute.xlu1 %954 }
 0x55b   :  { %v993_v46 = vpop.permute.xlu1 %992  ;;  %v876_v47 = vpop.permute.xlu0 %875 }
 0x55c   :  { %v886_v12 = vmul.f32 %v4328_v52, %v876_v47  ;;  %v1006_v32 = vmul.f32 %v4358_v45, %v993_v46 }
 0x55f   :  { %v980_v39 = vpop.permute.xlu0 %979  ;;  %v933_v50 = vpop.permute.xlu1 %932 }
 0x560   :  { %v943_v59 = vmul.f32 %v4332_v53, %v933_v50  ;;  %v990_v50 = vmul.f32 %v4352_v19, %v980_v39  ;;  %v953_v39 = vmul.f32 %v4248_v6, %v4234_v31 }
 0x562   :  { %v3088_v8 = vpack.c.bf16 %v944_v63, %v943_v59  ;;  %v968_v59 = vmul.f32 %v4364_v56, %v955_v40  ;;  %v991_v63 = vmul.f32 %v4352_v19, %v982_v54 }
 0x563   :  { %v895_v61 = vpop.permute.xlu0 %894  ;;  %v4324_v51 = vpop.permute.xlu1 %962 }
 0x564   :  { %v3120_v13 = vpack.c.bf16 %v1006_v32, %v991_v63  ;;  %v905_v14 = vmul.f32 %v4346_v48, %v895_v61  ;;  %v3100_v40 = vpack.c.bf16 %v968_v59, %v953_v39 }
 0x567   :  { %v4335_v57 = vpop.permute.xlu1 %1000  ;;  %v931_v58 = vpop.permute.xlu0 %930 }
 0x568   :  { %v942_v60 = vmul.f32 %v4332_v53, %v931_v58 }
 0x56a   :  { %v3084_v21 = vpack.c.bf16 %v942_v60, %v941_v37 }
 0x56b   :  { %v4342_v3 = vpop.permute.xlu1 %913  ;;  %v961_v2 = vpop.permute.xlu0 %960 }
 0x56c   :  { %3085 = vmatprep.subr.bf16.mxu1 %v3084_v21  ;;  %v903_v21 = vmul.f32 %v4346_v48, %v891_v41  ;;  %v969_v41 = vmul.f32 %v4364_v56, %v4316_v38  ;;  %v971_v61 = vmul.f32 %v4364_v56, %v961_v2 }
 0x56d   :  { %3087 = vmatpush3.bf16.msra.mxu1 %v3086_v7  ;;  %v4387_v7 = vrot.slane %v4244_v11, %v4035_v22  ;;  %v1007_v11 = vmul.f32 %v4358_v45, %v4318_v42 }
 0x56e   :  { %3089 = vmatprep.subr.bf16.mxu1 %v3088_v8 }
 0x56f   :  { %v874_v9 = vpop.permute.xlu1 %873  ;;  %v999_v10 = vpop.permute.xlu0 %998  ;;  %v921_v20 = vmul.f32 %v4387_v7, %v4322_v36 }
 0x570   :  { %v885_v15 = vmul.f32 %v4328_v52, %v874_v9  ;;  %v922_v9 = vmul.f32 %v4387_v7, %v4320_v28  ;;  %v1009_v25 = vmul.f32 %v4358_v45, %v999_v10 }
 0x572   :  { %v3090_v27 = vpack.c.bf16 %v886_v12, %v885_v15  ;;  %v972_v15 = vmul.f32 %v4364_v56, %v4324_v51  ;;  %v3106_v36 = vpack.c.bf16 %v922_v9, %v921_v20  ;;  %v924_v51 = vmul.f32 %v4387_v7, %v4342_v3  ;;  %v1212_v9 = vld [vmem:[%s5584_s14] sm:$0xff]  ;;  %s3681_s14 = smov 17  }
 0x573   :  { %v978_v30 = vpop.permute.xlu1 %977  ;;  %v893_v34 = vpop.permute.xlu0 %892 }
 0x574   :  { %v989_v47 = vmul.f32 %v4352_v19, %v978_v30  ;;  %3091 = vmatpush3.bf16.msra.mxu1 %v3090_v27  ;;  %v904_v37 = vmul.f32 %v4346_v48, %v893_v34  ;;  %v3108_v30 = vpack.c.bf16 %v972_v15, %v971_v61  ;;  %v1300_v15 = vld [vmem:[#allocation17 + $0x28] sm:$0xff] }
 0x575   :  { %3093 = vmatprep.subr.bf16.mxu1 %v3092_v16  ;;  %v906_v16 = vmul.f32 %v4346_v48, %v4314_v33 }
 0x576   :  { %v3117_v58 = vpack.c.bf16 %v990_v50, %v989_v47  ;;  %v3098_v31 = vpack.c.bf16 %v904_v37, %v903_v21  ;;  %v1010_v50 = vmul.f32 %v4358_v45, %v4335_v57  ;;  %v4409_v47 = vld [vmem:[#allocation10 + $0x8] ss:$0 sm:$0xff] }
 0x577   :  { %v976_v60 = vpop.permute.xlu1 %975  ;;  %v974_v62 = vpop.permute.xlu0 %973 }
 0x578   :  { %3095 = vmatpush3.bf16.msra.mxu1 %v3094_v43  ;;  %3118 = vmatpush3.bf16.msra.mxu0 %v3117_v58  ;;  %v988_v34 = vmul.f32 %v4352_v19, %v976_v60  ;;  %v987_v42 = vmul.f32 %v4352_v19, %v974_v62  ;;  %v3126_v10 = vpack.c.bf16 %v1010_v50, %v1009_v25  ;;  %v1295_v25 = vld [vmem:[#allocation17] sm:$0xff] }
 0x579   :  { %3097 = vmatprep.subr.bf16.mxu1 %v3096_v24  ;;  %3119 = vmatprep.subr.bf16.mxu0 %v3664_v0  ;;  %v3102_v24 = vpack.c.bf16 %v906_v16, %v905_v14  ;;  %v1030_v14 = vld [vmem:[%s5581_s11] sm:$0xff] }
 0x57a   :  { %v3112_v37 = vpack.c.bf16 %v988_v34, %v987_v42  ;;  %v1308_v34 = vld [vmem:[#allocation17 + $0x68] sm:$0xff] }
 0x57b   :  { %v959_v46 = vpop.permute.xlu1 %958  ;;  %v1012_v54 = vpop.permute.xlu0 %1011 }
 0x57c   :  { %v970_v23 = vmul.f32 %v4364_v56, %v959_v46  ;;  %3099 = vmatpush3.bf16.msra.mxu1 %v3098_v31  ;;  %3121 = vmatpush3.bf16.msra.mxu0 %v3120_v13  ;;  %v1025_v57 = vmul.f32 %v4409_v47, %v1012_v54  ;;  %v1032_v46 = vld [vmem:[%s5581_s11 + $0x10] sm:$0xff] }
 0x57d   :  { %3101 = vmatprep.subr.bf16.mxu1 %v3100_v40  ;;  %3122 = vmatprep.subr.bf16.mxu0 %v3664_v0 }
 0x57e   :  { %v3104_v33 = vpack.c.bf16 %v970_v23, %v969_v41 }
 0x57f   :  { %v997_v8 = vpop.permute.xlu1 %996  ;;  %v912_v38 = vpop.permute.xlu0 %911 }
 0x580   :  { %v1008_v12 = vmul.f32 %v4358_v45, %v997_v8  ;;  %3103 = vmatpush3.bf16.msra.mxu1 %v3102_v24  ;;  %v923_v2 = vmul.f32 %v4387_v7, %v912_v38 }
 0x581   :  { %3105 = vmatprep.subr.bf16.mxu1 %v3104_v33 }
 0x582   :  { %v3123_v27 = vpack.c.bf16 %v1008_v12, %v1007_v11  ;;  %v3110_v43 = vpack.c.bf16 %v924_v51, %v923_v2  ;;  %v1296_v12 = vld [vmem:[#allocation17 + $0x8] sm:$0xff] }
 0x583   :  { %v1014_v35 = vpop.permute.xlu1 %1013  ;;  %v916_v28 = vpop.permute.xlu0 %915  ;;  %v1312_v51 = vld [vmem:[#allocation17 + $0x88] sm:$0xff] }
 0x584   :  { %3107 = vmatpush3.bf16.msra.mxu1 %v3106_v36  ;;  %3124 = vmatpush3.bf16.msra.mxu0 %v3123_v27  ;;  %v1026_v32 = vmul.f32 %v4409_v47, %v1014_v35  ;;  %v925_v58 = vmul.f32 %v4387_v7, %v916_v28  ;;  %v3146_v36 = vpack.c.bf16 %v1300_v15, %v1296_v12  ;;  %v1299_v27 = vld [vmem:[#allocation17 + $0x20] sm:$0xff] }
 0x585   :  { %3109 = vmatprep.subr.bf16.mxu1 %v3108_v30  ;;  %3125 = vmatprep.subr.bf16.mxu0 %v3664_v0  ;;  %v3148_v2 = vpack.c.bf16 %v1299_v27, %v1295_v25  ;;  %v1304_v30 = vld [vmem:[#allocation17 + $0x48] sm:$0xff]  ;;  %v1303_v35 = vld [vmem:[#allocation17 + $0x40] sm:$0xff] }
 0x586   :  { %v3129_v60 = vpack.c.bf16 %v1026_v32, %v1025_v57  ;;  %v3150_v42 = vpack.c.bf16 %v1308_v34, %v1304_v30  ;;  %v1307_v28 = vld [vmem:[#allocation17 + $0x60] sm:$0xff]  ;;  %v1324_v57 = vld [vmem:[#allocation17 + $0xe8] sm:$0xff] }
 0x587   :  { %v927_v39 = vpop.permute.xlu1 %926  ;;  %v1016_v3 = vpop.permute.xlu0 %1015  ;;  %v3152_v50 = vpack.c.bf16 %v1307_v28, %v1303_v35  ;;  %v1311_v32 = vld [vmem:[#allocation17 + $0x80] sm:$0xff] }
 0x588   :  { %v940_v59 = vmul.f32 %v4332_v53, %v927_v39  ;;  %3111 = vmatpush3.bf16.msra.mxu1 %v3110_v43  ;;  %3127 = vmatpush3.bf16.msra.mxu0 %v3126_v10  ;;  %v1027_v21 = vmul.f32 %v4409_v47, %v1016_v3  ;;  %v1316_v10 = vld [vmem:[#allocation17 + $0xa8] sm:$0xff]  ;;  %v1319_v3 = vld [vmem:[#allocation17 + $0xc0] sm:$0xff] }
 0x589   :  { %3113 = vmatprep.subr.bf16.mxu1 %v3112_v37  ;;  %3128 = vmatprep.subr.bf16.mxu0 %v3664_v0  ;;  %v3154_v43 = vpack.c.bf16 %v1316_v10, %v1312_v51  ;;  %v1320_v39 = vld [vmem:[#allocation17 + $0xc8] sm:$0xff] }
 0x58a   :  { %v3114_v62 = vpack.c.bf16 %v940_v59, %v925_v58  ;;  %v1315_v58 = vld [vmem:[#allocation17 + $0xa0] sm:$0xff]  ;;  %v3158_v59 = vpack.c.bf16 %v1324_v57, %v1320_v39  ;;  %v1310_v39 = vld [vmem:[#allocation17 + $0x78] sm:$0xff] }
 0x58b   :  { %v1018_v63 = vpop.permute.xlu1 %1017  ;;  %v1020_v31 = vpop.permute.xlu0 %1019  ;;  %v3156_v37 = vpack.c.bf16 %v1315_v58, %v1311_v32  ;;  %v1298_v32 = vld [vmem:[#allocation17 + $0x18] sm:$0xff] }
 0x58c   :  { %v1028_v13 = vmul.f32 %v4409_v47, %v1018_v63  ;;  %3115 = vmatpush3.bf16.msra.mxu1 %v3114_v62  ;;  %3130 = vmatpush3.bf16.msra.mxu0 %v3129_v60  ;;  %v1029_v40 = vmul.f32 %v4409_v47, %v1020_v31  ;;  %v1323_v60 = vld [vmem:[#allocation17 + $0xe0] sm:$0xff]  ;;  %v1328_v62 = vld [vmem:[#allocation17 + $0x108] sm:$0xff]  ;;  %v1302_v58 = vld [vmem:[#allocation17 + $0x38] sm:$0xff] }
 0x58d   :  { %3131 = vmatprep.subr.bf16.mxu0 %v3664_v0  ;;  %3134 = vmatprep.subr.bf16.mxu1 %v3664_v0  ;;  %v1332_v63 = vld [vmem:[#allocation17 + $0x128] sm:$0xff]  ;;  %v1331_v31 = vld [vmem:[#allocation17 + $0x120] sm:$0xff]  ;;  %v3178_v57 = vpack.c.bf16 %v1302_v58, %v1298_v32  ;;  %v1353_v58 = vld [vmem:[#allocation17 + $0x1d0] sm:$0xff] }
 0x58e   :  { %v3132_v16 = vpack.c.bf16 %v1028_v13, %v1027_v21  ;;  %v3160_v21 = vpack.c.bf16 %v1323_v60, %v1319_v3  ;;  %v3162_v13 = vpack.c.bf16 %v1332_v63, %v1328_v62  ;;  %v1305_v60 = vld [vmem:[#allocation17 + $0x50] sm:$0xff]  ;;  %v1314_v62 = vld [vmem:[#allocation17 + $0x98] sm:$0xff] }
 0x58f   :  { %1108 = vmatmul.mubr.f32.vlgmr.msra.gmra.mrb[12].mxu1 %v1030_v14  ;;  %v1327_v14 = vld [vmem:[#allocation17 + $0x100] sm:$0xff]  ;;  %v1318_v63 = vld [vmem:[#allocation17 + $0xb8] sm:$0xff] }
 0x590   :  { %3133 = vmatpush3.bf16.msra.mxu0 %v3132_v16  ;;  %2982 = vmatprep.mubr.msk.f32.mxu1 %vm3679_vm10, %v5606_v26  ;;  %v1336_v16 = vld [vmem:[#allocation17 + $0x148] sm:$0xff] }
 0x591   :  { %2959 = vmatprep.subr.mxu0 %v5606_v26 }
 0x594   :  { %2960 = vmatpush3.msra.mxu0 %v1029_v40  ;;  %v1340_v40 = vld [vmem:[#allocation17 + $0x168] sm:$0xff] }
 0x595   :  { %2962 = vmatmul.mubr.msk.f32.vlgmr.msra.gmra.mrb[12].mxu0 %vm1039_vm11, %v1032_v46  ;;  %3147 = vmatprep.subr.bf16.mxu0 %v3146_v36  ;;  %v3164_v46 = vpack.c.bf16 %v1331_v31, %v1327_v14  ;;  %v1313_v14 = vld [vmem:[#allocation17 + $0x90] sm:$0xff]  ;;  %v1322_v31 = vld [vmem:[#allocation17 + $0xd8] sm:$0xff] }
 0x596   :  { %1423 = vmatprep.mubr.f32.mxu0 %v5606_v26  ;;  %3149 = vmatpush1.bf16.msra.mxu0 %v3148_v2 }
 0x597   :  { %3151 = vmatprep.subr.bf16.mxu0 %v3150_v42 }
 0x59a   :  { %3153 = vmatpush1.bf16.msra.mxu0 %v3152_v50 }
 0x59b   :  { %3155 = vmatprep.subr.bf16.mxu0 %v3154_v43 }
 0x59c   :  { %v1037_v20 = vpop.permute.xlu1 %1036 }
 0x59e   :  { %3157 = vmatpush1.bf16.msra.mxu0 %v3156_v37 }
 0x59f   :  { %3159 = vmatprep.subr.bf16.mxu0 %v3158_v59 }
 0x5a2   :  { %3161 = vmatpush1.bf16.msra.mxu0 %v3160_v21 }
 0x5a3   :  { %3163 = vmatprep.subr.bf16.mxu0 %v3162_v13  ;;  %v3186_v13 = vpack.c.bf16 %v1318_v63, %v1314_v62 }
 0x5a6   :  { %3165 = vmatpush1.bf16.msra.mxu0 %v3164_v46 }
 0x662   :  { %v2856_v54 = vpop.f32.mrb[12].mxu1 }
 0x663   :  { %v2857_v41 = vpop.f32.mrb[13].mxu1 }
 0x664   :  { %v2858_v23 = vadd.f32 %v2857_v41, %v2856_v54  ;;  %v3166_v54 = vpack.c.bf16 %v1340_v40, %v1336_v16  ;;  %v1335_v41 = vld [vmem:[#allocation17 + $0x140] sm:$0xff]  ;;  %v1326_v16 = vld [vmem:[#allocation17 + $0xf8] sm:$0xff] }
 0x665   :  { %v3190_v46 = vpack.c.bf16 %v1326_v16, %v1322_v31 }
 0x666   :  { %v1110_v24 = vadd.f32 %v2858_v23, %v1037_v20  ;;  %v1339_v23 = vld [vmem:[#allocation17 + $0x160] sm:$0xff]  ;;  %v1344_v20 = vld [vmem:[#allocation17 + $0x188] sm:$0xff]  ;;  %3167 = vmatprep.subr.bf16.mxu0 %v3166_v54  ;;  %v1321_v54 = vld [vmem:[#allocation17 + $0xd0] sm:$0xff] }
 0x668   :  { %v1179_v33 = vpop.f32.mrb[12].mxu0 }
 0x669   :  { %v1180_v61 = vadd.f32 %v1179_v33, %v1110_v24  ;;  %v2963_v8 = vpop.f32.mrb[13].mxu0  ;;  %v1348_v24 = vld [vmem:[#allocation17 + $0x1a8] sm:$0xff]  ;;  %v3168_v33 = vpack.c.bf16 %v1339_v23, %v1335_v41  ;;  %v1325_v41 = vld [vmem:[#allocation17 + $0xf0] sm:$0xff]  ;;  %v1330_v23 = vld [vmem:[#allocation17 + $0x118] sm:$0xff] }
 0x66a   :  { %v1343_v8 = vld [vmem:[#allocation17 + $0x180] sm:$0xff] }
 0x66b   :  { %vm1183_vm12 = vcmp.ge.f32.partialorder %v1180_v61, 0.0  ;;  %v1184_v38 = vmul.f32 0.01, %v1180_v61  ;;  %3169 = vmatpush1.bf16.msra.mxu0 %v3168_v33 }
 0x66d   :  { %v4432_v11 = vsel %vm1183_vm12, %v1180_v61, %v1184_v38  ;;  %v3170_v61 = vpack.c.bf16 %v1348_v24, %v1344_v20  ;;  %v1347_v38 = vld [vmem:[#allocation17 + $0x1a0] sm:$0xff]  ;;  %v1334_v20 = vld [vmem:[#allocation17 + $0x138] sm:$0xff]  ;;  %v3192_v24 = vpack.c.bf16 %v1325_v41, %v1321_v54 }
 0x66e   :  { %1189 = vrot.lane.b32.xlu1 %v4432_v11, %s3653_s26  ;;  %1186 = vrot.lane.b32.xlu0 %v4432_v11, %s3674_s3  ;;  %v1198_v50 = vmul.f32 %v4432_v11, %v4248_v6  ;;  %v1297_v6 = vld [vmem:[#allocation17 + $0x10] sm:$0xff]  ;;  %v3194_v33 = vpack.c.bf16 %v1334_v20, %v1330_v23 }
 0x66f   :  { %3171 = vmatprep.subr.bf16.mxu0 %v3170_v61  ;;  %v1329_v61 = vld [vmem:[#allocation17 + $0x110] sm:$0xff] }
 0x672   :  { %1195 = vrot.lane.b32.xlu1 %v4432_v11, %s3668_s2  ;;  %1192 = vrot.lane.b32.xlu0 %v4432_v11, %s3677_s22 }
 0x676   :  { %1202 = vrot.lane.b32.xlu1 %v4432_v11, %s3675_s1  ;;  %1199 = vrot.lane.b32.xlu0 %v4432_v11, %s3669_s0 }
 0x67a   :  { %1208 = vrot.lane.b32.xlu1 %v4432_v11, %s3678_s15  ;;  %1205 = vrot.lane.b32.xlu0 %v4432_v11, %s3676_s10  ;;  %v1301_v11 = vld [vmem:[#allocation17 + $0x30] sm:$0xff]  ;;  %s5671_s15 = sld [smem:[#allocation47_spill]] }
 0x67e   :  { %1215 = vperm.xlu0 %3388, %v1212_v9   ;;  %v3172_v9 = vpack.c.bf16 %v1347_v38, %v1343_v8  ;;  %v1333_v8 = vld [vmem:[#allocation17 + $0x130] sm:$0xff]  ;;  %v1338_v38 = vld [vmem:[#allocation17 + $0x158] sm:$0xff] }
 0x680   :  { %3173 = vmatpush1.bf16.msra.mxu0 %v3172_v9  ;;  %v1342_v9 = vld [vmem:[#allocation17 + $0x178] sm:$0xff] }
 0x6e0   :  { %v1190_v12 = vpop.permute.xlu1 %1189  ;;  %v1187_v15 = vpop.permute.xlu0 %1186 }
 0x6e1   :  { %v1191_v36 = vmul.f32 %v1190_v12, %v4346_v48  ;;  %v1188_v25 = vmul.f32 %v1187_v15, %v4328_v52  ;;  %v3196_v12 = vpack.c.bf16 %v1333_v8, %v1329_v61  ;;  %v3198_v15 = vpack.c.bf16 %v1342_v9, %v1338_v38  ;;  %v1932_v8 = vld [vmem:[%s5586_s16 + $0x8] sm:$0xff] }
 0x6e3   :  { %v3135_v27 = vpack.c.bf16 %v1191_v36, %v1188_v25  ;;  %v1337_v36 = vld [vmem:[#allocation17 + $0x150] sm:$0xff] }
 0x6e4   :  { %v1196_v2 = vpop.permute.xlu1 %1195  ;;  %v1193_v30 = vpop.permute.xlu0 %1192  ;;  %v1341_v25 = vld [vmem:[#allocation17 + $0x170] sm:$0xff] }
 0x6e5   :  { %v1197_v34 = vmul.f32 %v1196_v2, %v4332_v53  ;;  %v1194_v42 = vmul.f32 %v1193_v30, %v4387_v7  ;;  %3136 = vmatpush3.bf16.msra.mxu1 %v3135_v27  ;;  %v1346_v27 = vld [vmem:[#allocation17 + $0x198] sm:$0xff]  ;;  %v3200_v30 = vpack.c.bf16 %v1341_v25, %v1337_v36 }
 0x6e6   :  { %3137 = vmatprep.subr.bf16.mxu1 %v3664_v0  ;;  %v1350_v2 = vld [vmem:[#allocation17 + $0x1b8] sm:$0xff] }
 0x6e7   :  { %v3138_v35 = vpack.c.bf16 %v1197_v34, %v1194_v42  ;;  %v3202_v34 = vpack.c.bf16 %v1350_v2, %v1346_v27  ;;  %v1345_v42 = vld [vmem:[#allocation17 + $0x190] sm:$0xff] }
 0x6e8   :  { %v1200_v28 = vpop.permute.xlu0 %1199  ;;  %v1203_v48 = vpop.permute.xlu1 %1202 }
 0x6e9   :  { %v1201_v51 = vmul.f32 %v1200_v28, %v4364_v56  ;;  %3139 = vmatpush3.bf16.msra.mxu1 %v3138_v35  ;;  %v1204_v53 = vmul.f32 %v1203_v48, %v4352_v19  ;;  %v1306_v56 = vld [vmem:[#allocation17 + $0x58] sm:$0xff]  ;;  %v1349_v35 = vld [vmem:[#allocation17 + $0x1b0] sm:$0xff] }
 0x6ea   :  { %3140 = vmatprep.subr.bf16.mxu1 %v3664_v0  ;;  %v1211_v19 = vld [vmem:[#allocation16] sm:$0xff]  ;;  %v3182_v3 = vpack.c.bf16 %v1310_v39, %v1306_v56  ;;  %v3204_v28 = vpack.c.bf16 %v1349_v35, %v1345_v42  ;;  %v4473_v56 = vld [vmem:[#allocation2 + $0x8] sm:$0xff]  ;;  %v4477_v39 = vld [vmem:[#allocation2 + $0x10] sm:$0xff] }
 0x6eb   :  { %v3141_v52 = vpack.c.bf16 %v1201_v51, %v1198_v50  ;;  %v1352_v50 = vld [vmem:[#allocation17 + $0x1c8] sm:$0xff]  ;;  %v1354_v48 = vld [vmem:[#allocation17 + $0x1d8] sm:$0xff] }
 0x6ec   :  { %v1206_v10 = vpop.permute.xlu0 %1205  ;;  %v1209_v37 = vpop.permute.xlu1 %1208  ;;  %v1356_v51 = vld [vmem:[#allocation17 + $0x1e8] sm:$0xff] }
 0x6ed   :  { %v1207_v7 = vmul.f32 %v1206_v10, %v4358_v45  ;;  %3142 = vmatpush3.bf16.msra.mxu1 %v3141_v52  ;;  %v1210_v59 = vmul.f32 %v4409_v47, %v1209_v37  ;;  %v3180_v45 = vpack.c.bf16 %v1301_v11, %v1297_v6  ;;  %v1317_v47 = vld [vmem:[#allocation17 + $0xb0] sm:$0xff]  ;;  %v3174_v52 = vpack.c.bf16 %v1356_v51, %v1352_v50  ;;  %v1358_v10 = vld [vmem:[#allocation17 + $0x1f8] sm:$0xff]  ;;  %v4469_v11 = vld [vmem:[#allocation2] sm:$0xff] }
 0x6ee   :  { %3143 = vmatprep.subr.bf16.mxu1 %v3664_v0  ;;  %v1309_v0 = vld [vmem:[#allocation17 + $0x70] sm:$0xff]  ;;  %v3188_v40 = vpack.c.bf16 %v1317_v47, %v1313_v14  ;;  %1515 = vrot.lane.b32.xlu0 %v4469_v11, %s3681_s14 }
 0x6ef   :  { %v3144_v43 = vpack.c.bf16 %v1207_v7, %v1204_v53  ;;  %v3184_v21 = vpack.c.bf16 %v1309_v0, %v1305_v60  ;;  %v1351_v53 = vld [vmem:[#allocation17 + $0x1c0] sm:$0xff]  ;;  %v1357_v37 = vld [vmem:[#allocation17 + $0x1f0] sm:$0xff]  ;;  %3175 = vmatprep.subr.bf16.mxu0 %v3174_v52  ;;  %v4481_v0 = vld [vmem:[#allocation2 + $0x18] sm:$0xff] }
 0x6f0   :  { %v1355_v7 = vld [vmem:[#allocation17 + $0x1e0] sm:$0xff]  ;;  %v3208_v6 = vpack.c.bf16 %v1357_v37, %v1353_v58  ;;  %v4690_v37 = vand.u32 127, %v5605_v1  ;;  %v4715_v1 = vld [vmem:[#allocation8 + $0x18] sm:$0xff] }
 0x6f1   :  { %3145 = vmatpush3.bf16.msra.mxu1 %v3144_v43  ;;  %v3206_v43 = vpack.c.bf16 %v1358_v10, %v1354_v48  ;;  %v3176_v32 = vpack.c.bf16 %v1355_v7, %v1351_v53 }
 0x6f2   :  { %2980 = vmatprep.subr.mxu1 %v5606_v26  ;;  %1519 = vrot.lane.b32.xlu0 %v4473_v56, %s3681_s14  ;;  %vm1531_vm15 = vcmp.lt.s32.totalorder %v4690_v37, 17  ;;  %vm1629_vm1 = vcmp.lt.s32.totalorder %v4690_v37, 15  ;;  %vm1678_vm2 = vcmp.lt.s32.totalorder %v4690_v37, 1  ;;  %vm1751_vm3 = vcmp.lt.s32.totalorder %v4690_v37, 127 }
 0x6f3   :  { %3177 = vmatpush1.bf16.msra.mxu0 %v3176_v32  ;;  %vm1800_vm4 = vcmp.lt.s32.totalorder %v4690_v37, 113  ;;  %vm1849_vm5 = vcmp.lt.s32.totalorder %v4690_v37, 112  ;;  %vm1898_vm6 = vcmp.lt.s32.totalorder %v4690_v37, 111 }
 0x6f5   :  { %2981 = vmatpush3.msra.mxu1 %v1210_v59 }
 0x6f6   :  { %2983 = vmatmul.mubr.msk.f32.vlgmr.msra.gmra.mrb[14].mxu1 %vm1218_vm13, %v1211_v19  ;;  %3179 = vmatprep.subr.bf16.mxu1 %v3178_v57 }
 0x6f7   :  { %3181 = vmatpush1.bf16.msra.mxu1 %v3180_v45  ;;  %1494 = vmatprep.mubr.f32.mxu1 %v5606_v26 }
 0x6f8   :  { %3183 = vmatprep.subr.bf16.mxu1 %v3182_v3  ;;  %1523 = vrot.lane.b32.xlu0 %v4477_v39, %s3681_s14 }
 0x6fb   :  { %3185 = vmatpush1.bf16.msra.mxu1 %v3184_v21 }
 0x6fc   :  { %3187 = vmatprep.subr.bf16.mxu1 %v3186_v13  ;;  %1527 = vrot.lane.b32.xlu0 %v4481_v0, %s3681_s14 }
 0x6fd   :  { %v1216_v57 = vpop.permute.xlu0 %1215 }
 0x6ff   :  { %3189 = vmatpush1.bf16.msra.mxu1 %v3188_v40 }
 0x700   :  { %3191 = vmatprep.subr.bf16.mxu1 %v3190_v46  ;;  %1566 = vrot.lane.b32.xlu0 %v4469_v11, %s3661_s25 }
 0x703   :  { %3193 = vmatpush1.bf16.msra.mxu1 %v3192_v24 }
 0x704   :  { %3195 = vmatprep.subr.bf16.mxu1 %v3194_v33  ;;  %1570 = vrot.lane.b32.xlu0 %v4473_v56, %s3661_s25 }
 0x707   :  { %3197 = vmatpush1.bf16.msra.mxu1 %v3196_v12 }
 0x708   :  { %3199 = vmatprep.subr.bf16.mxu1 %v3198_v15  ;;  %1574 = vrot.lane.b32.xlu0 %v4477_v39, %s3661_s25  ;;  %v1933_v15 = vld [vmem:[%s5587_s17] sm:$0xff] }
 0x70b   :  { %3201 = vmatpush1.bf16.msra.mxu1 %v3200_v30 }
 0x70c   :  { %3203 = vmatprep.subr.bf16.mxu1 %v3202_v34  ;;  %1578 = vrot.lane.b32.xlu0 %v4481_v0, %s3661_s25 }
 0x70f   :  { %3205 = vmatpush1.bf16.msra.mxu1 %v3204_v28 }
 0x710   :  { %3207 = vmatprep.subr.bf16.mxu1 %v3206_v43  ;;  %1615 = vrot.lane.b32.xlu0 %v4469_v11, %s3682_s30 }
 0x713   :  { %3209 = vmatpush1.bf16.msra.mxu1 %v3208_v6 }
 0x714   :  { %1619 = vrot.lane.b32.xlu0 %v4473_v56, %s3682_s30 }
 0x718   :  { %1623 = vrot.lane.b32.xlu0 %v4477_v39, %s3682_s30 }
 0x71c   :  { %1627 = vrot.lane.b32.xlu0 %v4481_v0, %s3682_s30 }
 0x720   :  { %1664 = vrot.lane.b32.xlu0 %v4469_v11, %s3668_s2 }
 0x724   :  { %1668 = vrot.lane.b32.xlu0 %v4473_v56, %s3668_s2 }
 0x728   :  { %1672 = vrot.lane.b32.xlu0 %v4477_v39, %s3668_s2 }
 0x72c   :  { %1676 = vrot.lane.b32.xlu0 %v4481_v0, %s3668_s2 }
 0x730   :  { %1737 = vrot.lane.b32.xlu0 %v4469_v11, %s3669_s0 }
 0x734   :  { %1741 = vrot.lane.b32.xlu0 %v4473_v56, %s3669_s0 }
 0x738   :  { %1745 = vrot.lane.b32.xlu0 %v4477_v39, %s3669_s0 }
 0x73c   :  { %1749 = vrot.lane.b32.xlu0 %v4481_v0, %s3669_s0 }
 0x740   :  { %1786 = vrot.lane.b32.xlu0 %v4469_v11, %s3683_s5 }
 0x744   :  { %1790 = vrot.lane.b32.xlu0 %v4473_v56, %s3683_s5 }
 0x748   :  { %1794 = vrot.lane.b32.xlu0 %v4477_v39, %s3683_s5 }
 0x74c   :  { %1798 = vrot.lane.b32.xlu0 %v4481_v0, %s3683_s5 }
 0x750   :  { %1835 = vrot.lane.b32.xlu0 %v4469_v11, %s3684_s24 }
 0x754   :  { %1839 = vrot.lane.b32.xlu0 %v4473_v56, %s3684_s24 }
 0x758   :  { %1843 = vrot.lane.b32.xlu0 %v4477_v39, %s3684_s24 }
 0x75c   :  { %1847 = vrot.lane.b32.xlu0 %v4481_v0, %s3684_s24 }
 0x760   :  { %1884 = vrot.lane.b32.xlu0 %v4469_v11, %s3685_s9  ;;  %v4575_v14 = vpop.permute.xlu0 %1515 }
 0x764   :  { %1888 = vrot.lane.b32.xlu0 %v4473_v56, %s3685_s9  ;;  %v4579_v47 = vpop.permute.xlu0 %1519 }
 0x768   :  { %1892 = vrot.lane.b32.xlu0 %v4477_v39, %s3685_s9 }
 0x76a   :  { %v4585_v31 = vpop.permute.xlu0 %1523 }
 0x76c   :  { %1896 = vrot.lane.b32.xlu0 %v4481_v0, %s3685_s9 }
 0x76e   :  { %v4589_v16 = vpop.permute.xlu0 %1527 }
 0x76f   :  { %v1539_v26 = vsel %vm1531_vm15, %v4589_v16, %v4575_v14 }
 0x772   :  { %v4595_v40 = vpop.permute.xlu0 %1566 }
 0x776   :  { %v4599_v46 = vpop.permute.xlu0 %1570 }
 0x77a   :  { %v4605_v54 = vpop.permute.xlu0 %1574 }
 0x77e   :  { %v4609_v41 = vpop.permute.xlu0 %1578 }
 0x782   :  { %v4615_v23 = vpop.permute.xlu0 %1615 }
 0x786   :  { %v4619_v20 = vpop.permute.xlu0 %1619 }
 0x78a   :  { %v4625_v24 = vpop.permute.xlu0 %1623 }
 0x78e   :  { %v4631_v61 = vpop.permute.xlu0 %1627 }
 0x792   :  { %v4642_v9 = vpop.permute.xlu0 %1664 }
 0x796   :  { %v4653_v25 = vpop.permute.xlu0 %1668 }
 0x79a   :  { %v4657_v2 = vpop.permute.xlu0 %1672 }
 0x79e   :  { %v4663_v42 = vpop.permute.xlu0 %1676 }
 0x7a2   :  { %v4667_v28 = vpop.permute.xlu0 %1737 }
 0x7a6   :  { %v4673_v48 = vpop.permute.xlu0 %1741 }
 0x7aa   :  { %v4677_v10 = vpop.permute.xlu0 %1745 }
 0x7ae   :  { %v4683_v43 = vpop.permute.xlu0 %1749 }
 0x7b2   :  { %v4687_v58 = vpop.permute.xlu0 %1786 }
 0x7b3   :  { %5650 = vst [vmem:[#allocation33_spill] sm:$0xff] %v4687_v58 }
 0x7c9   :  { %v1288_v59 = vpop.f32.mrb[14].mxu1 }
 0x7ca   :  { %v1289_v19 = vadd.f32 %v1288_v59, %v1216_v57  ;;  %v2984_v45 = vpop.f32.mrb[15].mxu1  ;;  %v4697_v59 = vpop.permute.xlu0 %1790 }
 0x7cb   :  { %5653 = vst [vmem:[#allocation36_spill] sm:$0xff] %v4697_v59 }
 0x7cc   :  { %vm1292_vm14 = vcmp.ge.f32.partialorder %v1289_v19, 0.0  ;;  %v1293_v3 = vmul.f32 0.01, %v1289_v19 }
 0x7ce   :  { %v1294_v60 = vsel %vm1292_vm14, %v1289_v19, %v1293_v3  ;;  %v4699_v19 = vld [vmem:[#allocation8 + $0x8] sm:$0xff]  ;;  %v1537_v3 = vsel %vm1531_vm15, %v4575_v14, %v4579_v47 }
 0x7cf   :  { %1424 = vmatmul.mubr.f32.vlgmr.msra.gmra.mrb[14].mxu0 %v1294_v60  ;;  %1495 = vmatmul.mubr.f32.vlgmr.msra.gmra.mrb[16].mxu1 %v1294_v60  ;;  %v4703_v45 = vrot.slane %v4699_v19, %v4025_v17  ;;  %v4709_v60 = vld [vmem:[#allocation8] sm:$0xff] }
 0x7d0   :  { %2746 = vmatprep.mubr.msk.f32.mxu0 %vm324_vm0, %v1932_v8  ;;  %2747 = vmatprep.mubr.msk.f32.mxu1 %vm324_vm0, %v1932_v8  ;;  %v4713_v8 = vrot.slane %v4709_v60, %v4025_v17  ;;  %vm1580_vm0 = vcmp.lt.s32.totalorder %v4690_v37, 16  ;;  %v3686_v37 = vmov 1966171168  }
 0x7d1   :  { %5654 = vst [vmem:[#allocation37_spill] sm:$0xff] %v4703_v45 }
 0x8a2   :  { %v4541_v62 = vpop.f32.mrb[14].mxu0  ;;  %v4543_v63 = vpop.f32.mrb[16].mxu1 }
 0x8a3   :  { %1513 = vrot.lane.b32.xlu1 %v4541_v62, %s3681_s14  ;;  %v4547_v21 = vpop.f32.mrb[15].mxu0  ;;  %v4549_v13 = vpop.f32.mrb[17].mxu1 }
 0x8a7   :  { %1521 = vrot.lane.b32.xlu1 %v4543_v63, %s3681_s14 }
 0x8ab   :  { %1564 = vrot.lane.b32.xlu1 %v4541_v62, %s3661_s25 }
 0x8af   :  { %1572 = vrot.lane.b32.xlu1 %v4543_v63, %s3661_s25 }
 0x8b3   :  { %1613 = vrot.lane.b32.xlu1 %v4541_v62, %s3682_s30 }
 0x8b7   :  { %1621 = vrot.lane.b32.xlu1 %v4543_v63, %s3682_s30 }
 0x8bb   :  { %1662 = vrot.lane.b32.xlu1 %v4541_v62, %s3668_s2 }
 0x8bf   :  { %1670 = vrot.lane.b32.xlu1 %v4543_v63, %s3668_s2 }
 0x8c3   :  { %1735 = vrot.lane.b32.xlu1 %v4541_v62, %s3669_s0 }
 0x8c7   :  { %1743 = vrot.lane.b32.xlu1 %v4543_v63, %s3669_s0 }
 0x8cb   :  { %1784 = vrot.lane.b32.xlu1 %v4541_v62, %s3683_s5 }
 0x8cf   :  { %1792 = vrot.lane.b32.xlu1 %v4543_v63, %s3683_s5 }
 0x8d3   :  { %1833 = vrot.lane.b32.xlu1 %v4541_v62, %s3684_s24 }
 0x8d7   :  { %1841 = vrot.lane.b32.xlu1 %v4543_v63, %s3684_s24 }
 0x8db   :  { %1882 = vrot.lane.b32.xlu1 %v4541_v62, %s3685_s9 }
 0x8df   :  { %1890 = vrot.lane.b32.xlu1 %v4543_v63, %s3685_s9 }
 0x8e3   :  { %1517 = vrot.lane.b32.xlu1 %v4547_v21, %s3681_s14 }
 0x8e7   :  { %1525 = vrot.lane.b32.xlu1 %v4549_v13, %s3681_s14 }
 0x8eb   :  { %1568 = vrot.lane.b32.xlu1 %v4547_v21, %s3661_s25 }
 0x8ef   :  { %1576 = vrot.lane.b32.xlu1 %v4549_v13, %s3661_s25 }
 0x8f3   :  { %1617 = vrot.lane.b32.xlu1 %v4547_v21, %s3682_s30 }
 0x8f7   :  { %1625 = vrot.lane.b32.xlu1 %v4549_v13, %s3682_s30 }
 0x8fb   :  { %1666 = vrot.lane.b32.xlu1 %v4547_v21, %s3668_s2 }
 0x8ff   :  { %1674 = vrot.lane.b32.xlu1 %v4549_v13, %s3668_s2 }
 0x903   :  { %1739 = vrot.lane.b32.xlu1 %v4547_v21, %s3669_s0 }
 0x907   :  { %1747 = vrot.lane.b32.xlu1 %v4549_v13, %s3669_s0 }
 0x90b   :  { %1788 = vrot.lane.b32.xlu1 %v4547_v21, %s3683_s5 }
 0x90f   :  { %1796 = vrot.lane.b32.xlu1 %v4549_v13, %s3683_s5 }
 0x913   :  { %1837 = vrot.lane.b32.xlu1 %v4547_v21, %s3684_s24 }
 0x915   :  { %v4629_v33 = vpop.permute.xlu1 %1513 }
 0x917   :  { %1845 = vrot.lane.b32.xlu1 %v4549_v13, %s3684_s24 }
 0x919   :  { %v1522_v38 = vpop.permute.xlu1 %1521 }
 0x91b   :  { %1886 = vrot.lane.b32.xlu1 %v4547_v21, %s3685_s9 }
 0x91d   :  { %v4644_v12 = vpop.permute.xlu1 %1564 }
 0x91f   :  { %1894 = vrot.lane.b32.xlu1 %v4549_v13, %s3685_s9 }
 0x921   :  { %v4651_v36 = vpop.permute.xlu1 %1572 }
 0x923   :  { %1936 = vperm.xlu1 %3389, %v1933_v15  }
 0x925   :  { %v4655_v27 = vpop.permute.xlu1 %1613 }
 0x929   :  { %v4659_v30 = vpop.permute.xlu1 %1621 }
 0x92d   :  { %v4661_v34 = vpop.permute.xlu1 %1662 }
 0x931   :  { %v4665_v35 = vpop.permute.xlu1 %1670 }
 0x935   :  { %v4669_v50 = vpop.permute.xlu1 %1735 }
 0x939   :  { %v4671_v51 = vpop.permute.xlu1 %1743 }
 0x93d   :  { %v4675_v52 = vpop.permute.xlu1 %1784 }
 0x93e   :  { %5646 = vst [vmem:[#allocation29_spill] sm:$0xff] %v4675_v52  ;;  %v4734_v52 = vpop.permute.xlu0 %1794 }
 0x93f   :  { %5655 = vst [vmem:[#allocation38_spill] sm:$0xff] %v4734_v52 }
 0x941   :  { %v4679_v53 = vpop.permute.xlu1 %1792 }
 0x942   :  { %5647 = vst [vmem:[#allocation30_spill] sm:$0xff] %v4679_v53 }
 0x945   :  { %v4681_v7 = vpop.permute.xlu1 %1833 }
 0x946   :  { %5648 = vst [vmem:[#allocation31_spill] sm:$0xff] %v4681_v7  ;;  %v4729_v7 = vrot.slane %v4715_v1, %v4025_v17 }
 0x949   :  { %v4685_v32 = vpop.permute.xlu1 %1841 }
 0x94a   :  { %5649 = vst [vmem:[#allocation32_spill] sm:$0xff] %v4685_v32 }
 0x94d   :  { %v4692_v6 = vpop.permute.xlu1 %1882 }
 0x94e   :  { %5651 = vst [vmem:[#allocation34_spill] sm:$0xff] %v4692_v6  ;;  %v1561_v6 = vmul.f32 %v4703_v45, %v1537_v3  ;;  %v1533_v3 = vsel %vm1531_vm15, %v4585_v31, %v4589_v16 }
 0x94f   :  { %v1563_v59 = vmul.f32 %v4729_v7, %v1533_v3 }
 0x951   :  { %v4695_v57 = vpop.permute.xlu1 %1890 }
 0x952   :  { %5652 = vst [vmem:[#allocation35_spill] sm:$0xff] %v4695_v57  ;;  %v4725_v57 = vld [vmem:[#allocation8 + $0x10] sm:$0xff] }
 0x953   :  { %v4738_v14 = vrot.slane %v4725_v57, %v4025_v17  ;;  %v4752_v17 = vrot.slane %v4699_v19, %v4028_v18 }
 0x955   :  { %v1518_v15 = vpop.permute.xlu1 %1517  ;;  %5656 = vst [vmem:[#allocation39_spill] sm:$0xff] %v4738_v14 }
 0x956   :  { %v1536_v4 = vsel %vm1531_vm15, %v4629_v33, %v1518_v15  ;;  %v1534_v32 = vsel %vm1531_vm15, %v1518_v15, %v1522_v38  ;;  %v1535_v15 = vsel %vm1531_vm15, %v4579_v47, %v4585_v31 }
 0x957   :  { %v1557_v55 = vmul.f32 %v4703_v45, %v1536_v4  ;;  %v1560_v4 = vmul.f32 %v4713_v8, %v1539_v26  ;;  %v1558_v52 = vmul.f32 %v4738_v14, %v1534_v32  ;;  %v1562_v31 = vmul.f32 %v4738_v14, %v1535_v15 }
 0x958   :  { %v4784_v15 = vrot.slane %v4715_v1, %v4028_v18 }
 0x959   :  { %v1526_v45 = vpop.permute.xlu1 %1525  ;;  %v3210_v53 = vpack.c.bf16 %v1561_v6, %v1557_v55  ;;  %v1586_v55 = vsel %vm1580_vm0, %v4595_v40, %v4599_v46 }
 0x95a   :  { %v1532_v16 = vsel %vm1531_vm15, %v1522_v38, %v1526_v45  ;;  %v1538_v58 = vsel %vm1531_vm15, %v1526_v45, %v4629_v33  ;;  %v4770_v38 = vrot.slane %v4709_v60, %v4028_v18  ;;  %v4772_v45 = vpop.permute.xlu0 %1798  ;;  %v1610_v3 = vmul.f32 %v4752_v17, %v1586_v55 }
 0x95b   :  { %v1556_v26 = vmul.f32 %v4713_v8, %v1538_v58  ;;  %v1559_v47 = vmul.f32 %v4729_v7, %v1532_v16  ;;  %3211 = vmatprep.subr.bf16.mxu0 %v3210_v53  ;;  %v1588_v58 = vsel %vm1580_vm0, %v4609_v41, %v4595_v40  ;;  %v3248_v16 = vpack.c.bf16 %v1562_v31, %v1558_v52 }
 0x95c   :  { %v4792_v40 = vrot.slane %v4725_v57, %v4028_v18  ;;  %v1582_v52 = vsel %vm1580_vm0, %v4605_v54, %v4609_v41  ;;  %v4801_v55 = vrot.slane %v4709_v60, %v3981_v5  ;;  %v1609_v18 = vmul.f32 %v4770_v38, %v1588_v58 }
 0x95d   :  { %v3212_v32 = vpack.c.bf16 %v1560_v4, %v1556_v26  ;;  %v1569_v33 = vpop.permute.xlu1 %1568  ;;  %v3246_v6 = vpack.c.bf16 %v1563_v59, %v1559_v47  ;;  %v1584_v26 = vsel %vm1580_vm0, %v4599_v46, %v4605_v54  ;;  %v4814_v41 = vrot.slane %v4699_v19, %v4035_v22 }
 0x95e   :  { %v1585_v53 = vsel %vm1580_vm0, %v4644_v12, %v1569_v33  ;;  %v1583_v59 = vsel %vm1580_vm0, %v1569_v33, %v4651_v36  ;;  %v1612_v54 = vmul.f32 %v4784_v15, %v1582_v52  ;;  %v4847_v52 = vrot.slane %v4709_v60, %v4035_v22 }
 0x95f   :  { %v1606_v4 = vmul.f32 %v4752_v17, %v1585_v53  ;;  %3213 = vmatpush1.bf16.msra.mxu0 %v3212_v32  ;;  %3247 = vmatprep.subr.bf16.mxu1 %v3246_v6  ;;  %v4810_v32 = vrot.slane %v4725_v57, %v3981_v5  ;;  %v1607_v33 = vmul.f32 %v4792_v40, %v1583_v59  ;;  %v4830_v53 = vpop.permute.xlu0 %1835 }
 0x960   :  { %3249 = vmatpush1.bf16.msra.mxu1 %v3248_v16  ;;  %v4835_v59 = vrot.slane %v4699_v19, %v3981_v5 }
 0x961   :  { %v1577_v47 = vpop.permute.xlu1 %1576  ;;  %v3214_v31 = vpack.c.bf16 %v1610_v3, %v1606_v4  ;;  %v1635_v3 = vsel %vm1629_vm1, %v4615_v23, %v4619_v20  ;;  %v4843_v4 = vmul.f32 %v4801_v55, %v4469_v11 }
 0x962   :  { %v1581_v6 = vsel %vm1580_vm0, %v4651_v36, %v1577_v47  ;;  %v1587_v46 = vsel %vm1580_vm0, %v1577_v47, %v4644_v12  ;;  %v1611_v36 = vmul.f32 %v4792_v40, %v1584_v26  ;;  %v4839_v12 = vrot.slane %v4715_v1, %v3981_v5 }
 0x963   :  { %v1605_v58 = vmul.f32 %v4770_v38, %v1587_v46  ;;  %v1608_v16 = vmul.f32 %v4784_v15, %v1581_v6  ;;  %3215 = vmatprep.subr.bf16.mxu0 %v3214_v31  ;;  %v4851_v26 = vmul.f32 %v4810_v32, %v4477_v39  ;;  %v1659_v46 = vmul.f32 %v4814_v41, %v1635_v3 }
 0x964   :  { %v1637_v5 = vsel %vm1629_vm1, %v4631_v61, %v4615_v23  ;;  %v3252_v11 = vpack.c.bf16 %v1611_v36, %v1607_v33  ;;  %v4871_v23 = vrot.slane %v4725_v57, %v4035_v22  ;;  %v1631_v33 = vsel %vm1629_vm1, %v4625_v24, %v4631_v61  ;;  %v4887_v36 = vpop.permute.xlu0 %1839 }
 0x965   :  { %v3216_v47 = vpack.c.bf16 %v1609_v18, %v1605_v58  ;;  %v1618_v31 = vpop.permute.xlu1 %1617  ;;  %v3250_v6 = vpack.c.bf16 %v1612_v54, %v1608_v16  ;;  %v4863_v18 = vrot.slane %v4715_v1, %v4035_v22  ;;  %v4880_v3 = vmul.f32 %v4835_v59, %v4473_v56 }
 0x966   :  { %v1634_v14 = vsel %vm1629_vm1, %v4655_v27, %v1618_v31  ;;  %v1632_v39 = vsel %vm1629_vm1, %v1618_v31, %v4659_v30  ;;  %v1658_v22 = vmul.f32 %v4847_v52, %v1637_v5  ;;  %v4891_v61 = vmul.f32 %v4801_v55, %v4541_v62 }
 0x967   :  { %v1655_v54 = vmul.f32 %v4814_v41, %v1634_v14  ;;  %3217 = vmatpush1.bf16.msra.mxu0 %v3216_v47  ;;  %3251 = vmatprep.subr.bf16.mxu1 %v3250_v6  ;;  %v1633_v14 = vsel %vm1629_vm1, %v4619_v20, %v4625_v24  ;;  %v4895_v47 = vrot.slane %v4699_v19, %v4048_v29 }
 0x968   :  { %3253 = vmatpush1.bf16.msra.mxu1 %v3252_v11  ;;  %v1656_v56 = vmul.f32 %v4871_v23, %v1632_v39  ;;  %v1661_v31 = vmul.f32 %v4863_v18, %v1631_v33  ;;  %v1684_v62 = vsel %vm1678_vm2, %v4642_v9, %v4653_v25  ;;  %v1660_v5 = vmul.f32 %v4871_v23, %v1633_v14 }
 0x969   :  { %v1626_v58 = vpop.permute.xlu1 %1625  ;;  %v3218_v16 = vpack.c.bf16 %v1659_v46, %v1655_v54  ;;  %v4920_v11 = vmul.f32 %v4810_v32, %v4543_v63  ;;  %v3228_v14 = vpack.c.bf16 %v4843_v4, %v4891_v61  ;;  %v5660_v61 = vld [vmem:[#allocation30_spill] sm:$0xff] }
 0x96a   :  { %v1630_v20 = vsel %vm1629_vm1, %v4659_v30, %v1626_v58  ;;  %v1636_v24 = vsel %vm1629_vm1, %v1626_v58, %v4655_v27  ;;  %v1728_v30 = vmul.f32 %v4835_v59, %v4547_v21  ;;  %v4916_v27 = vmul.f32 %v4839_v12, %v4481_v0 }
 0x96b   :  { %v1654_v6 = vmul.f32 %v4847_v52, %v1636_v24  ;;  %v1657_v46 = vmul.f32 %v4863_v18, %v1630_v20  ;;  %3219 = vmatprep.subr.bf16.mxu0 %v3218_v16  ;;  %v1730_v58 = vmul.f32 %v4839_v12, %v4549_v13  ;;  %v1708_v16 = vmul.f32 %v4895_v47, %v1684_v62  ;;  %v4942_v24 = vpop.permute.xlu0 %1843 }
 0x96c   :  { %v4929_v21 = vrot.slane %v4709_v60, %v4048_v29  ;;  %v3256_v0 = vpack.c.bf16 %v1660_v5, %v1656_v56  ;;  %v4946_v56 = vrot.slane %v4725_v57, %v4048_v29  ;;  %v1686_v62 = vsel %vm1678_vm2, %v4663_v42, %v4642_v9 }
 0x96d   :  { %v3220_v39 = vpack.c.bf16 %v1658_v22, %v1654_v6  ;;  %v1667_v54 = vpop.permute.xlu1 %1666  ;;  %v3254_v33 = vpack.c.bf16 %v1661_v31, %v1657_v46  ;;  %v4936_v22 = vrot.slane %v4715_v1, %v4048_v29  ;;  %v1680_v31 = vsel %vm1678_vm2, %v4657_v2, %v4663_v42 }
 0x96e   :  { %v1683_v63 = vsel %vm1678_vm2, %v4661_v34, %v1667_v54  ;;  %v1681_v13 = vsel %vm1678_vm2, %v1667_v54, %v4665_v35  ;;  %v3226_v6 = vpack.c.bf16 %v4880_v3, %v1728_v30  ;;  %v1682_v46 = vsel %vm1678_vm2, %v4653_v25, %v4657_v2 }
 0x96f   :  { %v1704_v20 = vmul.f32 %v4895_v47, %v1683_v63  ;;  %3221 = vmatpush1.bf16.msra.mxu0 %v3220_v39  ;;  %3255 = vmatprep.subr.bf16.mxu1 %v3254_v33  ;;  %v4964_v29 = vrot.slane %v4699_v19, %v4062_v44  ;;  %v1755_v9 = vsel %vm1751_vm3, %v4673_v48, %v4677_v10 }
 0x970   :  { %3257 = vmatpush1.bf16.msra.mxu1 %v3256_v0  ;;  %v1705_v42 = vmul.f32 %v4946_v56, %v1681_v13  ;;  %v1707_v2 = vmul.f32 %v4929_v21, %v1686_v62  ;;  %v1710_v30 = vmul.f32 %v4936_v22, %v1680_v31  ;;  %v4984_v0 = vrot.slane %v4709_v60, %v4062_v44  ;;  %v4994_v62 = vpop.permute.xlu0 %1847 }
 0x971   :  { %v1675_v5 = vpop.permute.xlu1 %1674  ;;  %v3222_v39 = vpack.c.bf16 %v1708_v16, %v1704_v20  ;;  %v1709_v16 = vmul.f32 %v4946_v56, %v1682_v46  ;;  %v1757_v63 = vsel %vm1751_vm3, %v4667_v28, %v4673_v48  ;;  %v1781_v13 = vmul.f32 %v4964_v29, %v1755_v9 }
 0x972   :  { %v1679_v3 = vsel %vm1678_vm2, %v4665_v35, %v1675_v5  ;;  %v1685_v25 = vsel %vm1678_vm2, %v1675_v5, %v4661_v34  ;;  %v3262_v35 = vpack.c.bf16 %v4916_v27, %v1730_v58  ;;  %v3264_v34 = vpack.c.bf16 %v4851_v26, %v4920_v11 }
 0x973   :  { %v1703_v54 = vmul.f32 %v4929_v21, %v1685_v25  ;;  %v1706_v33 = vmul.f32 %v4936_v22, %v1679_v3  ;;  %3223 = vmatprep.subr.bf16.mxu0 %v3222_v39  ;;  %v3260_v5 = vpack.c.bf16 %v1709_v16, %v1705_v42  ;;  %v5005_v48 = vrot.slane %v4725_v57, %v4062_v44  ;;  %v5658_v3 = vld [vmem:[#allocation33_spill] sm:$0xff] }
 0x974   :  { %v5009_v11 = vrot.slane %v4715_v1, %v4062_v44  ;;  %v1753_v39 = vsel %vm1751_vm3, %v4677_v10, %v4683_v43  ;;  %v1759_v9 = vsel %vm1751_vm3, %v4683_v43, %v4667_v28  ;;  %v5022_v42 = vrot.slane %v4709_v60, %v4070_v49  ;;  %v5657_v44 = vld [vmem:[#allocation36_spill] sm:$0xff] }
 0x975   :  { %v3224_v20 = vpack.c.bf16 %v1707_v2, %v1703_v54  ;;  %v1740_v31 = vpop.permute.xlu1 %1739  ;;  %v3258_v46 = vpack.c.bf16 %v1710_v30, %v1706_v33  ;;  %v1806_v25 = vsel %vm1800_vm4, %v5658_v3, %v5657_v44  ;;  %v5030_v2 = vrot.slane %v4699_v19, %v4070_v49  ;;  %v5659_v54 = vld [vmem:[#allocation38_spill] sm:$0xff] }
 0x976   :  { %v1754_v27 = vsel %vm1751_vm3, %v1740_v31, %v4671_v51  ;;  %v1756_v26 = vsel %vm1751_vm3, %v4669_v50, %v1740_v31  ;;  %v1780_v43 = vmul.f32 %v4984_v0, %v1757_v63  ;;  %v5048_v31 = vpop.permute.xlu0 %1884  ;;  %v1808_v4 = vsel %vm1800_vm4, %v4772_v45, %v5658_v3 }
 0x977   :  { %v1777_v58 = vmul.f32 %v4964_v29, %v1754_v27  ;;  %3225 = vmatpush1.bf16.msra.mxu0 %v3224_v20  ;;  %3259 = vmatprep.subr.bf16.mxu1 %v3258_v46  ;;  %v1776_v10 = vmul.f32 %v4984_v0, %v1756_v26  ;;  %v1782_v20 = vmul.f32 %v5005_v48, %v1753_v39 }
 0x978   :  { %3227 = vmatprep.subr.bf16.mxu0 %v3226_v6  ;;  %3261 = vmatpush1.bf16.msra.mxu1 %v3260_v5  ;;  %v1804_v6 = vsel %vm1800_vm4, %v5657_v44, %v5659_v54  ;;  %v5056_v46 = vrot.slane %v4715_v1, %v4070_v49  ;;  %v5061_v39 = vrot.slane %v4725_v57, %v4070_v49 }
 0x979   :  { %v1748_v30 = vpop.permute.xlu1 %1747  ;;  %3263 = vmatprep.subr.bf16.mxu1 %v3262_v35  ;;  %v3230_v28 = vpack.c.bf16 %v1781_v13, %v1777_v58  ;;  %v1783_v35 = vmul.f32 %v5009_v11, %v1759_v9  ;;  %v3232_v5 = vpack.c.bf16 %v1780_v43, %v1776_v10  ;;  %v1802_v44 = vsel %vm1800_vm4, %v5659_v54, %v4772_v45 }
 0x97a   :  { %v1752_v33 = vsel %vm1751_vm3, %v4671_v51, %v1748_v30  ;;  %v1758_v16 = vsel %vm1751_vm3, %v1748_v30, %v4669_v50  ;;  %v1829_v51 = vmul.f32 %v5022_v42, %v1806_v25  ;;  %v1830_v50 = vmul.f32 %v5030_v2, %v1804_v6  ;;  %v1889_v30 = vpop.permute.xlu0 %1888 }
 0x97b   :  { %v1778_v13 = vmul.f32 %v5005_v48, %v1752_v33  ;;  %v1779_v63 = vmul.f32 %v5009_v11, %v1758_v16  ;;  %3229 = vmatpush1.bf16.msra.mxu0 %v3228_v14  ;;  %v1832_v3 = vmul.f32 %v5056_v46, %v1808_v4  ;;  %v1831_v6 = vmul.f32 %v5061_v39, %v1802_v44  ;;  %v5662_v33 = vld [vmem:[#allocation28_spill] sm:$0xff]  ;;  %v5664_v4 = vld [vmem:[#allocation31_spill] sm:$0xff] }
 0x97c   :  { %3231 = vmatprep.subr.bf16.mxu0 %v3230_v28  ;;  %3265 = vmatpush1.bf16.msra.mxu1 %v3264_v34  ;;  %v5661_v34 = vld [vmem:[#allocation29_spill] sm:$0xff]  ;;  %v5084_v45 = vrot.slane %v4709_v60, %v5662_v33  ;;  %v1851_v44 = vsel %vm1849_vm5, %v4942_v24, %v4994_v62 }
 0x97d   :  { %v3268_v27 = vpack.c.bf16 %v1782_v20, %v1778_v13  ;;  %v1789_v26 = vpop.permute.xlu1 %1788  ;;  %v3266_v58 = vpack.c.bf16 %v1783_v35, %v1779_v63  ;;  %v1855_v20 = vsel %vm1849_vm5, %v4830_v53, %v4887_v36  ;;  %v5098_v35 = vrot.slane %v4699_v19, %v5662_v33 }
 0x97e   :  { %v1803_v14 = vsel %vm1800_vm4, %v1789_v26, %v5660_v61  ;;  %v1805_v9 = vsel %vm1800_vm4, %v5661_v34, %v1789_v26  ;;  %v1853_v63 = vsel %vm1849_vm5, %v4887_v36, %v4942_v24  ;;  %v5109_v19 = vrot.slane %v4715_v1, %v5662_v33  ;;  %v5663_v26 = vld [vmem:[#allocation32_spill] sm:$0xff] }
 0x97f   :  { %v1825_v49 = vmul.f32 %v5022_v42, %v1805_v9  ;;  %v1826_v25 = vmul.f32 %v5030_v2, %v1803_v14  ;;  %3233 = vmatpush1.bf16.msra.mxu0 %v3232_v5  ;;  %3267 = vmatprep.subr.bf16.mxu1 %v3266_v58  ;;  %v1879_v36 = vmul.f32 %v5098_v35, %v1853_v63 }
 0x980   :  { %3269 = vmatpush1.bf16.msra.mxu1 %v3268_v27  ;;  %v1878_v27 = vmul.f32 %v5084_v45, %v1855_v20  ;;  %v5120_v14 = vrot.slane %v4725_v57, %v5662_v33  ;;  %v1904_v33 = vsel %vm1898_vm6, %v5048_v31, %v1889_v30 }
 0x981   :  { %v3236_v10 = vpack.c.bf16 %v1829_v51, %v1825_v49  ;;  %v1797_v28 = vpop.permute.xlu1 %1796  ;;  %v3234_v43 = vpack.c.bf16 %v1830_v50, %v1826_v25  ;;  %v1857_v49 = vsel %vm1849_vm5, %v4994_v62, %v4830_v53 }
 0x982   :  { %v1801_v54 = vsel %vm1800_vm4, %v5660_v61, %v1797_v28  ;;  %v1807_v16 = vsel %vm1800_vm4, %v1797_v28, %v5661_v34  ;;  %v1893_v34 = vpop.permute.xlu0 %1892  ;;  %v1880_v24 = vmul.f32 %v5120_v14, %v1851_v44 }
 0x983   :  { %v1827_v60 = vmul.f32 %v5061_v39, %v1801_v54  ;;  %v1828_v13 = vmul.f32 %v5056_v46, %v1807_v16  ;;  %3235 = vmatprep.subr.bf16.mxu0 %v3234_v43  ;;  %v1881_v43 = vmul.f32 %v5109_v19, %v1857_v49  ;;  %v5148_v54 = vld [vmem:[#allocation8 + $0x28] ss:$0 sm:$0xff]  ;;  %v1902_v16 = vsel %vm1898_vm6, %v1889_v30, %v1893_v34 }
 0x984   :  { %3237 = vmatpush1.bf16.msra.mxu0 %v3236_v10 }
 0x985   :  { %v3272_v51 = vpack.c.bf16 %v1831_v6, %v1827_v60  ;;  %v1838_v50 = vpop.permute.xlu1 %1837  ;;  %v3270_v5 = vpack.c.bf16 %v1832_v3, %v1828_v13  ;;  %v5143_v6 = vld [vmem:[#allocation8 + $0x20] ss:$0 sm:$0xff] }
 0x986   :  { %v1852_v58 = vsel %vm1849_vm5, %v1838_v50, %v5663_v26  ;;  %v1854_v61 = vsel %vm1849_vm5, %v5664_v4, %v1838_v50  ;;  %v1897_v20 = vpop.permute.xlu0 %1896 }
 0x987   :  { %v1874_v9 = vmul.f32 %v5084_v45, %v1854_v61  ;;  %v1875_v1 = vmul.f32 %v5098_v35, %v1852_v58  ;;  %3271 = vmatprep.subr.bf16.mxu1 %v3270_v5  ;;  %v5666_v5 = vld [vmem:[#allocation34_spill] sm:$0xff]  ;;  %v1928_v58 = vmul.f32 %v5148_v54, %v1902_v16  ;;  %v5162_v61 = vld [vmem:[#allocation8 + $0x30] ss:$0 sm:$0xff] }
 0x988   :  { %3273 = vmatpush1.bf16.msra.mxu1 %v3272_v51  ;;  %v5665_v51 = vld [vmem:[#allocation35_spill] sm:$0xff] }
 0x989   :  { %v3240_v57 = vpack.c.bf16 %v1878_v27, %v1874_v9  ;;  %v1846_v25 = vpop.permute.xlu1 %1845  ;;  %v3238_v3 = vpack.c.bf16 %v1879_v36, %v1875_v1  ;;  %v5164_v36 = vld [vmem:[#allocation8 + $0x38] ss:$0 sm:$0xff]  ;;  %v1900_v9 = vsel %vm1898_vm6, %v1893_v34, %v1897_v20  ;;  %v1906_v1 = vsel %vm1898_vm6, %v1897_v20, %v5048_v31 }
 0x98a   :  { %v1850_v10 = vsel %vm1849_vm5, %v5663_v26, %v1846_v25  ;;  %v1856_v28 = vsel %vm1849_vm5, %v1846_v25, %v5664_v4  ;;  %v1927_v26 = vmul.f32 %v5143_v6, %v1904_v33  ;;  %v1930_v34 = vmul.f32 %v5164_v36, %v1906_v1 }
 0x98b   :  { %v1876_v53 = vmul.f32 %v5120_v14, %v1850_v10  ;;  %v1877_v62 = vmul.f32 %v5109_v19, %v1856_v28  ;;  %3239 = vmatprep.subr.bf16.mxu0 %v3238_v3  ;;  %v1929_v10 = vmul.f32 %v5162_v61, %v1900_v9 }
 0x98c   :  { %3241 = vmatpush1.bf16.msra.mxu0 %v3240_v57 }
 0x98d   :  { %v3276_v60 = vpack.c.bf16 %v1880_v24, %v1876_v53  ;;  %v1887_v13 = vpop.permute.xlu1 %1886  ;;  %v3274_v63 = vpack.c.bf16 %v1881_v43, %v1877_v62  ;;  %v1931_v24 = vld [vmem:[%s5586_s16] sm:$0xff]  ;;  %v5667_v62 = vmov 0.0  }
 0x98e   :  { %v1901_v50 = vsel %vm1898_vm6, %v1887_v13, %v5665_v51  ;;  %v1903_v27 = vsel %vm1898_vm6, %v5666_v5, %v1887_v13 }
 0x98f   :  { %v1923_v4 = vmul.f32 %v5143_v6, %v1903_v27  ;;  %v1924_v30 = vmul.f32 %v5148_v54, %v1901_v50  ;;  %3275 = vmatprep.subr.bf16.mxu1 %v3274_v63 }
 0x990   :  { %3277 = vmatpush1.bf16.msra.mxu1 %v3276_v60 }
 0x991   :  { %v3244_v44 = vpack.c.bf16 %v1927_v26, %v1923_v4  ;;  %v1895_v49 = vpop.permute.xlu1 %1894  ;;  %v3242_v57 = vpack.c.bf16 %v1928_v58, %v1924_v30 }
 0x992   :  { %v1899_v25 = vsel %vm1898_vm6, %v5665_v51, %v1895_v49  ;;  %v1905_v3 = vsel %vm1898_vm6, %v1895_v49, %v5666_v5  ;;  %v2229_v49 = vld [vmem:[%s5589_s19] sm:$0xff] }
 0x993   :  { %v1925_v28 = vmul.f32 %v5162_v61, %v1899_v25  ;;  %v1926_v31 = vmul.f32 %v5164_v36, %v1905_v3  ;;  %3243 = vmatprep.subr.bf16.mxu0 %v3242_v57 }
 0x994   :  { %3245 = vmatpush1.bf16.msra.mxu0 %v3244_v44 }
 0x995   :  { %v3280_v43 = vpack.c.bf16 %v1929_v10, %v1925_v28  ;;  %v3278_v53 = vpack.c.bf16 %v1930_v34, %v1926_v31 }
 0x997   :  { %2007 = vmatmul.mubr.f32.vlgmr.msra.gmra.mrb[16].mxu0 %v1931_v24  ;;  %3279 = vmatprep.subr.bf16.mxu1 %v3278_v53 }
 0x998   :  { %3281 = vmatpush1.bf16.msra.mxu1 %v3280_v43  ;;  %2302 = vmatprep.mubr.f32.mxu0 %v5667_v62  ;;  %v5668_v43 = vld [vmem:[#allocation37_spill] sm:$0xff] }
 0x99b   :  { %2078 = vmatmul.mubr.f32.vlgmr.msra.gmra.mrb[18].mxu1 %v1931_v24 }
 0x99c   :  { %2373 = vmatprep.mubr.f32.mxu1 %v5667_v62 }
 0x9a2   :  { %v1937_v33 = vpop.permute.xlu1 %1936 }
 0xa6a   :  { %v2008_v16 = vpop.f32.mrb[16].mxu0 }
 0xa6b   :  { %v2009_v20 = vadd.f32 %v2008_v16, %v1937_v33  ;;  %v2010_v60 = vpop.f32.mrb[17].mxu0 }
 0xa6c   :  { %v2011_v13 = vadd.f32 %v2010_v60, %v1937_v33 }
 0xa6d   :  { %vm2084_vm7 = vcmp.ge.f32.partialorder %v2009_v20, 0.0  ;;  %v2088_v63 = vmul.f32 0.01, %v2009_v20 }
 0xa6e   :  { %vm2085_vm8 = vcmp.ge.f32.partialorder %v2011_v13, 0.0  ;;  %v2089_v51 = vmul.f32 0.01, %v2011_v13  ;;  %v2079_v50 = vpop.f32.mrb[18].mxu1 }
 0xa6f   :  { %v5186_v5 = vsel %vm2084_vm7, %v2009_v20, %v2088_v63  ;;  %v2080_v27 = vadd.f32 %v2079_v50, %v1937_v33  ;;  %v2081_v26 = vpop.f32.mrb[19].mxu1 }
 0xa70   :  { %v5188_v58 = vsel %vm2085_vm8, %v2011_v13, %v2089_v51  ;;  %v2082_v4 = vadd.f32 %v2081_v26, %v1937_v33  ;;  %2096 = vrot.lane.b32.xlu0 %v5186_v5, %s3681_s14 }
 0xa71   :  { %vm2086_vm9 = vcmp.ge.f32.partialorder %v2080_v27, 0.0  ;;  %v2090_v30 = vmul.f32 0.01, %v2080_v27  ;;  %2098 = vrot.lane.b32.xlu1 %v5188_v58, %s3681_s14 }
 0xa72   :  { %vm2087_vm10 = vcmp.ge.f32.partialorder %v2082_v4, 0.0  ;;  %v2091_v9 = vmul.f32 0.01, %v2082_v4 }
 0xa73   :  { %v5194_v1 = vsel %vm2086_vm9, %v2080_v27, %v2090_v30 }
 0xa74   :  { %v5196_v44 = vsel %vm2087_vm10, %v2082_v4, %v2091_v9  ;;  %2100 = vrot.lane.b32.xlu0 %v5194_v1, %s3681_s14 }
 0xa75   :  { %2102 = vrot.lane.b32.xlu1 %v5196_v44, %s3681_s14 }
 0xa78   :  { %2112 = vrot.lane.b32.xlu0 %v5186_v5, %s3661_s25 }
 0xa79   :  { %2114 = vrot.lane.b32.xlu1 %v5188_v58, %s3661_s25 }
 0xa7c   :  { %2116 = vrot.lane.b32.xlu0 %v5194_v1, %s3661_s25 }
 0xa7d   :  { %2118 = vrot.lane.b32.xlu1 %v5196_v44, %s3661_s25 }
 0xa80   :  { %2128 = vrot.lane.b32.xlu0 %v5186_v5, %s3682_s30 }
 0xa81   :  { %2130 = vrot.lane.b32.xlu1 %v5188_v58, %s3682_s30 }
 0xa84   :  { %2132 = vrot.lane.b32.xlu0 %v5194_v1, %s3682_s30 }
 0xa85   :  { %2134 = vrot.lane.b32.xlu1 %v5196_v44, %s3682_s30 }
 0xa88   :  { %2144 = vrot.lane.b32.xlu0 %v5186_v5, %s3668_s2 }
 0xa89   :  { %2146 = vrot.lane.b32.xlu1 %v5188_v58, %s3668_s2 }
 0xa8c   :  { %2148 = vrot.lane.b32.xlu0 %v5194_v1, %s3668_s2 }
 0xa8d   :  { %2150 = vrot.lane.b32.xlu1 %v5196_v44, %s3668_s2 }
 0xa90   :  { %2164 = vrot.lane.b32.xlu0 %v5186_v5, %s3669_s0 }
 0xa91   :  { %2166 = vrot.lane.b32.xlu1 %v5188_v58, %s3669_s0 }
 0xa94   :  { %2168 = vrot.lane.b32.xlu0 %v5194_v1, %s3669_s0 }
 0xa95   :  { %2170 = vrot.lane.b32.xlu1 %v5196_v44, %s3669_s0 }
 0xa98   :  { %2180 = vrot.lane.b32.xlu0 %v5186_v5, %s3683_s5 }
 0xa99   :  { %2182 = vrot.lane.b32.xlu1 %v5188_v58, %s3683_s5 }
 0xa9c   :  { %2184 = vrot.lane.b32.xlu0 %v5194_v1, %s3683_s5 }
 0xa9d   :  { %2186 = vrot.lane.b32.xlu1 %v5196_v44, %s3683_s5 }
 0xaa0   :  { %2196 = vrot.lane.b32.xlu0 %v5186_v5, %s3684_s24 }
 0xaa1   :  { %2198 = vrot.lane.b32.xlu1 %v5188_v58, %s3684_s24 }
 0xaa4   :  { %2200 = vrot.lane.b32.xlu0 %v5194_v1, %s3684_s24 }
 0xaa5   :  { %2202 = vrot.lane.b32.xlu1 %v5196_v44, %s3684_s24 }
 0xaa8   :  { %2212 = vrot.lane.b32.xlu0 %v5186_v5, %s3685_s9 }
 0xaa9   :  { %2214 = vrot.lane.b32.xlu1 %v5188_v58, %s3685_s9 }
 0xaac   :  { %2216 = vrot.lane.b32.xlu0 %v5194_v1, %s3685_s9 }
 0xaad   :  { %2218 = vrot.lane.b32.xlu1 %v5196_v44, %s3685_s9 }
 0xab0   :  { %2232 = vperm.xlu0 %3388, %v2229_v49  }
 0xae2   :  { %v2097_v57 = vpop.permute.xlu0 %2096 }
 0xae3   :  { %v2099_v25 = vpop.permute.xlu1 %2098 }
 0xae4   :  { %v2106_v34 = vsel %vm1531_vm15, %v2097_v57, %v2099_v25 }
 0xae5   :  { %v2109_v53 = vmul.f32 %v2106_v34, %v5668_v43 }
 0xae6   :  { %v2101_v3 = vpop.permute.xlu0 %2100 }
 0xae7   :  { %v2103_v10 = vpop.permute.xlu1 %2102  ;;  %v2105_v13 = vsel %vm1531_vm15, %v2099_v25, %v2101_v3  ;;  %v5669_v25 = vld [vmem:[#allocation39_spill] sm:$0xff] }
 0xae8   :  { %v2104_v16 = vsel %vm1531_vm15, %v2101_v3, %v2103_v10  ;;  %v2107_v20 = vsel %vm1531_vm15, %v2103_v10, %v2097_v57  ;;  %v2110_v3 = vmul.f32 %v2105_v13, %v5669_v25 }
 0xae9   :  { %v2108_v30 = vmul.f32 %v2107_v20, %v4713_v8  ;;  %v2111_v9 = vmul.f32 %v2104_v16, %v4729_v7 }
 0xaea   :  { %v2113_v28 = vpop.permute.xlu0 %2112 }
 0xaeb   :  { %v2115_v31 = vpop.permute.xlu1 %2114 }
 0xaec   :  { %v2122_v24 = vsel %vm1580_vm0, %v2113_v28, %v2115_v31 }
 0xaed   :  { %v2125_v33 = vmul.f32 %v2122_v24, %v4752_v17 }
 0xaee   :  { %v2117_v60 = vpop.permute.xlu0 %2116 }
 0xaef   :  { %v2121_v63 = vsel %vm1580_vm0, %v2115_v31, %v2117_v60  ;;  %v2119_v51 = vpop.permute.xlu1 %2118  ;;  %v3282_v50 = vpack.c.bf16 %v2125_v33, %v2109_v53 }
 0xaf0   :  { %v2126_v27 = vmul.f32 %v2121_v63, %v4792_v40  ;;  %v2120_v26 = vsel %vm1580_vm0, %v2117_v60, %v2119_v51  ;;  %v2123_v4 = vsel %vm1580_vm0, %v2119_v51, %v2113_v28 }
 0xaf1   :  { %v2124_v49 = vmul.f32 %v2123_v4, %v4770_v38  ;;  %v2127_v57 = vmul.f32 %v2120_v26, %v4784_v15  ;;  %3283 = vmatprep.subr.bf16.mxu0 %v3282_v50 }
 0xaf2   :  { %v2129_v10 = vpop.permute.xlu0 %2128  ;;  %v3300_v53 = vpack.c.bf16 %v2126_v27, %v2110_v3 }
 0xaf3   :  { %v3284_v34 = vpack.c.bf16 %v2124_v49, %v2108_v30  ;;  %v2131_v31 = vpop.permute.xlu1 %2130  ;;  %v3298_v24 = vpack.c.bf16 %v2127_v57, %v2111_v9 }
 0xaf4   :  { %v2138_v16 = vsel %vm1629_vm1, %v2129_v10, %v2131_v31 }
 0xaf5   :  { %3285 = vmatpush1.bf16.msra.mxu0 %v3284_v34  ;;  %3299 = vmatprep.subr.bf16.mxu1 %v3298_v24  ;;  %v2141_v13 = vmul.f32 %v2138_v16, %v4814_v41 }
 0xaf6   :  { %3301 = vmatpush1.bf16.msra.mxu1 %v3300_v53  ;;  %v2133_v28 = vpop.permute.xlu0 %2132 }
 0xaf7   :  { %v2135_v33 = vpop.permute.xlu1 %2134  ;;  %v2137_v4 = vsel %vm1629_vm1, %v2131_v31, %v2133_v28 }
 0xaf8   :  { %v2136_v50 = vsel %vm1629_vm1, %v2133_v28, %v2135_v33  ;;  %v2139_v27 = vsel %vm1629_vm1, %v2135_v33, %v2129_v10  ;;  %v2142_v28 = vmul.f32 %v2137_v4, %v4871_v23 }
 0xaf9   :  { %v2140_v24 = vmul.f32 %v2139_v27, %v4847_v52  ;;  %v2143_v10 = vmul.f32 %v2136_v50, %v4863_v18  ;;  %v2160_v50 = vmul.f32 %v5186_v5, %v4801_v55  ;;  %v2162_v5 = vmul.f32 %v5194_v1, %v4810_v32 }
 0xafa   :  { %v2145_v20 = vpop.permute.xlu0 %2144 }
 0xafb   :  { %v2147_v60 = vpop.permute.xlu1 %2146 }
 0xafc   :  { %v2154_v63 = vsel %vm1678_vm2, %v2145_v20, %v2147_v60 }
 0xafd   :  { %v2157_v51 = vmul.f32 %v2154_v63, %v4895_v47 }
 0xafe   :  { %v2149_v26 = vpop.permute.xlu0 %2148 }
 0xaff   :  { %v2153_v30 = vsel %vm1678_vm2, %v2147_v60, %v2149_v26  ;;  %v2151_v9 = vpop.permute.xlu1 %2150  ;;  %v3286_v49 = vpack.c.bf16 %v2157_v51, %v2141_v13 }
 0xb00   :  { %v2158_v57 = vmul.f32 %v2153_v30, %v4946_v56  ;;  %v2152_v3 = vsel %vm1678_vm2, %v2149_v26, %v2151_v9  ;;  %v2155_v34 = vsel %vm1678_vm2, %v2151_v9, %v2145_v20 }
 0xb01   :  { %v2156_v53 = vmul.f32 %v2155_v34, %v4929_v21  ;;  %v2159_v31 = vmul.f32 %v2152_v3, %v4936_v22  ;;  %3287 = vmatprep.subr.bf16.mxu0 %v3286_v49 }
 0xb02   :  { %v2165_v33 = vpop.permute.xlu0 %2164  ;;  %v3304_v13 = vpack.c.bf16 %v2158_v57, %v2142_v28  ;;  %v2161_v57 = vmul.f32 %v5188_v58, %v4835_v59 }
 0xb03   :  { %v3288_v16 = vpack.c.bf16 %v2156_v53, %v2140_v24  ;;  %v2167_v60 = vpop.permute.xlu1 %2166  ;;  %v3302_v63 = vpack.c.bf16 %v2159_v31, %v2143_v10  ;;  %v2163_v24 = vmul.f32 %v5196_v44, %v4839_v12 }
 0xb04   :  { %v2174_v51 = vsel %vm1751_vm3, %v2165_v33, %v2167_v60 }
 0xb05   :  { %3289 = vmatpush1.bf16.msra.mxu0 %v3288_v16  ;;  %3303 = vmatprep.subr.bf16.mxu1 %v3302_v63  ;;  %v2176_v27 = vmul.f32 %v2174_v51, %v4984_v0 }
 0xb06   :  { %3305 = vmatpush1.bf16.msra.mxu1 %v3304_v13  ;;  %v2169_v20 = vpop.permute.xlu0 %2168 }
 0xb07   :  { %v2173_v26 = vsel %vm1751_vm3, %v2167_v60, %v2169_v20  ;;  %v2171_v4 = vpop.permute.xlu1 %2170  ;;  %v3292_v31 = vpack.c.bf16 %v2176_v27, %v2160_v50 }
 0xb08   :  { %v2177_v30 = vmul.f32 %v2173_v26, %v4964_v29  ;;  %v2172_v9 = vsel %vm1751_vm3, %v2169_v20, %v2171_v4  ;;  %v2175_v49 = vsel %vm1751_vm3, %v2171_v4, %v2165_v33 }
 0xb09   :  { %v2178_v3 = vmul.f32 %v2172_v9, %v5005_v48  ;;  %v2179_v34 = vmul.f32 %v2175_v49, %v5009_v11 }
 0xb0a   :  { %v2181_v10 = vpop.permute.xlu0 %2180  ;;  %v3290_v53 = vpack.c.bf16 %v2177_v30, %v2161_v57 }
 0xb0b   :  { %v3308_v28 = vpack.c.bf16 %v2178_v3, %v2162_v5  ;;  %v2183_v16 = vpop.permute.xlu1 %2182  ;;  %v3306_v60 = vpack.c.bf16 %v2179_v34, %v2163_v24 }
 0xb0c   :  { %3291 = vmatprep.subr.bf16.mxu0 %v3290_v53  ;;  %v2190_v13 = vsel %vm1800_vm4, %v2181_v10, %v2183_v16 }
 0xb0d   :  { %3293 = vmatpush1.bf16.msra.mxu0 %v3292_v31  ;;  %3307 = vmatprep.subr.bf16.mxu1 %v3306_v60  ;;  %v2192_v26 = vmul.f32 %v2190_v13, %v5022_v42 }
 0xb0e   :  { %v2185_v58 = vpop.permute.xlu0 %2184  ;;  %3309 = vmatpush1.bf16.msra.mxu1 %v3308_v28 }
 0xb0f   :  { %v2187_v33 = vpop.permute.xlu1 %2186  ;;  %v2189_v51 = vsel %vm1800_vm4, %v2183_v16, %v2185_v58 }
 0xb10   :  { %v2188_v20 = vsel %vm1800_vm4, %v2185_v58, %v2187_v33  ;;  %v2191_v50 = vsel %vm1800_vm4, %v2187_v33, %v2181_v10  ;;  %v2193_v49 = vmul.f32 %v2189_v51, %v5030_v2 }
 0xb11   :  { %v2194_v34 = vmul.f32 %v2188_v20, %v5061_v39  ;;  %v2195_v24 = vmul.f32 %v2191_v50, %v5056_v46 }
 0xb12   :  { %v2197_v1 = vpop.permute.xlu0 %2196 }
 0xb13   :  { %v2199_v63 = vpop.permute.xlu1 %2198 }
 0xb14   :  { %v2206_v44 = vsel %vm1849_vm5, %v2197_v1, %v2199_v63 }
 0xb15   :  { %v2208_v4 = vmul.f32 %v2206_v44, %v5084_v45 }
 0xb16   :  { %v2201_v27 = vpop.permute.xlu0 %2200 }
 0xb17   :  { %v2205_v30 = vsel %vm1849_vm5, %v2199_v63, %v2201_v27  ;;  %v2203_v9 = vpop.permute.xlu1 %2202  ;;  %v3296_v16 = vpack.c.bf16 %v2208_v4, %v2192_v26 }
 0xb18   :  { %v2209_v57 = vmul.f32 %v2205_v30, %v5098_v35  ;;  %v2204_v5 = vsel %vm1849_vm5, %v2201_v27, %v2203_v9  ;;  %v2207_v3 = vsel %vm1849_vm5, %v2203_v9, %v2197_v1  ;;  %v2228_v30 = vld [vmem:[%s5588_s18] sm:$0xff] }
 0xb19   :  { %v2210_v10 = vmul.f32 %v2204_v5, %v5120_v14  ;;  %v2211_v53 = vmul.f32 %v2207_v3, %v5109_v19 }
 0xb1a   :  { %v2213_v31 = vpop.permute.xlu0 %2212  ;;  %v3294_v28 = vpack.c.bf16 %v2209_v57, %v2193_v49 }
 0xb1b   :  { %v3312_v60 = vpack.c.bf16 %v2210_v10, %v2194_v34  ;;  %v2215_v58 = vpop.permute.xlu1 %2214  ;;  %v3310_v33 = vpack.c.bf16 %v2211_v53, %v2195_v24 }
 0xb1c   :  { %3295 = vmatprep.subr.bf16.mxu0 %v3294_v28  ;;  %v2222_v1 = vsel %vm1898_vm6, %v2213_v31, %v2215_v58 }
 0xb1d   :  { %3297 = vmatpush1.bf16.msra.mxu0 %v3296_v16  ;;  %3311 = vmatprep.subr.bf16.mxu1 %v3310_v33  ;;  %v2224_v27 = vmul.f32 %v5143_v6, %v2222_v1 }
 0xb1e   :  { %v2217_v63 = vpop.permute.xlu0 %2216  ;;  %3313 = vmatpush1.bf16.msra.mxu1 %v3312_v60 }
 0xb1f   :  { %v2221_v13 = vsel %vm1898_vm6, %v2215_v58, %v2217_v63  ;;  %v2219_v44 = vpop.permute.xlu1 %2218 }
 0xb20   :  { %v2225_v51 = vmul.f32 %v5148_v54, %v2221_v13  ;;  %v2220_v20 = vsel %vm1898_vm6, %v2217_v63, %v2219_v44  ;;  %v2223_v50 = vsel %vm1898_vm6, %v2219_v44, %v2213_v31 }
 0xb21   :  { %v2226_v26 = vmul.f32 %v5162_v61, %v2220_v20  ;;  %v2227_v4 = vmul.f32 %v5164_v36, %v2223_v50 }
 0xb22   :  { %2254 = vmatprep.subr.mxu0 %v2225_v51 }
 0xb23   :  { %2255 = vmatpush1.msra.mxu0 %v2224_v27  ;;  %2325 = vmatprep.subr.mxu1 %v2227_v4 }
 0xb24   :  { %2748 = vmatmul.mubr.msk.f32.vlgmr.msra.gmra.mrb[18].mxu0 %vm1218_vm13, %v2228_v30  ;;  %2326 = vmatpush1.msra.mxu1 %v2226_v26 }
 0xb25   :  { %2749 = vmatmul.mubr.msk.f32.vlgmr.msra.gmra.mrb[20].mxu1 %vm1218_vm13, %v2228_v30  ;;  %2598 = vmatprep.mubr.f32.mxu0 %v5667_v62 }
 0xb26   :  { %2669 = vmatprep.mubr.f32.mxu1 %v5667_v62 }
 0xb2f   :  { %v2233_v9 = vpop.permute.xlu0 %2232 }
 0xbf7   :  { %v2304_v49 = vpop.f32.mrb[18].mxu0 }
 0xbf8   :  { %v2305_v57 = vadd.f32 %v2304_v49, %v2233_v9  ;;  %v2306_v5 = vpop.f32.mrb[19].mxu0  ;;  %v2375_v3 = vpop.f32.mrb[20].mxu1 }
 0xbf9   :  { %v2307_v34 = vadd.f32 %v2306_v5, %v2233_v9  ;;  %v2376_v24 = vadd.f32 %v2375_v3, %v2233_v9  ;;  %v2377_v10 = vpop.f32.mrb[21].mxu1 }
 0xbfa   :  { %vm2380_vm11 = vcmp.ge.f32.partialorder %v2305_v57, 0.0  ;;  %v2384_v53 = vmul.f32 0.01, %v2305_v57  ;;  %v2378_v31 = vadd.f32 %v2377_v10, %v2233_v9 }
 0xbfb   :  { %vm2381_vm12 = vcmp.ge.f32.partialorder %v2307_v34, 0.0  ;;  %v2385_v28 = vmul.f32 0.01, %v2307_v34  ;;  %v2386_v60 = vmul.f32 0.01, %v2376_v24  ;;  %vm2382_vm14 = vcmp.ge.f32.partialorder %v2376_v24, 0.0 }
 0xbfc   :  { %v5372_v16 = vsel %vm2380_vm11, %v2305_v57, %v2384_v53  ;;  %v2387_v62 = vmul.f32 0.01, %v2378_v31  ;;  %vm2383_vm7 = vcmp.ge.f32.partialorder %v2378_v31, 0.0 }
 0xbfd   :  { %v5374_v58 = vsel %vm2381_vm12, %v2307_v34, %v2385_v28  ;;  %2392 = vrot.lane.b32.xlu1 %v5372_v16, %s3681_s14  ;;  %v5380_v33 = vsel %vm2382_vm14, %v2376_v24, %v2386_v60 }
 0xbfe   :  { %2394 = vrot.lane.b32.xlu0 %v5374_v58, %s3681_s14  ;;  %v5382_v1 = vsel %vm2383_vm7, %v2378_v31, %v2387_v62 }
 0xc01   :  { %2396 = vrot.lane.b32.xlu1 %v5380_v33, %s3681_s14 }
 0xc02   :  { %2398 = vrot.lane.b32.xlu0 %v5382_v1, %s3681_s14 }
 0xc05   :  { %2408 = vrot.lane.b32.xlu1 %v5372_v16, %s3661_s25 }
 0xc06   :  { %2410 = vrot.lane.b32.xlu0 %v5374_v58, %s3661_s25 }
 0xc09   :  { %2412 = vrot.lane.b32.xlu1 %v5380_v33, %s3661_s25 }
 0xc0a   :  { %2414 = vrot.lane.b32.xlu0 %v5382_v1, %s3661_s25 }
 0xc0d   :  { %2424 = vrot.lane.b32.xlu1 %v5372_v16, %s3682_s30 }
 0xc0e   :  { %2426 = vrot.lane.b32.xlu0 %v5374_v58, %s3682_s30 }
 0xc11   :  { %2428 = vrot.lane.b32.xlu1 %v5380_v33, %s3682_s30 }
 0xc12   :  { %2430 = vrot.lane.b32.xlu0 %v5382_v1, %s3682_s30 }
 0xc15   :  { %2440 = vrot.lane.b32.xlu1 %v5372_v16, %s3668_s2 }
 0xc16   :  { %2442 = vrot.lane.b32.xlu0 %v5374_v58, %s3668_s2 }
 0xc19   :  { %2444 = vrot.lane.b32.xlu1 %v5380_v33, %s3668_s2 }
 0xc1a   :  { %2446 = vrot.lane.b32.xlu0 %v5382_v1, %s3668_s2  ;;  %s5670_s2 = sld [smem:[#allocation48_spill]] }
 0xc1d   :  { %2460 = vrot.lane.b32.xlu1 %v5372_v16, %s3669_s0 }
 0xc1e   :  { %2462 = vrot.lane.b32.xlu0 %v5374_v58, %s3669_s0 }
 0xc20   :  { %v2525_v63 = vld [vmem:[%s5670_s2] sm:$0xff] }
 0xc21   :  { %2464 = vrot.lane.b32.xlu1 %v5380_v33, %s3669_s0 }
 0xc22   :  { %2466 = vrot.lane.b32.xlu0 %v5382_v1, %s3669_s0 }
 0xc25   :  { %2476 = vrot.lane.b32.xlu1 %v5372_v16, %s3683_s5 }
 0xc26   :  { %2478 = vrot.lane.b32.xlu0 %v5374_v58, %s3683_s5 }
 0xc29   :  { %2480 = vrot.lane.b32.xlu1 %v5380_v33, %s3683_s5 }
 0xc2a   :  { %2482 = vrot.lane.b32.xlu0 %v5382_v1, %s3683_s5 }
 0xc2d   :  { %2492 = vrot.lane.b32.xlu1 %v5372_v16, %s3684_s24 }
 0xc2e   :  { %2494 = vrot.lane.b32.xlu0 %v5374_v58, %s3684_s24 }
 0xc31   :  { %2496 = vrot.lane.b32.xlu1 %v5380_v33, %s3684_s24 }
 0xc32   :  { %2498 = vrot.lane.b32.xlu0 %v5382_v1, %s3684_s24 }
 0xc35   :  { %2508 = vrot.lane.b32.xlu1 %v5372_v16, %s3685_s9 }
 0xc36   :  { %2510 = vrot.lane.b32.xlu0 %v5374_v58, %s3685_s9 }
 0xc39   :  { %2512 = vrot.lane.b32.xlu1 %v5380_v33, %s3685_s9 }
 0xc3a   :  { %2514 = vrot.lane.b32.xlu0 %v5382_v1, %s3685_s9 }
 0xc3d   :  { %2528 = vperm.xlu1 %3389, %v2525_v63  }
 0xc6f   :  { %v2393_v13 = vpop.permute.xlu1 %2392 }
 0xc70   :  { %v2395_v44 = vpop.permute.xlu0 %2394 }
 0xc71   :  { %v2402_v50 = vsel %vm1531_vm15, %v2393_v13, %v2395_v44 }
 0xc72   :  { %v2405_v30 = vmul.f32 %v2402_v50, %v5668_v43 }
 0xc73   :  { %v2397_v51 = vpop.permute.xlu1 %2396 }
 0xc74   :  { %v2399_v20 = vpop.permute.xlu0 %2398  ;;  %v2401_v3 = vsel %vm1531_vm15, %v2395_v44, %v2397_v51 }
 0xc75   :  { %v2400_v49 = vsel %vm1531_vm15, %v2397_v51, %v2399_v20  ;;  %v2403_v57 = vsel %vm1531_vm15, %v2399_v20, %v2393_v13  ;;  %v2406_v63 = vmul.f32 %v2401_v3, %v5669_v25 }
 0xc76   :  { %v2404_v31 = vmul.f32 %v2403_v57, %v4713_v8  ;;  %v2407_v28 = vmul.f32 %v2400_v49, %v4729_v7 }
 0xc77   :  { %v2409_v27 = vpop.permute.xlu1 %2408 }
 0xc78   :  { %v2411_v26 = vpop.permute.xlu0 %2410 }
 0xc79   :  { %v2418_v4 = vsel %vm1580_vm0, %v2409_v27, %v2411_v26 }
 0xc7a   :  { %v2421_v9 = vmul.f32 %v2418_v4, %v4752_v17 }
 0xc7b   :  { %v2413_v5 = vpop.permute.xlu1 %2412 }
 0xc7c   :  { %v2417_v34 = vsel %vm1580_vm0, %v2411_v26, %v2413_v5  ;;  %v2415_v24 = vpop.permute.xlu0 %2414  ;;  %v3314_v10 = vpack.c.bf16 %v2421_v9, %v2405_v30 }
 0xc7d   :  { %v2422_v53 = vmul.f32 %v2417_v34, %v4792_v40  ;;  %v2416_v17 = vsel %vm1580_vm0, %v2413_v5, %v2415_v24  ;;  %v2419_v43 = vsel %vm1580_vm0, %v2415_v24, %v2409_v27 }
 0xc7e   :  { %v2420_v60 = vmul.f32 %v2419_v43, %v4770_v38  ;;  %v2423_v62 = vmul.f32 %v2416_v17, %v4784_v15  ;;  %3315 = vmatprep.subr.bf16.mxu0 %v3314_v10 }
 0xc7f   :  { %v2425_v13 = vpop.permute.xlu1 %2424  ;;  %v3332_v20 = vpack.c.bf16 %v2422_v53, %v2406_v63 }
 0xc80   :  { %v3316_v44 = vpack.c.bf16 %v2420_v60, %v2404_v31  ;;  %v2427_v40 = vpop.permute.xlu0 %2426  ;;  %v3330_v51 = vpack.c.bf16 %v2423_v62, %v2407_v28 }
 0xc81   :  { %v2434_v7 = vsel %vm1629_vm1, %v2425_v13, %v2427_v40 }
 0xc82   :  { %3317 = vmatpush1.bf16.msra.mxu0 %v3316_v44  ;;  %3331 = vmatprep.subr.bf16.mxu1 %v3330_v51  ;;  %v2437_v25 = vmul.f32 %v2434_v7, %v4814_v41  ;;  %v2457_v51 = vmul.f32 %v5374_v58, %v4835_v59 }
 0xc83   :  { %3333 = vmatpush1.bf16.msra.mxu1 %v3332_v20  ;;  %v2429_v50 = vpop.permute.xlu1 %2428  ;;  %v2459_v20 = vmul.f32 %v5382_v1, %v4839_v12 }
 0xc84   :  { %v2431_v27 = vpop.permute.xlu0 %2430  ;;  %v2433_v49 = vsel %vm1629_vm1, %v2427_v40, %v2429_v50 }
 0xc85   :  { %v2432_v4 = vsel %vm1629_vm1, %v2429_v50, %v2431_v27  ;;  %v2435_v30 = vsel %vm1629_vm1, %v2431_v27, %v2425_v13  ;;  %v2438_v43 = vmul.f32 %v2433_v49, %v4871_v23 }
 0xc86   :  { %v2436_v24 = vmul.f32 %v2435_v30, %v4847_v52  ;;  %v2439_v10 = vmul.f32 %v2432_v4, %v4863_v18  ;;  %v2456_v18 = vmul.f32 %v5372_v16, %v4801_v55  ;;  %v2458_v55 = vmul.f32 %v5380_v33, %v4810_v32 }
 0xc87   :  { %v2441_v8 = vpop.permute.xlu1 %2440 }
 0xc88   :  { %v2443_v38 = vpop.permute.xlu0 %2442 }
 0xc89   :  { %v2450_v15 = vsel %vm1678_vm2, %v2441_v8, %v2443_v38 }
 0xc8a   :  { %v2453_v26 = vmul.f32 %v2450_v15, %v4895_v47 }
 0xc8b   :  { %v2445_v9 = vpop.permute.xlu1 %2444 }
 0xc8c   :  { %v2449_v57 = vsel %vm1678_vm2, %v2443_v38, %v2445_v9  ;;  %v2447_v5 = vpop.permute.xlu0 %2446  ;;  %v3318_v3 = vpack.c.bf16 %v2453_v26, %v2437_v25 }
 0xc8d   :  { %v2454_v34 = vmul.f32 %v2449_v57, %v4946_v56  ;;  %v2448_v41 = vsel %vm1678_vm2, %v2445_v9, %v2447_v5  ;;  %v2451_v47 = vsel %vm1678_vm2, %v2447_v5, %v2441_v8 }
 0xc8e   :  { %v2452_v53 = vmul.f32 %v2451_v47, %v4929_v21  ;;  %v2455_v17 = vmul.f32 %v2448_v41, %v4936_v22  ;;  %3319 = vmatprep.subr.bf16.mxu0 %v3318_v3 }
 0xc8f   :  { %v2461_v31 = vpop.permute.xlu1 %2460  ;;  %v3336_v62 = vpack.c.bf16 %v2454_v34, %v2438_v43 }
 0xc90   :  { %v3320_v28 = vpack.c.bf16 %v2452_v53, %v2436_v24  ;;  %v2463_v56 = vpop.permute.xlu0 %2462  ;;  %v3334_v60 = vpack.c.bf16 %v2455_v17, %v2439_v10 }
 0xc91   :  { %v2470_v63 = vsel %vm1751_vm3, %v2461_v31, %v2463_v56 }
 0xc92   :  { %3321 = vmatpush1.bf16.msra.mxu0 %v3320_v28  ;;  %3335 = vmatprep.subr.bf16.mxu1 %v3334_v60  ;;  %v2472_v21 = vmul.f32 %v2470_v63, %v4984_v0 }
 0xc93   :  { %3337 = vmatpush1.bf16.msra.mxu1 %v3336_v62  ;;  %v2465_v52 = vpop.permute.xlu1 %2464  ;;  %v2524_v62 = vld [vmem:[%s5671_s15] sm:$0xff] }
 0xc94   :  { %v2469_v23 = vsel %vm1751_vm3, %v2463_v56, %v2465_v52  ;;  %v2467_v22 = vpop.permute.xlu0 %2466  ;;  %v3324_v27 = vpack.c.bf16 %v2472_v21, %v2456_v18 }
 0xc95   :  { %v2473_v13 = vmul.f32 %v2469_v23, %v4964_v29  ;;  %v2468_v44 = vsel %vm1751_vm3, %v2465_v52, %v2467_v22  ;;  %v2471_v40 = vsel %vm1751_vm3, %v2467_v22, %v2461_v31  ;;  %v5672_v23 = vld [vmem:[#allocation27_spill] sm:$0xff] }
 0xc96   :  { %v2474_v0 = vmul.f32 %v2468_v44, %v5005_v48  ;;  %v2475_v16 = vmul.f32 %v2471_v40, %v5009_v11 }
 0xc97   :  { %v2477_v29 = vpop.permute.xlu1 %2476  ;;  %v3322_v50 = vpack.c.bf16 %v2473_v13, %v2457_v51 }
 0xc98   :  { %v3340_v7 = vpack.c.bf16 %v2474_v0, %v2458_v55  ;;  %v2479_v8 = vpop.permute.xlu0 %2478  ;;  %v3338_v38 = vpack.c.bf16 %v2475_v16, %v2459_v20 }
 0xc99   :  { %3323 = vmatprep.subr.bf16.mxu0 %v3322_v50  ;;  %v2486_v48 = vsel %vm1800_vm4, %v2477_v29, %v2479_v8 }
 0xc9a   :  { %3325 = vmatpush1.bf16.msra.mxu0 %v3324_v27  ;;  %3339 = vmatprep.subr.bf16.mxu1 %v3338_v38  ;;  %v2488_v26 = vmul.f32 %v2486_v48, %v5022_v42 }
 0xc9b   :  { %v2481_v59 = vpop.permute.xlu1 %2480  ;;  %3341 = vmatpush1.bf16.msra.mxu1 %v3340_v7 }
 0xc9c   :  { %v2483_v58 = vpop.permute.xlu0 %2482  ;;  %v2485_v11 = vsel %vm1800_vm4, %v2479_v8, %v2481_v59 }
 0xc9d   :  { %v2484_v1 = vsel %vm1800_vm4, %v2481_v59, %v2483_v58  ;;  %v2487_v15 = vsel %vm1800_vm4, %v2483_v58, %v2477_v29  ;;  %v2489_v49 = vmul.f32 %v2485_v11, %v5030_v2  ;;  %v5673_v29 = vlaneseq }
 0xc9e   :  { %v2490_v34 = vmul.f32 %v2484_v1, %v5061_v39  ;;  %v2491_v42 = vmul.f32 %v2487_v15, %v5056_v46 }
 0xc9f   :  { %v2493_v32 = vpop.permute.xlu1 %2492 }
 0xca0   :  { %v2495_v33 = vpop.permute.xlu0 %2494 }
 0xca1   :  { %v2502_v12 = vsel %vm1849_vm5, %v2493_v32, %v2495_v33 }
 0xca2   :  { %v2504_v4 = vmul.f32 %v2502_v12, %v5084_v45 }
 0xca3   :  { %v2497_v25 = vpop.permute.xlu1 %2496 }
 0xca4   :  { %v2501_v30 = vsel %vm1849_vm5, %v2495_v33, %v2497_v25  ;;  %v2499_v9 = vpop.permute.xlu0 %2498  ;;  %v3328_v10 = vpack.c.bf16 %v2504_v4, %v2488_v26 }
 0xca5   :  { %v2505_v57 = vmul.f32 %v2501_v30, %v5098_v35  ;;  %v2500_v5 = vsel %vm1849_vm5, %v2497_v25, %v2499_v9  ;;  %v2503_v3 = vsel %vm1849_vm5, %v2499_v9, %v2493_v32 }
 0xca6   :  { %v2506_v45 = vmul.f32 %v2500_v5, %v5120_v14  ;;  %v2507_v41 = vmul.f32 %v2503_v3, %v5109_v19 }
 0xca7   :  { %v2509_v47 = vpop.permute.xlu1 %2508  ;;  %v3326_v24 = vpack.c.bf16 %v2505_v57, %v2489_v49 }
 0xca8   :  { %v3344_v2 = vpack.c.bf16 %v2506_v45, %v2490_v34  ;;  %v2511_v53 = vpop.permute.xlu0 %2510  ;;  %v3342_v35 = vpack.c.bf16 %v2507_v41, %v2491_v42 }
 0xca9   :  { %3327 = vmatprep.subr.bf16.mxu0 %v3326_v24  ;;  %v2518_v17 = vsel %vm1898_vm6, %v2509_v47, %v2511_v53 }
 0xcaa   :  { %3329 = vmatpush1.bf16.msra.mxu0 %v3328_v10  ;;  %3343 = vmatprep.subr.bf16.mxu1 %v3342_v35  ;;  %v2520_v28 = vmul.f32 %v5143_v6, %v2518_v17 }
 0xcab   :  { %v2513_v43 = vpop.permute.xlu1 %2512  ;;  %3345 = vmatpush1.bf16.msra.mxu1 %v3344_v2 }
 0xcac   :  { %v2517_v46 = vsel %vm1898_vm6, %v2511_v53, %v2513_v43  ;;  %v2515_v39 = vpop.permute.xlu0 %2514 }
 0xcad   :  { %v2521_v19 = vmul.f32 %v5148_v54, %v2517_v46  ;;  %v2516_v14 = vsel %vm1898_vm6, %v2513_v43, %v2515_v39  ;;  %v2519_v31 = vsel %vm1898_vm6, %v2515_v39, %v2509_v47  ;;  %v2683_v54 = vunpack.c.l.s4 %v3686_v37 }
 0xcae   :  { %v2522_v56 = vmul.f32 %v5162_v61, %v2516_v14  ;;  %v2523_v60 = vmul.f32 %v5164_v36, %v2519_v31 }
 0xcaf   :  { %2550 = vmatprep.subr.mxu0 %v2521_v19  ;;  %v2684_v63 = vunpack.c.0.s8 %v2683_v54 }
 0xcb0   :  { %2551 = vmatpush1.msra.mxu0 %v2520_v28  ;;  %2621 = vmatprep.subr.mxu1 %v2523_v60 }
 0xcb1   :  { %2750 = vmatmul.mubr.msk.f32.vlgmr.msra.gmra.mrb[20].mxu0 %vm1218_vm13, %v2524_v62  ;;  %2622 = vmatpush1.msra.mxu1 %v2522_v56  ;;  %v2687_v22 = vsub.s32 %v2684_v63, %v5672_v23 }
 0xcb2   :  { %2751 = vmatmul.mubr.msk.f32.vlgmr.msra.gmra.mrb[22].mxu1 %vm1218_vm13, %v2524_v62  ;;  %vm2707_vm13 = vcmp.lt.s32.totalorder %v5673_v29, 512 }
 0xcbc   :  { %v2529_v6 = vpop.permute.xlu1 %2528 }
 0xd84   :  { %v2600_v52 = vpop.f32.mrb[20].mxu0 }
 0xd85   :  { %v2601_v61 = vadd.f32 %v2600_v52, %v2529_v6  ;;  %v2602_v18 = vpop.f32.mrb[21].mxu0  ;;  %v2671_v36 = vpop.f32.mrb[22].mxu1 }
 0xd86   :  { %v2603_v21 = vadd.f32 %v2602_v18, %v2529_v6  ;;  %v2672_v13 = vadd.f32 %v2671_v36, %v2529_v6  ;;  %v2673_v44 = vpop.f32.mrb[23].mxu1 }
 0xd87   :  { %v2674_v40 = vadd.f32 %v2673_v44, %v2529_v6 }
 0xd88   :  { %v2680_v51 = vcombine.low %v2601_v61, %v2603_v21 }
 0xd89   :  { %v2681_v55 = vcombine.low %v2672_v13, %v2674_v40 }
 0xd8a   :  { %v2688_v0 = vrot.slane %v2680_v51, %v2687_v22 }
 0xd8b   :  { %v2695_v16 = vrot.slane %v2681_v55, %v2687_v22 }
 0xd8d   :  { %v2696_v20 = vcombine.low %v2688_v0, %v2695_v16 }
 0xd8f   :  { %v2703_v50 = vrot.slane %v2696_v20, %v2687_v22 }
 0xd91   :  { %2709 = vst.msk [vmem:[#allocation19] sm:$0xf] %vm2707_vm13, %v2703_v50 }
 0xd92   :  { %3621 = shalt.err (!%p3618_p0)
}
 0xd93   :  { %s5674_s20 = sld [smem:[#allocation49_spill]] }
 0xd99   :  { %s3622_s4 = scalar_lea.hbm %s5674_s20, 64 }
 0xd9a   :  { %p3623_p1 = scmp.ne.s32.totalorder %s5674_s20, %s3622_s4  ;;  %p3626_p2 = scmp.lt.u32.totalorder %s3622_s4, %s5674_s20 }
 0xd9c   :  { %p3628_p3 = pnand %p3626_p2, %p3623_p1 }
 0xd9e   :  { %3631 = shalt.err (!%p3628_p3)
}
 0xd9f   :  { %2719 = dma.vmem_to_hbm [thread:$0]  %s2717_s6, 64, %s5674_s20, [#allocation4]  }
 0xda0   :  { %3644 = dma.done.wait [#allocation4], 64  }
 0xda1   :  { %3645 = vsyncadd [#allocation4], 4294967232 }
 0xda2   :  { %2723 = vsyncpa [#allocation3], 1 }
 0xda3   :  { %2724 = vsyncpa [#allocation6], 1 }
 0xda4   :  { %2725 = vsyncpa [#allocation9], 1 }
 0xda5   :  { %2726 = vsyncpa [#allocation12], 1 }
 0xda6   :  { %2727 = vsyncpa [#allocation15], 1 }
 0xda7   :  { %2728 = vsyncpa [#allocation18], 1 }
 0xda8   :  { %2729 = vsyncpa [#allocation4], 1 }

</bundles_post_ra>
